<compile_context>
chip_gen: v7x
topology: tpu7x:2x2x1
jax: 0.10.0
libtpu: 0.0.40
codegen_flags: <defaults>
</compile_context>

<pallas_src>
import jax
import jax.numpy as jnp
from jax import lax
from jax.experimental import pallas as pl
from jax.experimental.pallas import tpu as pltpu

HEAD_PAD = 128  # fused policy(9) | value(1) | zero padding -> lane-dense output


def _pick_tile_b():
    """Batch tile: MXU-native rows per generation (128 on v5e, 256 on v6e/v7x)."""
    try:
        kind = jax.devices()[0].device_kind.lower()
    except Exception:
        return 128
    if "v6" in kind or "v7" in kind:
        return 256
    return 128


TILE_B = _pick_tile_b()


# ----------------------------------------------------------------------------
# Pallas kernel: batched FC stack + fused policy/value head.
# ----------------------------------------------------------------------------
def fc_head_kernel(acts_ref,            # (TILE_B, 4)      f32  fc1 inputs
                   fc1w_ref, fc1b_ref,  # (4, 1024) bf16,  (1, 1024) f32
                   fc2w_ref, fc2b_ref,  # (1024, 512) bf16,(1, 512)  f32
                   headw_ref, headb_ref,# (512, 128) f32,  (1, 128)  f32
                   out_ref):            # (TILE_B, 128)    f32
    a = acts_ref[...]                                                  # (B, 4)
    # fc1 + ReLU (bf16 weights, f32 accumulation)
    f1 = jnp.dot(a, fc1w_ref[...].astype(jnp.float32),
                 preferred_element_type=jnp.float32) + fc1b_ref[...]   # (B, 1024)
    f1 = jnp.maximum(f1, 0.0)
    # fc2 + ReLU
    f2 = jnp.dot(f1, fc2w_ref[...].astype(jnp.float32),
                 preferred_element_type=jnp.float32) + fc2b_ref[...]   # (B, 512)
    f2 = jnp.maximum(f2, 0.0)
    # Fused policy|value head: one lane-dense matmul + unmasked store.
    out_ref[...] = jnp.dot(f2, headw_ref[...],
                           preferred_element_type=jnp.float32) + headb_ref[...]


def _fc_head_pallas(acts, params):
    """acts: (B, 4) f32 -> (B, HEAD_PAD) fused head pre-activations."""
    B = acts.shape[0]
    nb = (B + TILE_B - 1) // TILE_B
    Bp = nb * TILE_B
    if Bp != B:
        acts = jnp.pad(acts, ((0, Bp - B), (0, 0)))

    flops = 2 * Bp * (4 * 1024 + 1024 * 512 + 512 * HEAD_PAD)
    bytes_accessed = (params["fc1w"].size * 2 + params["fc2w"].size * 2
                      + params["headw"].size * 4
                      + (1024 + 512 + HEAD_PAD) * 4
                      + Bp * 4 * 4 + Bp * HEAD_PAD * 4)

    const = lambda i: (0, 0)   # weights/biases: same block every step -> VMEM resident
    batch = lambda i: (i, 0)   # activations/outputs: blocked over batch tiles

    head = pl.pallas_call(
        fc_head_kernel,
        out_shape=jax.ShapeDtypeStruct((Bp, HEAD_PAD), jnp.float32),
        grid=(nb,),
        in_specs=[
            pl.BlockSpec((TILE_B, 4), batch),
            pl.BlockSpec((4, 1024), const),
            pl.BlockSpec((1, 1024), const),
            pl.BlockSpec((1024, 512), const),
            pl.BlockSpec((1, 512), const),
            pl.BlockSpec((512, HEAD_PAD), const),
            pl.BlockSpec((1, HEAD_PAD), const),
        ],
        out_specs=pl.BlockSpec((TILE_B, HEAD_PAD), batch),
        compiler_params=pltpu.CompilerParams(
            dimension_semantics=("parallel",)),
        cost_estimate=pl.CostEstimate(flops=flops, transcendentals=0,
                                      bytes_accessed=bytes_accessed),
    )(acts, params["fc1w"], params["fc1b"], params["fc2w"], params["fc2b"],
      params["headw"], params["headb"])
    return head[:B]


# ----------------------------------------------------------------------------
# Tiny conv pre-pass (wrapper / VPU): conv1(2x2)+ReLU, conv2(1x1)+ReLU.
# max_pool2d(kernel=1) is the identity and is dropped.
# ----------------------------------------------------------------------------
def conv_prepass(x, params):
    """x: (B, 13, 3, 3) NCHW -> (B, 4) fc1 inputs (== x[0][0].flatten() per sample)."""
    x = x.astype(jnp.float32)
    B = x.shape[0]
    # im2col for a 2x2 / stride-1 conv on 3x3 input: 4 output positions,
    # patch order (c, kh, kw), positions row-major.
    cols = jnp.stack([x[:, :, i:i + 2, j:j + 2].reshape(B, 52)
                      for i in range(2) for j in range(2)], axis=-1)    # (B, 52, 4)
    h1 = jnp.einsum("ok,bkp->bop", params["c1w"], cols) \
        + params["c1b"][None, :, None]                                  # (B, 2, 4)
    h1 = jnp.maximum(h1, 0.0)
    h2 = jnp.einsum("oc,bcp->bop", params["c2w"], h1) \
        + params["c2b"][None, :, None]                                  # (B, 1, 4)
    h2 = jnp.maximum(h2, 0.0)
    return h2[:, 0, :]                                                  # (B, 4)


# ----------------------------------------------------------------------------
# Public forwards.
# ----------------------------------------------------------------------------
@jax.jit
def network_forward(x, params):
    """Exact module semantics: x is (1, 13, 3, 3) (or (13, 3, 3)); returns
    policy (9,) and value (1,)."""
    if x.ndim == 3:
        x = x[None]
    acts = conv_prepass(x[:1], params)            # x[0][0].flatten() -> (1, 4)
    head = _fc_head_pallas(acts, params)          # (1, HEAD_PAD)
    policy = head[0, :9]
    value = jnp.tanh(head[0, 9:10])
    return policy, value


@jax.jit
def network_forward_batch(xs, params):
    """Throughput path: apply the module's per-sample forward to B boards."""
    acts = conv_prepass(xs, params)               # (B, 4)
    head = _fc_head_pallas(acts, params)          # (B, HEAD_PAD)
    return head[:, :9], jnp.tanh(head[:, 9:10])


# ----------------------------------------------------------------------------
# Parameters (mirror PyTorch default U(-1/sqrt(fan_in), 1/sqrt(fan_in)) init).
# ----------------------------------------------------------------------------
def init_params(key):
    def uni(k, shape, fan_in):
        b = 1.0 / jnp.sqrt(jnp.array(fan_in, jnp.float32))
        return jax.random.uniform(k, shape, jnp.float32, -b, b)

    ks = jax.random.split(key, 12)
    p = {}
    # conv1: Conv2d(13, 2, 2) -> (2, 52) matrix, (2,) bias.
    p["c1w"] = uni(ks[0], (2, 13, 2, 2), 13 * 2 * 2).reshape(2, 52)
    p["c1b"] = uni(ks[1], (2,), 13 * 2 * 2)
    # conv2: Conv2d(2, 1, 1) -> (1, 2) matrix, (1,) bias.
    p["c2w"] = uni(ks[2], (1, 2, 1, 1), 2).reshape(1, 2)
    p["c2b"] = uni(ks[3], (1,), 2)
    # fc1: Linear(4, 1024) -> (in, out), bf16 storage.
    p["fc1w"] = uni(ks[4], (1024, 4), 4).T.astype(jnp.bfloat16)
    p["fc1b"] = uni(ks[5], (1, 1024), 4)
    # fc2: Linear(1024, 512), bf16 storage.
    p["fc2w"] = uni(ks[6], (512, 1024), 1024).T.astype(jnp.bfloat16)
    p["fc2b"] = uni(ks[7], (1, 512), 1024)
    # heads (kept in f32): policy Linear(512, 9), value Linear(512, 1).
    polw = uni(ks[8], (9, 512), 512).T            # (512, 9)
    polb = uni(ks[9], (9,), 512)
    valw = uni(ks[10], (1, 512), 512).T           # (512, 1)
    valb = uni(ks[11], (1,), 512)
    p["polw"], p["polb"], p["valw"], p["valb"] = polw, polb, valw, valb
    # Fused, lane-dense head: columns 0:9 = policy, 9 = value, rest = 0.
    p["headw"] = jnp.concatenate(
        [polw, valw, jnp.zeros((512, HEAD_PAD - 10), jnp.float32)], axis=1)
    p["headb"] = jnp.concatenate(
        [polb, valb, jnp.zeros((HEAD_PAD - 10,), jnp.float32)]).reshape(1, HEAD_PAD)
    return p


# ----------------------------------------------------------------------------
# Pure-JAX/XLA reference mirroring the PyTorch forward (no Pallas, real convs).
# ----------------------------------------------------------------------------
def reference_forward(x, params):
    x = x.astype(jnp.float32)
    w1 = params["c1w"].reshape(2, 13, 2, 2)
    h = lax.conv_general_dilated(x, w1, (1, 1), "VALID",
                                 dimension_numbers=("NCHW", "OIHW", "NCHW"))
    h = jnp.maximum(h + params["c1b"].reshape(1, 2, 1, 1), 0.0)   # pool(k=1) = id
    w2 = params["c2w"].reshape(1, 2, 1, 1)
    h = lax.conv_general_dilated(h, w2, (1, 1), "VALID",
                                 dimension_numbers=("NCHW", "OIHW", "NCHW"))
    h = jnp.maximum(h + params["c2b"].reshape(1, 1, 1, 1), 0.0)
    v = h[0, 0].reshape(-1)                                        # (4,)
    f1 = jnp.maximum(v @ params["fc1w"].astype(jnp.float32) + params["fc1b"][0], 0.0)
    f2 = jnp.maximum(f1 @ params["fc2w"].astype(jnp.float32) + params["fc2b"][0], 0.0)
    pol = f2 @ params["polw"] + params["polb"]                     # (9,)
    val = jnp.tanh(f2 @ params["valw"][:, 0] + params["valb"])     # (1,)
    return pol, val


if __name__ == "__main__":
    key = jax.random.PRNGKey(0)
    k_x, k_b, k_p = jax.random.split(key, 3)
    params = init_params(k_p)

    # --- Single-sample path (exact module semantics: NCHW batch-1 input). ---
    x = jax.random.normal(k_x, (1, 13, 3, 3), dtype=jnp.float32)
    policy, value = network_forward(x, params)
    jax.block_until_ready((policy, value))
    ref_policy, ref_value = reference_forward(x, params)
    assert policy.shape == (9,) and value.shape == (1,)
    assert jnp.allclose(policy, ref_policy, atol=1e-3, rtol=1e-3)
    assert jnp.allclose(value, ref_value, atol=1e-3, rtol=1e-3)

    # --- Batched throughput path: B independent boards through one kernel. ---
    B = 8
    xs = jax.random.normal(k_b, (B, 13, 3, 3), dtype=jnp.float32)
    pol_b, val_b = network_forward_batch(xs, params)
    jax.block_until_ready((pol_b, val_b))
    assert pol_b.shape == (B, 9) and val_b.shape == (B, 1)
    for b in range(B):
        rp, rv = reference_forward(xs[b:b + 1], params)
        assert jnp.allclose(pol_b[b], rp, atol=1e-3, rtol=1e-3)
        assert jnp.allclose(val_b[b], rv, atol=1e-3, rtol=1e-3)

    print("KERNEL_OK")
</pallas_src>

<mosaic_0001>
module attributes {stable_mosaic.version = 11 : i64} {
  func.func @fc_head_kernel(%arg0: i32, %arg1: memref<128x4xf32, #tpu.memory_space<vmem>>, %arg2: memref<4x1024xbf16, #tpu.memory_space<vmem>>, %arg3: memref<1x1024xf32, #tpu.memory_space<vmem>>, %arg4: memref<1024x512xbf16, #tpu.memory_space<vmem>>, %arg5: memref<1x512xf32, #tpu.memory_space<vmem>>, %arg6: memref<512x128xf32, #tpu.memory_space<vmem>>, %arg7: memref<1x128xf32, #tpu.memory_space<vmem>>, %arg8: memref<128x128xf32, #tpu.memory_space<vmem>>) attributes {dimension_semantics = [#tpu.dimension_semantics<parallel>], iteration_bounds = array<i64: 1>, scalar_prefetch = 0 : i64, scratch_operands = 0 : i64, tpu.core_type = #tpu.core_type<tc>, window_params = [{transform_indices = @transform_0, window_bounds = array<i64: 128, 4>}, {pipeline_mode = #tpu.pipeline_mode<synchronous>, transform_indices = @transform_1, window_bounds = array<i64: 4, 1024>}, {pipeline_mode = #tpu.pipeline_mode<synchronous>, transform_indices = @transform_2, window_bounds = array<i64: 1, 1024>}, {pipeline_mode = #tpu.pipeline_mode<synchronous>, transform_indices = @transform_3, window_bounds = array<i64: 1024, 512>}, {pipeline_mode = #tpu.pipeline_mode<synchronous>, transform_indices = @transform_4, window_bounds = array<i64: 1, 512>}, {pipeline_mode = #tpu.pipeline_mode<synchronous>, transform_indices = @transform_5, window_bounds = array<i64: 512, 128>}, {pipeline_mode = #tpu.pipeline_mode<synchronous>, transform_indices = @transform_6, window_bounds = array<i64: 1, 128>}, {transform_indices = @transform_7, window_bounds = array<i64: 128, 128>}]} {
    %c0 = arith.constant 0 : index
    %c0_0 = arith.constant 0 : index
    %0 = vector.load %arg1[%c0, %c0_0] : memref<128x4xf32, #tpu.memory_space<vmem>>, vector<128x4xf32>
    %c0_1 = arith.constant 0 : index
    %c0_2 = arith.constant 0 : index
    %1 = vector.load %arg2[%c0_1, %c0_2] : memref<4x1024xbf16, #tpu.memory_space<vmem>>, vector<4x1024xbf16>
    %2 = arith.extf %1 : vector<4x1024xbf16> to vector<4x1024xf32>
    %cst = arith.constant dense<0.000000e+00> : vector<128x1024xf32>
    %3 = tpu.matmul %0, %2, %cst {dimension_numbers = #tpu.dot_dimension_numbers<[1], [0], [0], [1], [0, 0, 1, 1], [], []>} : vector<128x4xf32>, vector<4x1024xf32>, vector<128x1024xf32> -> vector<128x1024xf32>
    %c0_3 = arith.constant 0 : index
    %c0_4 = arith.constant 0 : index
    %4 = vector.load %arg3[%c0_3, %c0_4] : memref<1x1024xf32, #tpu.memory_space<vmem>>, vector<1x1024xf32>
    %5 = vector.broadcast %4 : vector<1x1024xf32> to vector<128x1024xf32>
    %6 = arith.addf %3, %5 : vector<128x1024xf32>
    %cst_5 = arith.constant 0.000000e+00 : f32
    %7 = vector.broadcast %cst_5 : f32 to vector<128x1024xf32>
    %8 = arith.maximumf %6, %7 : vector<128x1024xf32>
    %c0_6 = arith.constant 0 : index
    %c0_7 = arith.constant 0 : index
    %9 = vector.load %arg4[%c0_6, %c0_7] : memref<1024x512xbf16, #tpu.memory_space<vmem>>, vector<1024x512xbf16>
    %10 = arith.extf %9 : vector<1024x512xbf16> to vector<1024x512xf32>
    %cst_8 = arith.constant dense<0.000000e+00> : vector<128x512xf32>
    %11 = tpu.matmul %8, %10, %cst_8 {dimension_numbers = #tpu.dot_dimension_numbers<[1], [0], [0], [1], [0, 0, 1, 1], [], []>} : vector<128x1024xf32>, vector<1024x512xf32>, vector<128x512xf32> -> vector<128x512xf32>
    %c0_9 = arith.constant 0 : index
    %c0_10 = arith.constant 0 : index
    %12 = vector.load %arg5[%c0_9, %c0_10] : memref<1x512xf32, #tpu.memory_space<vmem>>, vector<1x512xf32>
    %13 = vector.broadcast %12 : vector<1x512xf32> to vector<128x512xf32>
    %14 = arith.addf %11, %13 : vector<128x512xf32>
    %cst_11 = arith.constant 0.000000e+00 : f32
    %15 = vector.broadcast %cst_11 : f32 to vector<128x512xf32>
    %16 = arith.maximumf %14, %15 : vector<128x512xf32>
    %c0_12 = arith.constant 0 : index
    %c0_13 = arith.constant 0 : index
    %17 = vector.load %arg6[%c0_12, %c0_13] : memref<512x128xf32, #tpu.memory_space<vmem>>, vector<512x128xf32>
    %cst_14 = arith.constant dense<0.000000e+00> : vector<128x128xf32>
    %18 = tpu.matmul %16, %17, %cst_14 {dimension_numbers = #tpu.dot_dimension_numbers<[1], [0], [0], [1], [0, 0, 1, 1], [], []>} : vector<128x512xf32>, vector<512x128xf32>, vector<128x128xf32> -> vector<128x128xf32>
    %c0_15 = arith.constant 0 : index
    %c0_16 = arith.constant 0 : index
    %19 = vector.load %arg7[%c0_15, %c0_16] : memref<1x128xf32, #tpu.memory_space<vmem>>, vector<1x128xf32>
    %20 = vector.broadcast %19 : vector<1x128xf32> to vector<128x128xf32>
    %21 = arith.addf %18, %20 : vector<128x128xf32>
    %c0_17 = arith.constant 0 : index
    %c0_18 = arith.constant 0 : index
    %22 = vector.load %arg8[%c0_17, %c0_18] : memref<128x128xf32, #tpu.memory_space<vmem>>, vector<128x128xf32>
    tpu.vector_store %arg8[%c0_17, %c0_18], %21 {strides = array<i32>} : memref<128x128xf32, #tpu.memory_space<vmem>>, vector<128x128xf32>,
    return
  }
  func.func @transform_0(%arg0: i32) -> (i32, i32) {
    %c0_i32 = arith.constant 0 : i32
    %c0_i32_0 = arith.constant 0 : i32
    return %arg0, %c0_i32 : i32, i32
  }
  func.func @transform_1(%arg0: i32) -> (i32, i32) {
    %c0_i32 = arith.constant 0 : i32
    %c0_i32_0 = arith.constant 0 : i32
    %c0_i32_1 = arith.constant 0 : i32
    return %c0_i32, %c0_i32_0 : i32, i32
  }
  func.func @transform_2(%arg0: i32) -> (i32, i32) {
    %c0_i32 = arith.constant 0 : i32
    %c0_i32_0 = arith.constant 0 : i32
    %c0_i32_1 = arith.constant 0 : i32
    return %c0_i32, %c0_i32_0 : i32, i32
  }
  func.func @transform_3(%arg0: i32) -> (i32, i32) {
    %c0_i32 = arith.constant 0 : i32
    %c0_i32_0 = arith.constant 0 : i32
    %c0_i32_1 = arith.constant 0 : i32
    return %c0_i32, %c0_i32_0 : i32, i32
  }
  func.func @transform_4(%arg0: i32) -> (i32, i32) {
    %c0_i32 = arith.constant 0 : i32
    %c0_i32_0 = arith.constant 0 : i32
    %c0_i32_1 = arith.constant 0 : i32
    return %c0_i32, %c0_i32_0 : i32, i32
  }
  func.func @transform_5(%arg0: i32) -> (i32, i32) {
    %c0_i32 = arith.constant 0 : i32
    %c0_i32_0 = arith.constant 0 : i32
    %c0_i32_1 = arith.constant 0 : i32
    return %c0_i32, %c0_i32_0 : i32, i32
  }
  func.func @transform_6(%arg0: i32) -> (i32, i32) {
    %c0_i32 = arith.constant 0 : i32
    %c0_i32_0 = arith.constant 0 : i32
    %c0_i32_1 = arith.constant 0 : i32
    return %c0_i32, %c0_i32_0 : i32, i32
  }
  func.func @transform_7(%arg0: i32) -> (i32, i32) {
    %c0_i32 = arith.constant 0 : i32
    %c0_i32_0 = arith.constant 0 : i32
    return %arg0, %c0_i32 : i32, i32
  }
}

</mosaic_0001>

<bundles_post_ra>
// kernel: network_forward.1
= control target key start
LH: loop header
LB: loop body
LE: loop exit
PB: predicated region body
PF: predicated region fallthrough
CT: control target
= control target key end

     0   :  { %12 = vsyncpa [#allocation3], 0  ;;  %s5208_s24 = smov [#allocation2]   ;;  %s6362_s0 = inlined_call_operand.vmem [shape: f32[128,4], index: 0, kind: input, shape index: {}]   ;;  %s6363_s1 = inlined_call_operand.vmem [shape: bf16[4,1024], index: 1, kind: input, shape index: {}]   ;;  %s6364_s2 = inlined_call_operand.vmem [shape: f32[1,1024], index: 2, kind: input, shape index: {}]   ;;  %s6365_s3 = inlined_call_operand.hbm [shape: bf16[1024,512], index: 3, kind: input, shape index: {}]   ;;  %s6366_s4 = inlined_call_operand.vmem [shape: f32[1,512], index: 4, kind: input, shape index: {}]   ;;  %s6367_s5 = inlined_call_operand.vmem [shape: f32[512,128], index: 5, kind: input, shape index: {}]   ;;  %s6368_s6 = inlined_call_operand.vmem [shape: f32[1,128], index: 6, kind: input, shape index: {}]   ;;  %s6369_s7 = inlined_call_operand.vmem [shape: f32[128,128], index: 7, kind: output, shape index: {}]  }
   0x1   :  { %s24_s25 = sshll.u32 %s5208_s24, 4  ;;  %s5184_s28 = scalar_lea.hbm %s6365_s3, 32768  ;;  %s25_s25 = int_to_ptr.vmem [resolvable:$true] %s24_s25 }
   0x2   :  { %p5185_p0 = scmp.ne.s32.totalorder %s6365_s3, %s5184_s28  ;;  %p5188_p1 = scmp.lt.u32.totalorder %s5184_s28, %s6365_s3 }
   0x4   :  { %p5190_p2 = pnand %p5188_p1, %p5185_p0 }
   0x6   :  { %5193 = shalt.err (!%p5190_p2)
}
   0x7   :  { %s5194_s10 = scalar_lea.vmem %s25_s25, 32768  ;;  %p5199_p4 = scmp.lt.s32.totalorder %s25_s25, %s25_s25 }
   0x8   :  { %p5195_p3 = scmp.ne.s32.totalorder %s25_s25, %s5194_s10  ;;  %p5200_p5 = scmp.lt.s32.totalorder %s5194_s10, %s5194_s10 }
   0xa   :  { %p5201_p6 = por %p5200_p5, %p5199_p4 }
   0xc   :  { %p5202_p7 = pnand %p5201_p6, %p5195_p3 }
   0xe   :  { %5205 = shalt.err (!%p5202_p7)
}
   0xf   :  { %s5209_s11 = smov 256   ;;  %s5210_s12 = smov 16  }
  0x10   :  { %30 = dma.hbm_to_vmem [thread:$0]  %s6365_s3, 32768, %s25_s25, [#allocation3], %s5209_s11, %s5209_s11, %s5210_s12  }
  0x11   :  { %5206 = dma.done.wait [#allocation3], 32768  }
  0x12   :  { %5207 = vsyncadd [#allocation3], 4294934528  ;;  %v5211_v0 = vmov 0.0   ;;  %v56_v1 = vld [vmem:[%s6363_s1] sm:$0xff]  ;;  %vm161_vm0 = vcmask 1043456   ;;  %vm112_vm1 = vcmask 31744  }
  0x13   :  { %242 = vmatprep.mubr.f32.mxu0 %v5211_v0  ;;  %403 = vmatprep.mubr.f32.mxu1 %v5211_v0  ;;  %v58_v2 = vunpack.c.l.bf16 %v56_v1  ;;  %v59_v3 = vunpack.c.h.bf16 %v56_v1  ;;  %v5272_v6 = vld [vmem:[%s6362_s0] sm:$0xff]  ;;  %v57_v7 = vld [vmem:[%s6363_s1 + $0x8] sm:$0xff]  ;;  %v5302_v15 = vld [vmem:[%s6362_s0 + $0x10] sm:$0xff] }
  0x14   :  { %v60_v8 = vunpack.c.l.bf16 %v57_v7  ;;  %v61_v9 = vunpack.c.h.bf16 %v57_v7  ;;  %v5289_v10 = vld [vmem:[%s6362_s0 + $0x8] sm:$0xff]  ;;  %v4799_v13 = vld [vmem:[#allocation2 + $0x4] ss:$16 sps:$4 sm:$0xff]   ;;  %v5315_v16 = vld [vmem:[%s6362_s0 + $0x18] sm:$0xff] }
  0x15   :  { %v108_v4 = vcombine.high %v58_v2, %v58_v2  ;;  %v109_v5 = vcombine.high %v59_v3, %v59_v3  ;;  %v4802_v14 = vld [vmem:[#allocation2 + $0xc] ss:$16 sps:$4 sm:$0xff]   ;;  %v5326_v17 = vld [vmem:[%s6362_s0 + $0x20] sm:$0xff]  ;;  %v5348_v19 = vld [vmem:[%s6362_s0 + $0x30] sm:$0xff] }
  0x16   :  { %v110_v11 = vcombine.high %v60_v8, %v60_v8  ;;  %v111_v12 = vcombine.high %v61_v9, %v61_v9  ;;  %v5337_v18 = vld [vmem:[%s6362_s0 + $0x28] sm:$0xff]  ;;  %v5359_v20 = vld [vmem:[%s6362_s0 + $0x38] sm:$0xff]  ;;  %v5370_v21 = vld [vmem:[%s6362_s0 + $0x40] sm:$0xff] }
  0x17   :  { %3474 = vmatprep.subr.msk.mxu0 %vm161_vm0, %v108_v4  ;;  %3492 = vmatprep.subr.msk.mxu1 %vm161_vm0, %v109_v5  ;;  %v5381_v22 = vld [vmem:[%s6362_s0 + $0x48] sm:$0xff]  ;;  %v5392_v23 = vld [vmem:[%s6362_s0 + $0x50] sm:$0xff]  ;;  %v5398_v24 = vld [vmem:[%s6362_s0 + $0x58] sm:$0xff] }
  0x18   :  { %3475 = vmatpush1.msk.msra.mxu0 %vm161_vm0, %v58_v2  ;;  %3493 = vmatpush1.msk.msra.mxu1 %vm161_vm0, %v59_v3  ;;  %v5409_v25 = vld [vmem:[%s6362_s0 + $0x60] sm:$0xff]  ;;  %v5420_v26 = vld [vmem:[%s6362_s0 + $0x68] sm:$0xff]  ;;  %v5431_v27 = vld [vmem:[%s6362_s0 + $0x70] sm:$0xff] }
  0x19   :  { %3476 = vmatmul.mubr.msk.f32.vlgmr.msra.gmra.mrb[0].mxu0 %vm112_vm1, %v5272_v6  ;;  %3494 = vmatmul.mubr.msk.f32.vlgmr.msra.gmra.mrb[0].mxu1 %vm112_vm1, %v5272_v6  ;;  %v5442_v28 = vld [vmem:[%s6362_s0 + $0x78] sm:$0xff]  ;;  %v4801_v29 = vld [vmem:[#allocation2] ss:$16 sps:$4 sm:$0xff]   ;;  %v4805_v31 = vld [vmem:[#allocation2 + $0x24] ss:$16 sps:$4 sm:$0xff]  }
  0x1a   :  { %248 = vmatprep.mubr.f32.mxu0 %v5211_v0  ;;  %409 = vmatprep.mubr.f32.mxu1 %v5211_v0  ;;  %v4804_v30 = vld [vmem:[#allocation2 + $0x8] ss:$16 sps:$4 sm:$0xff]   ;;  %v4808_v32 = vld [vmem:[#allocation2 + $0x2c] ss:$16 sps:$4 sm:$0xff]   ;;  %v4807_v33 = vld [vmem:[#allocation2 + $0x20] ss:$16 sps:$4 sm:$0xff]  }
  0x1b   :  { %3510 = vmatprep.subr.msk.mxu0 %vm161_vm0, %v110_v11  ;;  %3528 = vmatprep.subr.msk.mxu1 %vm161_vm0, %v111_v12  ;;  %v4810_v34 = vld [vmem:[#allocation2 + $0x28] ss:$16 sps:$4 sm:$0xff]   ;;  %v4811_v35 = vld [vmem:[#allocation2 + $0x44] ss:$16 sps:$4 sm:$0xff]   ;;  %v4814_v36 = vld [vmem:[#allocation2 + $0x4c] ss:$16 sps:$4 sm:$0xff]  }
  0x1c   :  { %3511 = vmatpush1.msk.msra.mxu0 %vm161_vm0, %v60_v8  ;;  %3529 = vmatpush1.msk.msra.mxu1 %vm161_vm0, %v61_v9  ;;  %v4813_v37 = vld [vmem:[#allocation2 + $0x40] ss:$16 sps:$4 sm:$0xff]   ;;  %v4816_v38 = vld [vmem:[#allocation2 + $0x48] ss:$16 sps:$4 sm:$0xff]   ;;  %v4817_v39 = vld [vmem:[#allocation2 + $0x64] ss:$16 sps:$4 sm:$0xff]  }
  0x1d   :  { %3477 = vmatmul.mubr.msk.f32.gmra.mrb[2].mxu0 %vm112_vm1, %v5289_v10  ;;  %3495 = vmatmul.mubr.msk.f32.gmra.mrb[2].mxu1 %vm112_vm1, %v5289_v10  ;;  %v4820_v40 = vld [vmem:[#allocation2 + $0x6c] ss:$16 sps:$4 sm:$0xff]   ;;  %v4819_v41 = vld [vmem:[#allocation2 + $0x60] ss:$16 sps:$4 sm:$0xff]   ;;  %v4822_v42 = vld [vmem:[#allocation2 + $0x68] ss:$16 sps:$4 sm:$0xff]  }
  0x1e   :  { %254 = vmatprep.mubr.f32.mxu0 %v5211_v0  ;;  %415 = vmatprep.mubr.f32.mxu1 %v5211_v0  ;;  %v4823_v43 = vld [vmem:[#allocation2 + $0x84] ss:$16 sps:$4 sm:$0xff]   ;;  %v4826_v44 = vld [vmem:[#allocation2 + $0x8c] ss:$16 sps:$4 sm:$0xff]   ;;  %v4825_v45 = vld [vmem:[#allocation2 + $0x80] ss:$16 sps:$4 sm:$0xff]  }
  0x1f   :  { %3708 = vmatprep.subr.bf16.mxu0 %v4799_v13  ;;  %3964 = vmatprep.subr.bf16.mxu1 %v4802_v14  ;;  %v4828_v46 = vld [vmem:[#allocation2 + $0x88] ss:$16 sps:$4 sm:$0xff]   ;;  %v4829_v47 = vld [vmem:[#allocation2 + $0xa4] ss:$16 sps:$4 sm:$0xff]   ;;  %v4832_v48 = vld [vmem:[#allocation2 + $0xac] ss:$16 sps:$4 sm:$0xff]  }
  0x20   :  { %v4831_v49 = vld [vmem:[#allocation2 + $0xa0] ss:$16 sps:$4 sm:$0xff]   ;;  %v4834_v50 = vld [vmem:[#allocation2 + $0xa8] ss:$16 sps:$4 sm:$0xff]   ;;  %v4835_v51 = vld [vmem:[#allocation2 + $0xc4] ss:$16 sps:$4 sm:$0xff]  }
  0x21   :  { %3478 = vmatmul.mubr.msk.f32.gmra.mrb[4].mxu0 %vm112_vm1, %v5302_v15  ;;  %3496 = vmatmul.mubr.msk.f32.gmra.mrb[4].mxu1 %vm112_vm1, %v5302_v15  ;;  %v4838_v52 = vld [vmem:[#allocation2 + $0xcc] ss:$16 sps:$4 sm:$0xff]   ;;  %v4837_v53 = vld [vmem:[#allocation2 + $0xc0] ss:$16 sps:$4 sm:$0xff]   ;;  %v4840_v54 = vld [vmem:[#allocation2 + $0xc8] ss:$16 sps:$4 sm:$0xff]  }
  0x22   :  { %260 = vmatprep.mubr.f32.mxu0 %v5211_v0  ;;  %421 = vmatprep.mubr.f32.mxu1 %v5211_v0  ;;  %v4841_v55 = vld [vmem:[#allocation2 + $0xe4] ss:$16 sps:$4 sm:$0xff]   ;;  %v4844_v56 = vld [vmem:[#allocation2 + $0xec] ss:$16 sps:$4 sm:$0xff]   ;;  %v4843_v57 = vld [vmem:[#allocation2 + $0xe0] ss:$16 sps:$4 sm:$0xff]  }
  0x23   :  { %v4846_v58 = vld [vmem:[#allocation2 + $0xe8] ss:$16 sps:$4 sm:$0xff]   ;;  %v4847_v59 = vld [vmem:[#allocation2 + $0x104] ss:$16 sps:$4 sm:$0xff]   ;;  %v4850_v60 = vld [vmem:[#allocation2 + $0x10c] ss:$16 sps:$4 sm:$0xff]  }
  0x24   :  { %v4849_v61 = vld [vmem:[#allocation2 + $0x100] ss:$16 sps:$4 sm:$0xff]   ;;  %v4852_v62 = vld [vmem:[#allocation2 + $0x108] ss:$16 sps:$4 sm:$0xff]   ;;  %v4853_v63 = vld [vmem:[#allocation2 + $0x124] ss:$16 sps:$4 sm:$0xff]  }
  0x25   :  { %3479 = vmatmul.mubr.msk.f32.gmra.mrb[6].mxu0 %vm112_vm1, %v5315_v16  ;;  %3497 = vmatmul.mubr.msk.f32.gmra.mrb[6].mxu1 %vm112_vm1, %v5315_v16  ;;  %v4856_v1 = vld [vmem:[#allocation2 + $0x12c] ss:$16 sps:$4 sm:$0xff]   ;;  %v4855_v2 = vld [vmem:[#allocation2 + $0x120] ss:$16 sps:$4 sm:$0xff]   ;;  %v4858_v3 = vld [vmem:[#allocation2 + $0x128] ss:$16 sps:$4 sm:$0xff]  }
  0x26   :  { %266 = vmatprep.mubr.f32.mxu0 %v5211_v0  ;;  %427 = vmatprep.mubr.f32.mxu1 %v5211_v0  ;;  %v4859_v4 = vld [vmem:[#allocation2 + $0x144] ss:$16 sps:$4 sm:$0xff]   ;;  %v4862_v5 = vld [vmem:[#allocation2 + $0x14c] ss:$16 sps:$4 sm:$0xff]   ;;  %v4864_v7 = vld [vmem:[#allocation2 + $0x148] ss:$16 sps:$4 sm:$0xff]  }
  0x27   :  { %v4865_v8 = vld [vmem:[#allocation2 + $0x164] ss:$16 sps:$4 sm:$0xff]   ;;  %v4868_v9 = vld [vmem:[#allocation2 + $0x16c] ss:$16 sps:$4 sm:$0xff]   ;;  %v4870_v11 = vld [vmem:[#allocation2 + $0x168] ss:$16 sps:$4 sm:$0xff]  }
  0x28   :  { %v4871_v12 = vld [vmem:[#allocation2 + $0x184] ss:$16 sps:$4 sm:$0xff]   ;;  %v4874_v13 = vld [vmem:[#allocation2 + $0x18c] ss:$16 sps:$4 sm:$0xff]   ;;  %v4873_v14 = vld [vmem:[#allocation2 + $0x180] ss:$16 sps:$4 sm:$0xff]  }
  0x29   :  { %3480 = vmatmul.mubr.msk.f32.gmra.mrb[8].mxu0 %vm112_vm1, %v5326_v17  ;;  %3498 = vmatmul.mubr.msk.f32.gmra.mrb[8].mxu1 %vm112_vm1, %v5326_v17 }
  0x2a   :  { %272 = vmatprep.mubr.f32.mxu0 %v5211_v0  ;;  %433 = vmatprep.mubr.f32.mxu1 %v5211_v0 }
  0x2d   :  { %3481 = vmatmul.mubr.msk.f32.gmra.mrb[10].mxu0 %vm112_vm1, %v5337_v18  ;;  %3499 = vmatmul.mubr.msk.f32.gmra.mrb[10].mxu1 %vm112_vm1, %v5337_v18 }
  0x2e   :  { %278 = vmatprep.mubr.f32.mxu0 %v5211_v0  ;;  %439 = vmatprep.mubr.f32.mxu1 %v5211_v0 }
  0x31   :  { %3482 = vmatmul.mubr.msk.f32.gmra.mrb[12].mxu0 %vm112_vm1, %v5348_v19  ;;  %3500 = vmatmul.mubr.msk.f32.gmra.mrb[12].mxu1 %vm112_vm1, %v5348_v19 }
  0x32   :  { %284 = vmatprep.mubr.f32.mxu0 %v5211_v0  ;;  %445 = vmatprep.mubr.f32.mxu1 %v5211_v0 }
  0x35   :  { %3483 = vmatmul.mubr.msk.f32.gmra.mrb[14].mxu0 %vm112_vm1, %v5359_v20  ;;  %3501 = vmatmul.mubr.msk.f32.gmra.mrb[14].mxu1 %vm112_vm1, %v5359_v20 }
  0x36   :  { %290 = vmatprep.mubr.f32.mxu0 %v5211_v0  ;;  %451 = vmatprep.mubr.f32.mxu1 %v5211_v0 }
  0x39   :  { %3484 = vmatmul.mubr.msk.f32.gmra.mrb[16].mxu0 %vm112_vm1, %v5370_v21  ;;  %3502 = vmatmul.mubr.msk.f32.gmra.mrb[16].mxu1 %vm112_vm1, %v5370_v21 }
  0x3a   :  { %296 = vmatprep.mubr.f32.mxu0 %v5211_v0  ;;  %457 = vmatprep.mubr.f32.mxu1 %v5211_v0 }
  0x3d   :  { %3485 = vmatmul.mubr.msk.f32.gmra.mrb[18].mxu0 %vm112_vm1, %v5381_v22  ;;  %3503 = vmatmul.mubr.msk.f32.gmra.mrb[18].mxu1 %vm112_vm1, %v5381_v22 }
  0x3e   :  { %302 = vmatprep.mubr.f32.mxu0 %v5211_v0  ;;  %463 = vmatprep.mubr.f32.mxu1 %v5211_v0 }
  0x41   :  { %3486 = vmatmul.mubr.msk.f32.gmra.mrb[20].mxu0 %vm112_vm1, %v5392_v23  ;;  %3504 = vmatmul.mubr.msk.f32.gmra.mrb[20].mxu1 %vm112_vm1, %v5392_v23 }
  0x42   :  { %308 = vmatprep.mubr.f32.mxu0 %v5211_v0  ;;  %469 = vmatprep.mubr.f32.mxu1 %v5211_v0 }
  0x45   :  { %3487 = vmatmul.mubr.msk.f32.gmra.mrb[22].mxu0 %vm112_vm1, %v5398_v24  ;;  %3505 = vmatmul.mubr.msk.f32.gmra.mrb[22].mxu1 %vm112_vm1, %v5398_v24 }
  0x46   :  { %314 = vmatprep.mubr.f32.mxu0 %v5211_v0  ;;  %475 = vmatprep.mubr.f32.mxu1 %v5211_v0 }
  0x49   :  { %3488 = vmatmul.mubr.msk.f32.gmra.mrb[24].mxu0 %vm112_vm1, %v5409_v25  ;;  %3506 = vmatmul.mubr.msk.f32.gmra.mrb[24].mxu1 %vm112_vm1, %v5409_v25 }
  0x4a   :  { %320 = vmatprep.mubr.f32.mxu0 %v5211_v0  ;;  %481 = vmatprep.mubr.f32.mxu1 %v5211_v0 }
  0x4d   :  { %3489 = vmatmul.mubr.msk.f32.gmra.mrb[26].mxu0 %vm112_vm1, %v5420_v26  ;;  %3507 = vmatmul.mubr.msk.f32.gmra.mrb[26].mxu1 %vm112_vm1, %v5420_v26 }
  0x4e   :  { %326 = vmatprep.mubr.f32.mxu0 %v5211_v0  ;;  %487 = vmatprep.mubr.f32.mxu1 %v5211_v0 }
  0x51   :  { %3490 = vmatmul.mubr.msk.f32.gmra.mrb[28].mxu0 %vm112_vm1, %v5431_v27  ;;  %3508 = vmatmul.mubr.msk.f32.gmra.mrb[28].mxu1 %vm112_vm1, %v5431_v27 }
  0x52   :  { %332 = vmatprep.mubr.f32.mxu0 %v5211_v0  ;;  %493 = vmatprep.mubr.f32.mxu1 %v5211_v0 }
  0x55   :  { %3491 = vmatmul.mubr.msk.f32.gmra.mrb[30].mxu0 %vm112_vm1, %v5442_v28  ;;  %3509 = vmatmul.mubr.msk.f32.gmra.mrb[30].mxu1 %vm112_vm1, %v5442_v28 }
  0x56   :  { %564 = vmatprep.mubr.f32.mxu0 %v5211_v0  ;;  %725 = vmatprep.mubr.f32.mxu1 %v5211_v0 }
  0x59   :  { %3512 = vmatmul.mubr.msk.f32.vlgmr.msra.gmra.mrb[32].mxu0 %vm112_vm1, %v5272_v6  ;;  %3530 = vmatmul.mubr.msk.f32.vlgmr.msra.gmra.mrb[32].mxu1 %vm112_vm1, %v5272_v6  ;;  %v4861_v6 = vld [vmem:[#allocation2 + $0x140] ss:$16 sps:$4 sm:$0xff]  }
  0x5a   :  { %570 = vmatprep.mubr.f32.mxu0 %v5211_v0  ;;  %3710 = vmatpush1.bf16.msra.mxu0 %v4801_v29  ;;  %v4894_v29 = vld [vmem:[#allocation2 + $0x1e8] ss:$16 sps:$4 sm:$0xff]  }
  0x5b   :  { %3966 = vmatpush1.bf16.msra.mxu1 %v4804_v30  ;;  %731 = vmatprep.mubr.f32.mxu1 %v5211_v0  ;;  %v4895_v30 = vld [vmem:[#allocation2 + $0x204] ss:$16 sps:$4 sm:$0xff]  }
  0x5c   :  { %3712 = vmatprep.subr.bf16.mxu0 %v4805_v31  ;;  %3968 = vmatprep.subr.bf16.mxu1 %v4808_v32  ;;  %v4898_v31 = vld [vmem:[#allocation2 + $0x20c] ss:$16 sps:$4 sm:$0xff]  }
  0x5d   :  { %3513 = vmatmul.mubr.msk.f32.gmra.mrb[34].mxu0 %vm112_vm1, %v5289_v10  ;;  %3531 = vmatmul.mubr.msk.f32.gmra.mrb[34].mxu1 %vm112_vm1, %v5289_v10  ;;  %v4867_v10 = vld [vmem:[#allocation2 + $0x160] ss:$16 sps:$4 sm:$0xff]  }
  0x5e   :  { %576 = vmatprep.mubr.f32.mxu0 %v5211_v0  ;;  %3714 = vmatpush1.bf16.msra.mxu0 %v4807_v33  ;;  %v5556_v33 = vld [vmem:[%s6364_s2] sm:$0xff] }
  0x5f   :  { %3970 = vmatpush1.bf16.msra.mxu1 %v4810_v34  ;;  %737 = vmatprep.mubr.f32.mxu1 %v5211_v0 }
  0x60   :  { %3716 = vmatprep.subr.bf16.mxu0 %v4811_v35  ;;  %3972 = vmatprep.subr.bf16.mxu1 %v4814_v36 }
  0x61   :  { %3514 = vmatmul.mubr.msk.f32.gmra.mrb[36].mxu0 %vm112_vm1, %v5302_v15  ;;  %3532 = vmatmul.mubr.msk.f32.gmra.mrb[36].mxu1 %vm112_vm1, %v5302_v15  ;;  %v4876_v15 = vld [vmem:[#allocation2 + $0x188] ss:$16 sps:$4 sm:$0xff]  }
  0x62   :  { %582 = vmatprep.mubr.f32.mxu0 %v5211_v0  ;;  %3718 = vmatpush1.bf16.msra.mxu0 %v4813_v37 }
  0x63   :  { %3974 = vmatpush1.bf16.msra.mxu1 %v4816_v38  ;;  %743 = vmatprep.mubr.f32.mxu1 %v5211_v0 }
  0x64   :  { %3720 = vmatprep.subr.bf16.mxu0 %v4817_v39  ;;  %3976 = vmatprep.subr.bf16.mxu1 %v4820_v40 }
  0x65   :  { %3515 = vmatmul.mubr.msk.f32.gmra.mrb[38].mxu0 %vm112_vm1, %v5315_v16  ;;  %3533 = vmatmul.mubr.msk.f32.gmra.mrb[38].mxu1 %vm112_vm1, %v5315_v16  ;;  %v4877_v16 = vld [vmem:[#allocation2 + $0x1a4] ss:$16 sps:$4 sm:$0xff]  }
  0x66   :  { %588 = vmatprep.mubr.f32.mxu0 %v5211_v0  ;;  %3722 = vmatpush1.bf16.msra.mxu0 %v4819_v41 }
  0x67   :  { %3978 = vmatpush1.bf16.msra.mxu1 %v4822_v42  ;;  %749 = vmatprep.mubr.f32.mxu1 %v5211_v0  ;;  %v4897_v42 = vld [vmem:[#allocation2 + $0x200] ss:$16 sps:$4 sm:$0xff]  }
  0x68   :  { %3724 = vmatprep.subr.bf16.mxu0 %v4823_v43  ;;  %3980 = vmatprep.subr.bf16.mxu1 %v4826_v44  ;;  %v4900_v43 = vld [vmem:[#allocation2 + $0x208] ss:$16 sps:$4 sm:$0xff]  }
  0x69   :  { %3516 = vmatmul.mubr.msk.f32.gmra.mrb[40].mxu0 %vm112_vm1, %v5326_v17  ;;  %3534 = vmatmul.mubr.msk.f32.gmra.mrb[40].mxu1 %vm112_vm1, %v5326_v17  ;;  %v4880_v17 = vld [vmem:[#allocation2 + $0x1ac] ss:$16 sps:$4 sm:$0xff]  }
  0x6a   :  { %594 = vmatprep.mubr.f32.mxu0 %v5211_v0  ;;  %3726 = vmatpush1.bf16.msra.mxu0 %v4825_v45 }
  0x6b   :  { %3982 = vmatpush1.bf16.msra.mxu1 %v4828_v46  ;;  %755 = vmatprep.mubr.f32.mxu1 %v5211_v0  ;;  %v4901_v46 = vld [vmem:[#allocation2 + $0x224] ss:$16 sps:$4 sm:$0xff]  }
  0x6c   :  { %3728 = vmatprep.subr.bf16.mxu0 %v4829_v47  ;;  %3984 = vmatprep.subr.bf16.mxu1 %v4832_v48 }
  0x6d   :  { %3517 = vmatmul.mubr.msk.f32.gmra.mrb[42].mxu0 %vm112_vm1, %v5337_v18  ;;  %3535 = vmatmul.mubr.msk.f32.gmra.mrb[42].mxu1 %vm112_vm1, %v5337_v18  ;;  %v4879_v18 = vld [vmem:[#allocation2 + $0x1a0] ss:$16 sps:$4 sm:$0xff]  }
  0x6e   :  { %600 = vmatprep.mubr.f32.mxu0 %v5211_v0  ;;  %3730 = vmatpush1.bf16.msra.mxu0 %v4831_v49 }
  0x6f   :  { %3986 = vmatpush1.bf16.msra.mxu1 %v4834_v50  ;;  %761 = vmatprep.mubr.f32.mxu1 %v5211_v0 }
  0x70   :  { %3732 = vmatprep.subr.bf16.mxu0 %v4835_v51  ;;  %3988 = vmatprep.subr.bf16.mxu1 %v4838_v52  ;;  %v4904_v51 = vld [vmem:[#allocation2 + $0x22c] ss:$16 sps:$4 sm:$0xff]  }
  0x71   :  { %3518 = vmatmul.mubr.msk.f32.gmra.mrb[44].mxu0 %vm112_vm1, %v5348_v19  ;;  %3536 = vmatmul.mubr.msk.f32.gmra.mrb[44].mxu1 %vm112_vm1, %v5348_v19  ;;  %v4882_v19 = vld [vmem:[#allocation2 + $0x1a8] ss:$16 sps:$4 sm:$0xff]  }
  0x72   :  { %606 = vmatprep.mubr.f32.mxu0 %v5211_v0  ;;  %3734 = vmatpush1.bf16.msra.mxu0 %v4837_v53 }
  0x73   :  { %3990 = vmatpush1.bf16.msra.mxu1 %v4840_v54  ;;  %767 = vmatprep.mubr.f32.mxu1 %v5211_v0  ;;  %v4903_v54 = vld [vmem:[#allocation2 + $0x220] ss:$16 sps:$4 sm:$0xff]  }
  0x74   :  { %3736 = vmatprep.subr.bf16.mxu0 %v4841_v55  ;;  %3992 = vmatprep.subr.bf16.mxu1 %v4844_v56  ;;  %v4906_v55 = vld [vmem:[#allocation2 + $0x228] ss:$16 sps:$4 sm:$0xff]  }
  0x75   :  { %3519 = vmatmul.mubr.msk.f32.gmra.mrb[46].mxu0 %vm112_vm1, %v5359_v20  ;;  %3537 = vmatmul.mubr.msk.f32.gmra.mrb[46].mxu1 %vm112_vm1, %v5359_v20  ;;  %v4883_v20 = vld [vmem:[#allocation2 + $0x1c4] ss:$16 sps:$4 sm:$0xff]  }
  0x76   :  { %612 = vmatprep.mubr.f32.mxu0 %v5211_v0  ;;  %3738 = vmatpush1.bf16.msra.mxu0 %v4843_v57 }
  0x77   :  { %3994 = vmatpush1.bf16.msra.mxu1 %v4846_v58  ;;  %773 = vmatprep.mubr.f32.mxu1 %v5211_v0  ;;  %v4907_v58 = vld [vmem:[#allocation2 + $0x244] ss:$16 sps:$4 sm:$0xff]  }
  0x78   :  { %3740 = vmatprep.subr.bf16.mxu0 %v4847_v59  ;;  %3996 = vmatprep.subr.bf16.mxu1 %v4850_v60 }
  0x79   :  { %3520 = vmatmul.mubr.msk.f32.gmra.mrb[48].mxu0 %vm112_vm1, %v5370_v21  ;;  %3538 = vmatmul.mubr.msk.f32.gmra.mrb[48].mxu1 %vm112_vm1, %v5370_v21  ;;  %v4886_v21 = vld [vmem:[#allocation2 + $0x1cc] ss:$16 sps:$4 sm:$0xff]  }
  0x7a   :  { %618 = vmatprep.mubr.f32.mxu0 %v5211_v0  ;;  %3742 = vmatpush1.bf16.msra.mxu0 %v4849_v61 }
  0x7b   :  { %3998 = vmatpush1.bf16.msra.mxu1 %v4852_v62  ;;  %779 = vmatprep.mubr.f32.mxu1 %v5211_v0 }
  0x7c   :  { %3744 = vmatprep.subr.bf16.mxu0 %v4853_v63  ;;  %4000 = vmatprep.subr.bf16.mxu1 %v4856_v1  ;;  %v4910_v63 = vld [vmem:[#allocation2 + $0x24c] ss:$16 sps:$4 sm:$0xff]  }
  0x7d   :  { %3521 = vmatmul.mubr.msk.f32.gmra.mrb[50].mxu0 %vm112_vm1, %v5381_v22  ;;  %3539 = vmatmul.mubr.msk.f32.gmra.mrb[50].mxu1 %vm112_vm1, %v5381_v22  ;;  %v4885_v22 = vld [vmem:[#allocation2 + $0x1c0] ss:$16 sps:$4 sm:$0xff]  }
  0x7e   :  { %624 = vmatprep.mubr.f32.mxu0 %v5211_v0  ;;  %3746 = vmatpush1.bf16.msra.mxu0 %v4855_v2 }
  0x7f   :  { %4002 = vmatpush1.bf16.msra.mxu1 %v4858_v3  ;;  %785 = vmatprep.mubr.f32.mxu1 %v5211_v0  ;;  %v4909_v3 = vld [vmem:[#allocation2 + $0x240] ss:$16 sps:$4 sm:$0xff]  }
  0x80   :  { %3748 = vmatprep.subr.bf16.mxu0 %v4859_v4  ;;  %4004 = vmatprep.subr.bf16.mxu1 %v4862_v5  ;;  %v4912_v4 = vld [vmem:[#allocation2 + $0x248] ss:$16 sps:$4 sm:$0xff]  }
  0x81   :  { %3522 = vmatmul.mubr.msk.f32.gmra.mrb[52].mxu0 %vm112_vm1, %v5392_v23  ;;  %3540 = vmatmul.mubr.msk.f32.gmra.mrb[52].mxu1 %vm112_vm1, %v5392_v23  ;;  %v4888_v23 = vld [vmem:[#allocation2 + $0x1c8] ss:$16 sps:$4 sm:$0xff]  }
  0x82   :  { %630 = vmatprep.mubr.f32.mxu0 %v5211_v0  ;;  %3750 = vmatpush1.bf16.msra.mxu0 %v4861_v6 }
  0x83   :  { %4006 = vmatpush1.bf16.msra.mxu1 %v4864_v7  ;;  %791 = vmatprep.mubr.f32.mxu1 %v5211_v0  ;;  %v4913_v7 = vld [vmem:[#allocation2 + $0x264] ss:$16 sps:$4 sm:$0xff]  }
  0x84   :  { %3752 = vmatprep.subr.bf16.mxu0 %v4865_v8  ;;  %4008 = vmatprep.subr.bf16.mxu1 %v4868_v9 }
  0x85   :  { %3523 = vmatmul.mubr.msk.f32.gmra.mrb[54].mxu0 %vm112_vm1, %v5398_v24  ;;  %3541 = vmatmul.mubr.msk.f32.gmra.mrb[54].mxu1 %vm112_vm1, %v5398_v24  ;;  %v4889_v24 = vld [vmem:[#allocation2 + $0x1e4] ss:$16 sps:$4 sm:$0xff]  }
  0x86   :  { %636 = vmatprep.mubr.f32.mxu0 %v5211_v0  ;;  %3754 = vmatpush1.bf16.msra.mxu0 %v4867_v10 }
  0x87   :  { %4010 = vmatpush1.bf16.msra.mxu1 %v4870_v11  ;;  %797 = vmatprep.mubr.f32.mxu1 %v5211_v0 }
  0x88   :  { %3756 = vmatprep.subr.bf16.mxu0 %v4871_v12  ;;  %4012 = vmatprep.subr.bf16.mxu1 %v4874_v13  ;;  %v4916_v12 = vld [vmem:[#allocation2 + $0x26c] ss:$16 sps:$4 sm:$0xff]  }
  0x89   :  { %3524 = vmatmul.mubr.msk.f32.gmra.mrb[56].mxu0 %vm112_vm1, %v5409_v25  ;;  %3542 = vmatmul.mubr.msk.f32.gmra.mrb[56].mxu1 %vm112_vm1, %v5409_v25  ;;  %v4892_v25 = vld [vmem:[#allocation2 + $0x1ec] ss:$16 sps:$4 sm:$0xff]  }
  0x8a   :  { %642 = vmatprep.mubr.f32.mxu0 %v5211_v0  ;;  %3758 = vmatpush1.bf16.msra.mxu0 %v4873_v14 }
  0x8b   :  { %4014 = vmatpush1.bf16.msra.mxu1 %v4876_v15  ;;  %803 = vmatprep.mubr.f32.mxu1 %v5211_v0  ;;  %v4915_v15 = vld [vmem:[#allocation2 + $0x260] ss:$16 sps:$4 sm:$0xff]  }
  0x8c   :  { %3760 = vmatprep.subr.bf16.mxu0 %v4877_v16  ;;  %4016 = vmatprep.subr.bf16.mxu1 %v4880_v17  ;;  %v4918_v16 = vld [vmem:[#allocation2 + $0x268] ss:$16 sps:$4 sm:$0xff]  }
  0x8d   :  { %3525 = vmatmul.mubr.msk.f32.gmra.mrb[58].mxu0 %vm112_vm1, %v5420_v26  ;;  %3543 = vmatmul.mubr.msk.f32.gmra.mrb[58].mxu1 %vm112_vm1, %v5420_v26  ;;  %v4891_v26 = vld [vmem:[#allocation2 + $0x1e0] ss:$16 sps:$4 sm:$0xff]  }
  0x8e   :  { %648 = vmatprep.mubr.f32.mxu0 %v5211_v0  ;;  %3762 = vmatpush1.bf16.msra.mxu0 %v4879_v18 }
  0x8f   :  { %4018 = vmatpush1.bf16.msra.mxu1 %v4882_v19  ;;  %809 = vmatprep.mubr.f32.mxu1 %v5211_v0  ;;  %v4919_v19 = vld [vmem:[#allocation2 + $0x284] ss:$16 sps:$4 sm:$0xff]  }
  0x90   :  { %3764 = vmatprep.subr.bf16.mxu0 %v4883_v20  ;;  %4020 = vmatprep.subr.bf16.mxu1 %v4886_v21 }
  0x91   :  { %3526 = vmatmul.mubr.msk.f32.gmra.mrb[60].mxu0 %vm112_vm1, %v5431_v27  ;;  %3544 = vmatmul.mubr.msk.f32.gmra.mrb[60].mxu1 %vm112_vm1, %v5431_v27  ;;  %v64_v27 = vlaneseq }
  0x92   :  { %654 = vmatprep.mubr.f32.mxu0 %v5211_v0  ;;  %3766 = vmatpush1.bf16.msra.mxu0 %v4885_v22 }
  0x93   :  { %4022 = vmatpush1.bf16.msra.mxu1 %v4888_v23  ;;  %815 = vmatprep.mubr.f32.mxu1 %v5211_v0  ;;  %v5550_v32 = vshrl.u32 %v64_v27, 7 }
  0x94   :  { %3768 = vmatprep.subr.bf16.mxu0 %v4889_v24  ;;  %4024 = vmatprep.subr.bf16.mxu1 %v4892_v25  ;;  %v4922_v24 = vld [vmem:[#allocation2 + $0x28c] ss:$16 sps:$4 sm:$0xff]  }
  0x95   :  { %3527 = vmatmul.mubr.msk.f32.gmra.mrb[62].mxu0 %vm112_vm1, %v5442_v28  ;;  %3545 = vmatmul.mubr.msk.f32.gmra.mrb[62].mxu1 %vm112_vm1, %v5442_v28  ;;  %v6373_v0 = vsub.s32 0, %v5550_v32  ;;  %v6371_v34 = vsub.s32 1, %v5550_v32 }
  0x96   :  { %3770 = vmatpush1.bf16.msra.mxu0 %v4891_v26 }
  0x97   :  { %4026 = vmatpush1.bf16.msra.mxu1 %v4894_v29  ;;  %3772 = vmatprep.subr.bf16.mxu0 %v4895_v30  ;;  %v5562_v28 = vrot.slane %v5556_v33, %v6373_v0  ;;  %v5567_v35 = vrot.slane %v5556_v33, %v6371_v34  ;;  %v4921_v29 = vld [vmem:[#allocation2 + $0x280] ss:$16 sps:$4 sm:$0xff]   ;;  %v4924_v30 = vld [vmem:[#allocation2 + $0x288] ss:$16 sps:$4 sm:$0xff]  }
  0x98   :  { %4028 = vmatprep.subr.bf16.mxu1 %v4898_v31 }
  0xec   :  { %v244_v36 = vpop.f32.mrb[0].mxu0  ;;  %v5569_v37 = vpop.f32.mrb[0].mxu1 }
  0xed   :  { %v245_v38 = vadd.f32 %v244_v36, %v5562_v28  ;;  %v246_v39 = vpop.f32.mrb[1].mxu0  ;;  %v5572_v40 = vpop.f32.mrb[1].mxu1  ;;  %v4925_v36 = vld [vmem:[#allocation2 + $0x2a4] ss:$16 sps:$4 sm:$0xff]  }
  0xee   :  { %v247_v41 = vadd.f32 %v246_v39, %v5567_v35 }
  0xef   :  { %v822_v48 = vmax.f32 %v245_v38, 0.0 }
  0xf0   :  { %v823_v44 = vmax.f32 %v247_v41, 0.0  ;;  %v250_v45 = vpop.f32.mrb[2].mxu0  ;;  %v5575_v47 = vpop.f32.mrb[2].mxu1 }
  0xf1   :  { %v251_v49 = vadd.f32 %v250_v45, %v5562_v28  ;;  %v252_v50 = vpop.f32.mrb[3].mxu0  ;;  %v5578_v52 = vpop.f32.mrb[3].mxu1 }
  0xf2   :  { %v253_v53 = vadd.f32 %v252_v50, %v5567_v35  ;;  %1804 = vmatprep.mubr.f32.mxu0 %v823_v44  ;;  %2448 = vmatprep.mubr.f32.mxu1 %v823_v44 }
  0xf3   :  { %1805 = vmatmul.mubr.f32.vlgmr.msra.gmra.mrb[64].mxu0 %v822_v48  ;;  %2449 = vmatmul.mubr.f32.vlgmr.msra.gmra.mrb[64].mxu1 %v822_v48  ;;  %v830_v60 = vmax.f32 %v251_v49, 0.0  ;;  %v4930_v48 = vld [vmem:[#allocation2 + $0x2a8] ss:$16 sps:$4 sm:$0xff]  }
  0xf4   :  { %v831_v56 = vmax.f32 %v253_v53, 0.0  ;;  %3774 = vmatpush1.bf16.msra.mxu0 %v4897_v42  ;;  %v256_v57 = vpop.f32.mrb[4].mxu0  ;;  %4030 = vmatpush1.bf16.msra.mxu1 %v4900_v43  ;;  %v5581_v59 = vpop.f32.mrb[4].mxu1  ;;  %v4928_v43 = vld [vmem:[#allocation2 + $0x2ac] ss:$16 sps:$4 sm:$0xff]  }
  0xf5   :  { %v257_v61 = vadd.f32 %v256_v57, %v5562_v28  ;;  %v258_v62 = vpop.f32.mrb[5].mxu0  ;;  %3776 = vmatprep.subr.bf16.mxu0 %v4901_v46  ;;  %4032 = vmatprep.subr.bf16.mxu1 %v4904_v51  ;;  %v5584_v1 = vpop.f32.mrb[5].mxu1  ;;  %v4927_v46 = vld [vmem:[#allocation2 + $0x2a0] ss:$16 sps:$4 sm:$0xff]   ;;  %v4931_v51 = vld [vmem:[#allocation2 + $0x2c4] ss:$16 sps:$4 sm:$0xff]  }
  0xf6   :  { %v259_v2 = vadd.f32 %v258_v62, %v5567_v35  ;;  %1810 = vmatprep.mubr.f32.mxu0 %v831_v56  ;;  %2454 = vmatprep.mubr.f32.mxu1 %v831_v56  ;;  %v4934_v57 = vld [vmem:[#allocation2 + $0x2cc] ss:$16 sps:$4 sm:$0xff]   ;;  %v4936_v62 = vld [vmem:[#allocation2 + $0x2c8] ss:$16 sps:$4 sm:$0xff]  }
  0xf7   :  { %1811 = vmatmul.mubr.f32.gmra.mrb[66].mxu0 %v830_v60  ;;  %2455 = vmatmul.mubr.f32.gmra.mrb[66].mxu1 %v830_v60  ;;  %v838_v9 = vmax.f32 %v257_v61, 0.0  ;;  %v4933_v61 = vld [vmem:[#allocation2 + $0x2c0] ss:$16 sps:$4 sm:$0xff]  }
  0xf8   :  { %v839_v5 = vmax.f32 %v259_v2, 0.0  ;;  %3778 = vmatpush1.bf16.msra.mxu0 %v4903_v54  ;;  %v262_v6 = vpop.f32.mrb[6].mxu0  ;;  %4034 = vmatpush1.bf16.msra.mxu1 %v4906_v55  ;;  %v5587_v8 = vpop.f32.mrb[6].mxu1 }
  0xf9   :  { %v263_v10 = vadd.f32 %v262_v6, %v5562_v28  ;;  %v264_v11 = vpop.f32.mrb[7].mxu0  ;;  %3780 = vmatprep.subr.bf16.mxu0 %v4907_v58  ;;  %4036 = vmatprep.subr.bf16.mxu1 %v4910_v63  ;;  %v5590_v13 = vpop.f32.mrb[7].mxu1 }
  0xfa   :  { %v265_v14 = vadd.f32 %v264_v11, %v5567_v35  ;;  %1816 = vmatprep.mubr.f32.mxu0 %v839_v5  ;;  %2460 = vmatprep.mubr.f32.mxu1 %v839_v5 }
  0xfb   :  { %1817 = vmatmul.mubr.f32.gmra.mrb[68].mxu0 %v838_v9  ;;  %2461 = vmatmul.mubr.f32.gmra.mrb[68].mxu1 %v838_v9  ;;  %v846_v21 = vmax.f32 %v263_v10, 0.0  ;;  %v4940_v9 = vld [vmem:[#allocation2 + $0x2ec] ss:$16 sps:$4 sm:$0xff]  }
  0xfc   :  { %v847_v17 = vmax.f32 %v265_v14, 0.0  ;;  %3782 = vmatpush1.bf16.msra.mxu0 %v4909_v3  ;;  %v268_v18 = vpop.f32.mrb[8].mxu0  ;;  %4038 = vmatpush1.bf16.msra.mxu1 %v4912_v4  ;;  %v5593_v20 = vpop.f32.mrb[8].mxu1  ;;  %v4937_v3 = vld [vmem:[#allocation2 + $0x2e4] ss:$16 sps:$4 sm:$0xff]  }
  0xfd   :  { %v269_v22 = vadd.f32 %v268_v18, %v5562_v28  ;;  %v270_v23 = vpop.f32.mrb[9].mxu0  ;;  %3784 = vmatprep.subr.bf16.mxu0 %v4913_v7  ;;  %4040 = vmatprep.subr.bf16.mxu1 %v4916_v12  ;;  %v5596_v25 = vpop.f32.mrb[9].mxu1  ;;  %v4939_v12 = vld [vmem:[#allocation2 + $0x2e0] ss:$16 sps:$4 sm:$0xff]   ;;  %v4942_v14 = vld [vmem:[#allocation2 + $0x2e8] ss:$16 sps:$4 sm:$0xff]  }
  0xfe   :  { %v271_v26 = vadd.f32 %v270_v23, %v5567_v35  ;;  %1822 = vmatprep.mubr.f32.mxu0 %v847_v17  ;;  %2466 = vmatprep.mubr.f32.mxu1 %v847_v17  ;;  %v4943_v17 = vld [vmem:[#allocation2 + $0x304] ss:$16 sps:$4 sm:$0xff]   ;;  %v4946_v23 = vld [vmem:[#allocation2 + $0x30c] ss:$16 sps:$4 sm:$0xff]  }
  0xff   :  { %1823 = vmatmul.mubr.f32.gmra.mrb[70].mxu0 %v846_v21  ;;  %2467 = vmatmul.mubr.f32.gmra.mrb[70].mxu1 %v846_v21  ;;  %v854_v39 = vmax.f32 %v269_v22, 0.0 }
 0x100   :  { %v855_v31 = vmax.f32 %v271_v26, 0.0  ;;  %3786 = vmatpush1.bf16.msra.mxu0 %v4915_v15  ;;  %v274_v27 = vpop.f32.mrb[10].mxu0  ;;  %4042 = vmatpush1.bf16.msra.mxu1 %v4918_v16  ;;  %v5599_v38 = vpop.f32.mrb[10].mxu1 }
 0x101   :  { %v275_v41 = vadd.f32 %v274_v27, %v5562_v28  ;;  %v276_v42 = vpop.f32.mrb[11].mxu0  ;;  %3788 = vmatprep.subr.bf16.mxu0 %v4919_v19  ;;  %4044 = vmatprep.subr.bf16.mxu1 %v4922_v24  ;;  %v5602_v44 = vpop.f32.mrb[11].mxu1 }
 0x102   :  { %v277_v45 = vadd.f32 %v276_v42, %v5567_v35  ;;  %1828 = vmatprep.mubr.f32.mxu0 %v855_v31  ;;  %2472 = vmatprep.mubr.f32.mxu1 %v855_v31 }
 0x103   :  { %1829 = vmatmul.mubr.f32.gmra.mrb[72].mxu0 %v854_v39  ;;  %2473 = vmatmul.mubr.f32.gmra.mrb[72].mxu1 %v854_v39  ;;  %v862_v54 = vmax.f32 %v275_v41, 0.0 }
 0x104   :  { %v863_v49 = vmax.f32 %v277_v45, 0.0  ;;  %3790 = vmatpush1.bf16.msra.mxu0 %v4921_v29  ;;  %v280_v50 = vpop.f32.mrb[12].mxu0  ;;  %4046 = vmatpush1.bf16.msra.mxu1 %v4924_v30  ;;  %v5605_v53 = vpop.f32.mrb[12].mxu1  ;;  %v4945_v29 = vld [vmem:[#allocation2 + $0x300] ss:$16 sps:$4 sm:$0xff]  }
 0x105   :  { %v281_v55 = vadd.f32 %v280_v50, %v5562_v28  ;;  %v282_v56 = vpop.f32.mrb[13].mxu0  ;;  %3792 = vmatprep.subr.bf16.mxu0 %v4925_v36  ;;  %4048 = vmatprep.subr.bf16.mxu1 %v4928_v43  ;;  %v5608_v58 = vpop.f32.mrb[13].mxu1  ;;  %v4948_v30 = vld [vmem:[#allocation2 + $0x308] ss:$16 sps:$4 sm:$0xff]   ;;  %v4949_v36 = vld [vmem:[#allocation2 + $0x324] ss:$16 sps:$4 sm:$0xff]  }
 0x106   :  { %v283_v60 = vadd.f32 %v282_v56, %v5567_v35  ;;  %1834 = vmatprep.mubr.f32.mxu0 %v863_v49  ;;  %2478 = vmatprep.mubr.f32.mxu1 %v863_v49  ;;  %v4952_v45 = vld [vmem:[#allocation2 + $0x32c] ss:$16 sps:$4 sm:$0xff]   ;;  %v4951_v49 = vld [vmem:[#allocation2 + $0x320] ss:$16 sps:$4 sm:$0xff]   ;;  %v4954_v50 = vld [vmem:[#allocation2 + $0x328] ss:$16 sps:$4 sm:$0xff]  }
 0x107   :  { %1835 = vmatmul.mubr.f32.gmra.mrb[74].mxu0 %v862_v54  ;;  %2479 = vmatmul.mubr.f32.gmra.mrb[74].mxu1 %v862_v54  ;;  %v870_v5 = vmax.f32 %v281_v55, 0.0  ;;  %v4955_v55 = vld [vmem:[#allocation2 + $0x344] ss:$16 sps:$4 sm:$0xff]  }
 0x108   :  { %v871_v63 = vmax.f32 %v283_v60, 0.0  ;;  %3794 = vmatpush1.bf16.msra.mxu0 %v4927_v46  ;;  %v286_v2 = vpop.f32.mrb[14].mxu0  ;;  %4050 = vmatpush1.bf16.msra.mxu1 %v4930_v48  ;;  %v5611_v4 = vpop.f32.mrb[14].mxu1 }
 0x109   :  { %v287_v6 = vadd.f32 %v286_v2, %v5562_v28  ;;  %v288_v7 = vpop.f32.mrb[15].mxu0  ;;  %3796 = vmatprep.subr.bf16.mxu0 %v4931_v51  ;;  %4052 = vmatprep.subr.bf16.mxu1 %v4934_v57  ;;  %v5614_v10 = vpop.f32.mrb[15].mxu1 }
 0x10a   :  { %v289_v11 = vadd.f32 %v288_v7, %v5567_v35  ;;  %1840 = vmatprep.mubr.f32.mxu0 %v871_v63  ;;  %2484 = vmatprep.mubr.f32.mxu1 %v871_v63 }
 0x10b   :  { %1841 = vmatmul.mubr.f32.gmra.mrb[76].mxu0 %v870_v5  ;;  %2485 = vmatmul.mubr.f32.gmra.mrb[76].mxu1 %v870_v5  ;;  %v878_v19 = vmax.f32 %v287_v6, 0.0  ;;  %v4960_v5 = vld [vmem:[#allocation2 + $0x348] ss:$16 sps:$4 sm:$0xff]  }
 0x10c   :  { %v879_v15 = vmax.f32 %v289_v11, 0.0  ;;  %3798 = vmatpush1.bf16.msra.mxu0 %v4933_v61  ;;  %v292_v16 = vpop.f32.mrb[16].mxu0  ;;  %4054 = vmatpush1.bf16.msra.mxu1 %v4936_v62  ;;  %v5617_v18 = vpop.f32.mrb[16].mxu1  ;;  %v4958_v62 = vld [vmem:[#allocation2 + $0x34c] ss:$16 sps:$4 sm:$0xff]  }
 0x10d   :  { %v293_v21 = vadd.f32 %v292_v16, %v5562_v28  ;;  %v294_v22 = vpop.f32.mrb[17].mxu0  ;;  %3800 = vmatprep.subr.bf16.mxu0 %v4937_v3  ;;  %4056 = vmatprep.subr.bf16.mxu1 %v4940_v9  ;;  %v5620_v24 = vpop.f32.mrb[17].mxu1  ;;  %v4957_v3 = vld [vmem:[#allocation2 + $0x340] ss:$16 sps:$4 sm:$0xff]   ;;  %v4961_v9 = vld [vmem:[#allocation2 + $0x364] ss:$16 sps:$4 sm:$0xff]  }
 0x10e   :  { %v295_v26 = vadd.f32 %v294_v22, %v5567_v35  ;;  %1846 = vmatprep.mubr.f32.mxu0 %v879_v15  ;;  %2490 = vmatprep.mubr.f32.mxu1 %v879_v15  ;;  %v4964_v16 = vld [vmem:[#allocation2 + $0x36c] ss:$16 sps:$4 sm:$0xff]   ;;  %v4966_v22 = vld [vmem:[#allocation2 + $0x368] ss:$16 sps:$4 sm:$0xff]  }
 0x10f   :  { %1847 = vmatmul.mubr.f32.gmra.mrb[78].mxu0 %v878_v19  ;;  %2491 = vmatmul.mubr.f32.gmra.mrb[78].mxu1 %v878_v19  ;;  %v886_v41 = vmax.f32 %v293_v21, 0.0  ;;  %v4963_v21 = vld [vmem:[#allocation2 + $0x360] ss:$16 sps:$4 sm:$0xff]  }
 0x110   :  { %v887_v31 = vmax.f32 %v295_v26, 0.0  ;;  %3802 = vmatpush1.bf16.msra.mxu0 %v4939_v12  ;;  %v298_v27 = vpop.f32.mrb[18].mxu0  ;;  %4058 = vmatpush1.bf16.msra.mxu1 %v4942_v14  ;;  %v5623_v39 = vpop.f32.mrb[18].mxu1 }
 0x111   :  { %v299_v42 = vadd.f32 %v298_v27, %v5562_v28  ;;  %v300_v43 = vpop.f32.mrb[19].mxu0  ;;  %3804 = vmatprep.subr.bf16.mxu0 %v4943_v17  ;;  %4060 = vmatprep.subr.bf16.mxu1 %v4946_v23  ;;  %v5626_v46 = vpop.f32.mrb[19].mxu1 }
 0x112   :  { %v301_v48 = vadd.f32 %v300_v43, %v5567_v35  ;;  %1852 = vmatprep.mubr.f32.mxu0 %v887_v31  ;;  %2496 = vmatprep.mubr.f32.mxu1 %v887_v31 }
 0x113   :  { %1853 = vmatmul.mubr.f32.gmra.mrb[80].mxu0 %v886_v41  ;;  %2497 = vmatmul.mubr.f32.gmra.mrb[80].mxu1 %v886_v41  ;;  %v894_v57 = vmax.f32 %v299_v42, 0.0  ;;  %v4970_v41 = vld [vmem:[#allocation2 + $0x38c] ss:$16 sps:$4 sm:$0xff]  }
 0x114   :  { %v895_v51 = vmax.f32 %v301_v48, 0.0  ;;  %3806 = vmatpush1.bf16.msra.mxu0 %v4945_v29  ;;  %v304_v54 = vpop.f32.mrb[20].mxu0  ;;  %4062 = vmatpush1.bf16.msra.mxu1 %v4948_v30  ;;  %v5629_v56 = vpop.f32.mrb[20].mxu1  ;;  %v4967_v29 = vld [vmem:[#allocation2 + $0x384] ss:$16 sps:$4 sm:$0xff]  }
 0x115   :  { %v305_v60 = vadd.f32 %v304_v54, %v5562_v28  ;;  %v306_v61 = vpop.f32.mrb[21].mxu0  ;;  %3808 = vmatprep.subr.bf16.mxu0 %v4949_v36  ;;  %4064 = vmatprep.subr.bf16.mxu1 %v4952_v45  ;;  %v5632_v63 = vpop.f32.mrb[21].mxu1  ;;  %v4969_v45 = vld [vmem:[#allocation2 + $0x380] ss:$16 sps:$4 sm:$0xff]   ;;  %v4972_v48 = vld [vmem:[#allocation2 + $0x388] ss:$16 sps:$4 sm:$0xff]  }
 0x116   :  { %v307_v2 = vadd.f32 %v306_v61, %v5567_v35  ;;  %1858 = vmatprep.mubr.f32.mxu0 %v895_v51  ;;  %2502 = vmatprep.mubr.f32.mxu1 %v895_v51  ;;  %v4973_v51 = vld [vmem:[#allocation2 + $0x3a4] ss:$16 sps:$4 sm:$0xff]   ;;  %v4976_v61 = vld [vmem:[#allocation2 + $0x3ac] ss:$16 sps:$4 sm:$0xff]  }
 0x117   :  { %1859 = vmatmul.mubr.f32.gmra.mrb[82].mxu0 %v894_v57  ;;  %2503 = vmatmul.mubr.f32.gmra.mrb[82].mxu1 %v894_v57  ;;  %v902_v12 = vmax.f32 %v305_v60, 0.0 }
 0x118   :  { %v903_v6 = vmax.f32 %v307_v2, 0.0  ;;  %3810 = vmatpush1.bf16.msra.mxu0 %v4951_v49  ;;  %v310_v7 = vpop.f32.mrb[22].mxu0  ;;  %4066 = vmatpush1.bf16.msra.mxu1 %v4954_v50  ;;  %v5635_v11 = vpop.f32.mrb[22].mxu1 }
 0x119   :  { %v311_v14 = vadd.f32 %v310_v7, %v5562_v28  ;;  %v312_v15 = vpop.f32.mrb[23].mxu0  ;;  %3812 = vmatprep.subr.bf16.mxu0 %v4955_v55  ;;  %4068 = vmatprep.subr.bf16.mxu1 %v4958_v62  ;;  %v5638_v17 = vpop.f32.mrb[23].mxu1  ;;  %v6370_v62 = vsub.s32 3, %v5550_v32 }
 0x11a   :  { %v313_v19 = vadd.f32 %v312_v15, %v5567_v35  ;;  %1864 = vmatprep.mubr.f32.mxu0 %v903_v6  ;;  %2508 = vmatprep.mubr.f32.mxu1 %v903_v6  ;;  %v4978_v6 = vld [vmem:[#allocation2 + $0x3a8] ss:$16 sps:$4 sm:$0xff]  }
 0x11b   :  { %1865 = vmatmul.mubr.f32.gmra.mrb[84].mxu0 %v902_v12  ;;  %2509 = vmatmul.mubr.f32.gmra.mrb[84].mxu1 %v902_v12  ;;  %v910_v31 = vmax.f32 %v311_v14, 0.0  ;;  %v4979_v12 = vld [vmem:[#allocation2 + $0x3c4] ss:$16 sps:$4 sm:$0xff]  }
 0x11c   :  { %v911_v23 = vmax.f32 %v313_v19, 0.0  ;;  %3814 = vmatpush1.bf16.msra.mxu0 %v4957_v3  ;;  %v316_v26 = vpop.f32.mrb[24].mxu0  ;;  %4070 = vmatpush1.bf16.msra.mxu1 %v4960_v5  ;;  %v5641_v30 = vpop.f32.mrb[24].mxu1  ;;  %v4975_v5 = vld [vmem:[#allocation2 + $0x3a0] ss:$16 sps:$4 sm:$0xff]  }
 0x11d   :  { %v317_v27 = vadd.f32 %v316_v26, %v5562_v28  ;;  %v318_v36 = vpop.f32.mrb[25].mxu0  ;;  %3816 = vmatprep.subr.bf16.mxu0 %v4961_v9  ;;  %4072 = vmatprep.subr.bf16.mxu1 %v4964_v16  ;;  %v5644_v42 = vpop.f32.mrb[25].mxu1 }
 0x11e   :  { %v319_v43 = vadd.f32 %v318_v36, %v5567_v35  ;;  %1870 = vmatprep.mubr.f32.mxu0 %v911_v23  ;;  %2514 = vmatprep.mubr.f32.mxu1 %v911_v23  ;;  %v5661_v23 = vrot.slane %v5556_v33, %v6370_v62 }
 0x11f   :  { %1871 = vmatmul.mubr.f32.gmra.mrb[86].mxu0 %v910_v31  ;;  %2515 = vmatmul.mubr.f32.gmra.mrb[86].mxu1 %v910_v31  ;;  %v918_v55 = vmax.f32 %v317_v27, 0.0  ;;  %v4981_v31 = vld [vmem:[#allocation2 + $0x3c0] ss:$16 sps:$4 sm:$0xff]   ;;  %v4984_v27 = vld [vmem:[#allocation2 + $0x3c8] ss:$16 sps:$4 sm:$0xff]  }
 0x120   :  { %v919_v49 = vmax.f32 %v319_v43, 0.0  ;;  %3818 = vmatpush1.bf16.msra.mxu0 %v4963_v21  ;;  %v322_v50 = vpop.f32.mrb[26].mxu0  ;;  %4074 = vmatpush1.bf16.msra.mxu1 %v4966_v22  ;;  %v5647_v54 = vpop.f32.mrb[26].mxu1  ;;  %v6372_v21 = vsub.s32 2, %v5550_v32  ;;  %v4982_v22 = vld [vmem:[#allocation2 + $0x3cc] ss:$16 sps:$4 sm:$0xff]  }
 0x121   :  { %v323_v57 = vadd.f32 %v322_v50, %v5562_v28  ;;  %v324_v60 = vpop.f32.mrb[27].mxu0  ;;  %3820 = vmatprep.subr.bf16.mxu0 %v4967_v29  ;;  %4076 = vmatprep.subr.bf16.mxu1 %v4970_v41  ;;  %v5651_v2 = vpop.f32.mrb[27].mxu1  ;;  %v4985_v43 = vld [vmem:[#allocation2 + $0x3e4] ss:$16 sps:$4 sm:$0xff]  }
 0x122   :  { %v325_v3 = vadd.f32 %v324_v60, %v5567_v35  ;;  %1876 = vmatprep.mubr.f32.mxu0 %v919_v49  ;;  %2520 = vmatprep.mubr.f32.mxu1 %v919_v49 }
 0x123   :  { %1877 = vmatmul.mubr.f32.gmra.mrb[88].mxu0 %v918_v55  ;;  %2521 = vmatmul.mubr.f32.gmra.mrb[88].mxu1 %v918_v55  ;;  %v926_v15 = vmax.f32 %v323_v57, 0.0  ;;  %v408_v55 = vadd.f32 %v5572_v40, %v5661_v23  ;;  %v4988_v57 = vld [vmem:[#allocation2 + $0x3ec] ss:$16 sps:$4 sm:$0xff]  }
 0x124   :  { %v927_v7 = vmax.f32 %v325_v3, 0.0  ;;  %3822 = vmatpush1.bf16.msra.mxu0 %v4969_v45  ;;  %v328_v9 = vpop.f32.mrb[28].mxu0  ;;  %4078 = vmatpush1.bf16.msra.mxu1 %v4972_v48  ;;  %v5654_v14 = vpop.f32.mrb[28].mxu1 }
 0x125   :  { %v329_v16 = vadd.f32 %v328_v9, %v5562_v28  ;;  %v330_v19 = vpop.f32.mrb[29].mxu0  ;;  %3824 = vmatprep.subr.bf16.mxu0 %v4973_v51  ;;  %4080 = vmatprep.subr.bf16.mxu1 %v4976_v61  ;;  %v5663_v26 = vpop.f32.mrb[29].mxu1  ;;  %v5672_v51 = vrot.slane %v5556_v33, %v6372_v21  ;;  %v825_v9 = vmax.f32 %v408_v55, 0.0  ;;  %v4999_v55 = vld [vmem:[#allocation2 + $0x420] ss:$16 sps:$4 sm:$0xff]  }
 0x126   :  { %v331_v29 = vadd.f32 %v330_v19, %v5567_v35  ;;  %1882 = vmatprep.mubr.f32.mxu0 %v927_v7  ;;  %2526 = vmatprep.mubr.f32.mxu1 %v927_v7  ;;  %v4994_v19 = vld [vmem:[#allocation2 + $0x40c] ss:$16 sps:$4 sm:$0xff]  }
 0x127   :  { %1883 = vmatmul.mubr.f32.gmra.mrb[90].mxu0 %v926_v15  ;;  %2527 = vmatmul.mubr.f32.gmra.mrb[90].mxu1 %v926_v15  ;;  %v934_v48 = vmax.f32 %v329_v16, 0.0  ;;  %v406_v40 = vadd.f32 %v5569_v37, %v5672_v51  ;;  %v4991_v16 = vld [vmem:[#allocation2 + $0x404] ss:$16 sps:$4 sm:$0xff]   ;;  %v4996_v37 = vld [vmem:[#allocation2 + $0x408] ss:$16 sps:$4 sm:$0xff]  }
 0x128   :  { %v935_v36 = vmax.f32 %v331_v29, 0.0  ;;  %3826 = vmatpush1.bf16.msra.mxu0 %v4975_v5  ;;  %v334_v41 = vpop.f32.mrb[30].mxu0  ;;  %4082 = vmatpush1.bf16.msra.mxu1 %v4978_v6  ;;  %v5666_v45 = vpop.f32.mrb[30].mxu1  ;;  %v4990_v5 = vld [vmem:[#allocation2 + $0x3e8] ss:$16 sps:$4 sm:$0xff]  }
 0x129   :  { %v335_v49 = vadd.f32 %v334_v41, %v5562_v28  ;;  %v336_v50 = vpop.f32.mrb[31].mxu0  ;;  %3828 = vmatprep.subr.bf16.mxu0 %v4979_v12  ;;  %4084 = vmatprep.subr.bf16.mxu1 %v4982_v22  ;;  %v5676_v60 = vpop.f32.mrb[31].mxu1  ;;  %v4987_v28 = vld [vmem:[#allocation2 + $0x3e0] ss:$16 sps:$4 sm:$0xff]   ;;  %v420_v41 = vadd.f32 %v5584_v1, %v5661_v23  ;;  %v418_v1 = vadd.f32 %v5581_v59, %v5672_v51  ;;  %v5008_v59 = vld [vmem:[#allocation2 + $0x448] ss:$16 sps:$4 sm:$0xff]  }
 0x12a   :  { %v337_v61 = vadd.f32 %v336_v50, %v5567_v35  ;;  %1888 = vmatprep.mubr.f32.mxu0 %v935_v36  ;;  %2532 = vmatprep.mubr.f32.mxu1 %v935_v36  ;;  %v414_v35 = vadd.f32 %v5578_v52, %v5661_v23  ;;  %v4993_v22 = vld [vmem:[#allocation2 + $0x400] ss:$16 sps:$4 sm:$0xff]   ;;  %v412_v52 = vadd.f32 %v5575_v47, %v5672_v51  ;;  %v5000_v50 = vld [vmem:[#allocation2 + $0x42c] ss:$16 sps:$4 sm:$0xff]   ;;  %v5002_v47 = vld [vmem:[#allocation2 + $0x428] ss:$16 sps:$4 sm:$0xff]  }
 0x12b   :  { %1889 = vmatmul.mubr.f32.gmra.mrb[92].mxu0 %v934_v48  ;;  %2533 = vmatmul.mubr.f32.gmra.mrb[92].mxu1 %v934_v48  ;;  %v942_v7 = vmax.f32 %v335_v49, 0.0  ;;  %v4997_v49 = vld [vmem:[#allocation2 + $0x424] ss:$16 sps:$4 sm:$0xff]  }
 0x12c   :  { %v943_v3 = vmax.f32 %v337_v61, 0.0  ;;  %3830 = vmatpush1.bf16.msra.mxu0 %v4981_v31  ;;  %4086 = vmatpush1.bf16.msra.mxu1 %v4984_v27  ;;  %v5679_v33 = vpop.f32.mrb[32].mxu0  ;;  %v5681_v6 = vpop.f32.mrb[32].mxu1  ;;  %v824_v27 = vmax.f32 %v406_v40, 0.0  ;;  %v833_v36 = vmax.f32 %v414_v35, 0.0 }
 0x12d   :  { %3832 = vmatprep.subr.bf16.mxu0 %v4985_v43  ;;  %4088 = vmatprep.subr.bf16.mxu1 %v4988_v57  ;;  %v5687_v12 = vpop.f32.mrb[33].mxu0  ;;  %v5689_v15 = vpop.f32.mrb[33].mxu1  ;;  %v5006_v35 = vld [vmem:[#allocation2 + $0x44c] ss:$16 sps:$4 sm:$0xff]  }
 0x12e   :  { %1894 = vmatprep.mubr.f32.mxu0 %v943_v3  ;;  %2538 = vmatprep.mubr.f32.mxu1 %v943_v3  ;;  %v841_v3 = vmax.f32 %v420_v41, 0.0 }
 0x12f   :  { %1895 = vmatmul.mubr.f32.gmra.mrb[94].mxu0 %v942_v7  ;;  %2539 = vmatmul.mubr.f32.gmra.mrb[94].mxu1 %v942_v7 }
 0x130   :  { %3834 = vmatpush1.bf16.msra.mxu0 %v4987_v28  ;;  %4090 = vmatpush1.bf16.msra.mxu1 %v4990_v5  ;;  %v5691_v29 = vpop.f32.mrb[34].mxu0  ;;  %v5693_v31 = vpop.f32.mrb[34].mxu1  ;;  %v832_v28 = vmax.f32 %v412_v52, 0.0  ;;  %v426_v5 = vadd.f32 %v5590_v13, %v5661_v23  ;;  %v424_v13 = vadd.f32 %v5587_v8, %v5672_v51  ;;  %v432_v52 = vadd.f32 %v5596_v25, %v5661_v23  ;;  %v5014_v8 = vld [vmem:[#allocation2 + $0x468] ss:$16 sps:$4 sm:$0xff]  }
 0x131   :  { %1965 = vmatprep.mubr.f32.mxu0 %v825_v9  ;;  %2609 = vmatprep.mubr.f32.mxu1 %v825_v9  ;;  %v5699_v43 = vpop.f32.mrb[35].mxu0  ;;  %v5701_v48 = vpop.f32.mrb[35].mxu1  ;;  %v5003_v9 = vld [vmem:[#allocation2 + $0x444] ss:$16 sps:$4 sm:$0xff]   ;;  %v430_v25 = vadd.f32 %v5593_v20, %v5672_v51  ;;  %v5020_v20 = vld [vmem:[#allocation2 + $0x488] ss:$16 sps:$4 sm:$0xff]  }
 0x132   :  { %3836 = vmatprep.subr.bf16.mxu0 %v4991_v16  ;;  %4092 = vmatprep.subr.bf16.mxu1 %v4994_v19  ;;  %v5005_v16 = vld [vmem:[#allocation2 + $0x440] ss:$16 sps:$4 sm:$0xff]  }
 0x133   :  { %1966 = vmatmul.mubr.f32.vlgmr.msra.gmra.mrb[64].mxu0 %v824_v27  ;;  %2610 = vmatmul.mubr.f32.vlgmr.msra.gmra.mrb[64].mxu1 %v824_v27  ;;  %v849_v27 = vmax.f32 %v426_v5, 0.0  ;;  %v438_v5 = vadd.f32 %v5602_v44, %v5661_v23  ;;  %v436_v44 = vadd.f32 %v5599_v38, %v5672_v51  ;;  %v5026_v38 = vld [vmem:[#allocation2 + $0x4a8] ss:$16 sps:$4 sm:$0xff]  }
 0x134   :  { %3838 = vmatpush1.bf16.msra.mxu0 %v4993_v22  ;;  %4094 = vmatpush1.bf16.msra.mxu1 %v4996_v37  ;;  %v5703_v57 = vpop.f32.mrb[36].mxu0  ;;  %v5705_v61 = vpop.f32.mrb[36].mxu1  ;;  %v840_v37 = vmax.f32 %v418_v1, 0.0  ;;  %v848_v1 = vmax.f32 %v424_v13, 0.0 }
 0x135   :  { %1971 = vmatprep.mubr.f32.mxu0 %v833_v36  ;;  %2615 = vmatprep.mubr.f32.mxu1 %v833_v36  ;;  %v5711_v7 = vpop.f32.mrb[37].mxu0  ;;  %v5713_v40 = vpop.f32.mrb[37].mxu1  ;;  %v865_v62 = vmax.f32 %v438_v5, 0.0  ;;  %v864_v34 = vmax.f32 %v436_v44, 0.0  ;;  %v5029_v44 = vld [vmem:[#allocation2 + $0x4c0] ss:$16 sps:$4 sm:$0xff]  }
 0x136   :  { %3840 = vmatprep.subr.bf16.mxu0 %v4997_v49  ;;  %4096 = vmatprep.subr.bf16.mxu1 %v5000_v50  ;;  %v5009_v49 = vld [vmem:[#allocation2 + $0x464] ss:$16 sps:$4 sm:$0xff]   ;;  %v5012_v50 = vld [vmem:[#allocation2 + $0x46c] ss:$16 sps:$4 sm:$0xff]  }
 0x137   :  { %1972 = vmatmul.mubr.f32.gmra.mrb[66].mxu0 %v832_v28  ;;  %2616 = vmatmul.mubr.f32.gmra.mrb[66].mxu1 %v832_v28 }
 0x138   :  { %3842 = vmatpush1.bf16.msra.mxu0 %v4999_v55  ;;  %4098 = vmatpush1.bf16.msra.mxu1 %v5002_v47  ;;  %v5715_v19 = vpop.f32.mrb[38].mxu0  ;;  %v5717_v22 = vpop.f32.mrb[38].mxu1  ;;  %v5011_v55 = vld [vmem:[#allocation2 + $0x460] ss:$16 sps:$4 sm:$0xff]  }
 0x139   :  { %1977 = vmatprep.mubr.f32.mxu0 %v841_v3  ;;  %2621 = vmatprep.mubr.f32.mxu1 %v841_v3  ;;  %v5723_v36 = vpop.f32.mrb[39].mxu0  ;;  %v5725_v41 = vpop.f32.mrb[39].mxu1  ;;  %v857_v3 = vmax.f32 %v432_v52, 0.0  ;;  %v856_v52 = vmax.f32 %v430_v25, 0.0  ;;  %v5023_v25 = vld [vmem:[#allocation2 + $0x4a0] ss:$16 sps:$4 sm:$0xff]  }
 0x13a   :  { %3844 = vmatprep.subr.bf16.mxu0 %v5003_v9  ;;  %4100 = vmatprep.subr.bf16.mxu1 %v5006_v35 }
 0x13b   :  { %1978 = vmatmul.mubr.f32.gmra.mrb[68].mxu0 %v840_v37  ;;  %2622 = vmatmul.mubr.f32.gmra.mrb[68].mxu1 %v840_v37  ;;  %v5017_v37 = vld [vmem:[#allocation2 + $0x480] ss:$16 sps:$4 sm:$0xff]  }
 0x13c   :  { %3846 = vmatpush1.bf16.msra.mxu0 %v5005_v16  ;;  %4102 = vmatpush1.bf16.msra.mxu1 %v5008_v59  ;;  %v5727_v47 = vpop.f32.mrb[40].mxu0  ;;  %v5729_v28 = vpop.f32.mrb[40].mxu1  ;;  %v5015_v16 = vld [vmem:[#allocation2 + $0x484] ss:$16 sps:$4 sm:$0xff]   ;;  %v5018_v59 = vld [vmem:[#allocation2 + $0x48c] ss:$16 sps:$4 sm:$0xff]  }
 0x13d   :  { %1983 = vmatprep.mubr.f32.mxu0 %v849_v27  ;;  %2627 = vmatprep.mubr.f32.mxu1 %v849_v27  ;;  %v5735_v9 = vpop.f32.mrb[41].mxu0  ;;  %v5737_v35 = vpop.f32.mrb[41].mxu1 }
 0x13e   :  { %3848 = vmatprep.subr.bf16.mxu0 %v5009_v49  ;;  %4104 = vmatprep.subr.bf16.mxu1 %v5012_v50  ;;  %v444_v49 = vadd.f32 %v5608_v58, %v5661_v23  ;;  %v442_v58 = vadd.f32 %v5605_v53, %v5672_v51  ;;  %v5032_v53 = vld [vmem:[#allocation2 + $0x4c8] ss:$16 sps:$4 sm:$0xff]  }
 0x13f   :  { %1984 = vmatmul.mubr.f32.gmra.mrb[70].mxu0 %v848_v1  ;;  %2628 = vmatmul.mubr.f32.gmra.mrb[70].mxu1 %v848_v1  ;;  %v5024_v1 = vld [vmem:[#allocation2 + $0x4ac] ss:$16 sps:$4 sm:$0xff]  }
 0x140   :  { %3850 = vmatpush1.bf16.msra.mxu0 %v5011_v55  ;;  %4106 = vmatpush1.bf16.msra.mxu1 %v5014_v8  ;;  %v5739_v13 = vpop.f32.mrb[42].mxu0  ;;  %v5741_v27 = vpop.f32.mrb[42].mxu1  ;;  %v5021_v8 = vld [vmem:[#allocation2 + $0x4a4] ss:$16 sps:$4 sm:$0xff]   ;;  %v873_v21 = vmax.f32 %v444_v49, 0.0  ;;  %v872_v0 = vmax.f32 %v442_v58, 0.0 }
 0x141   :  { %6374 = vst [vmem:[#allocation5_spill] sm:$0xff] %v5741_v27  ;;  %1989 = vmatprep.mubr.f32.mxu0 %v857_v3  ;;  %2633 = vmatprep.mubr.f32.mxu1 %v857_v3  ;;  %v5747_v50 = vpop.f32.mrb[43].mxu0  ;;  %v5749_v55 = vpop.f32.mrb[43].mxu1  ;;  %v5035_v58 = vld [vmem:[#allocation2 + $0x4e0] ss:$16 sps:$4 sm:$0xff]  }
 0x142   :  { %6375 = vst [vmem:[#allocation6_spill] sm:$0xff] %v5749_v55  ;;  %3852 = vmatprep.subr.bf16.mxu0 %v5015_v16  ;;  %4108 = vmatprep.subr.bf16.mxu1 %v5018_v59  ;;  %v450_v16 = vadd.f32 %v5614_v10, %v5661_v23  ;;  %v448_v10 = vadd.f32 %v5611_v4, %v5672_v51  ;;  %v5038_v4 = vld [vmem:[#allocation2 + $0x4e8] ss:$16 sps:$4 sm:$0xff]   ;;  %v5078_v55 = vld [vmem:[#allocation2 + $0x5cc] ss:$16 sps:$4 sm:$0xff]  }
 0x143   :  { %1990 = vmatmul.mubr.f32.gmra.mrb[72].mxu0 %v856_v52  ;;  %2634 = vmatmul.mubr.f32.gmra.mrb[72].mxu1 %v856_v52  ;;  %v5030_v52 = vld [vmem:[#allocation2 + $0x4cc] ss:$16 sps:$4 sm:$0xff]  }
 0x144   :  { %3854 = vmatpush1.bf16.msra.mxu0 %v5017_v37  ;;  %4110 = vmatpush1.bf16.msra.mxu1 %v5020_v20  ;;  %v5751_v5 = vpop.f32.mrb[44].mxu0  ;;  %v5753_v3 = vpop.f32.mrb[44].mxu1  ;;  %v5027_v20 = vld [vmem:[#allocation2 + $0x4c4] ss:$16 sps:$4 sm:$0xff]  }
 0x145   :  { %6376 = vst [vmem:[#allocation7_spill] sm:$0xff] %v5753_v3  ;;  %1995 = vmatprep.mubr.f32.mxu0 %v865_v62  ;;  %2639 = vmatprep.mubr.f32.mxu1 %v865_v62  ;;  %v5759_v59 = vpop.f32.mrb[45].mxu0  ;;  %v5761_v37 = vpop.f32.mrb[45].mxu1  ;;  %v881_v3 = vmax.f32 %v450_v16, 0.0 }
 0x146   :  { %6377 = vst [vmem:[#allocation8_spill] sm:$0xff] %v5761_v37  ;;  %3856 = vmatprep.subr.bf16.mxu0 %v5021_v8  ;;  %4112 = vmatprep.subr.bf16.mxu1 %v5024_v1  ;;  %v456_v8 = vadd.f32 %v5620_v24, %v5661_v23  ;;  %v454_v24 = vadd.f32 %v5617_v18, %v5672_v51  ;;  %v5044_v18 = vld [vmem:[#allocation2 + $0x508] ss:$16 sps:$4 sm:$0xff]  }
 0x147   :  { %1996 = vmatmul.mubr.f32.gmra.mrb[74].mxu0 %v864_v34  ;;  %2640 = vmatmul.mubr.f32.gmra.mrb[74].mxu1 %v864_v34 }
 0x148   :  { %3858 = vmatpush1.bf16.msra.mxu0 %v5023_v25  ;;  %4114 = vmatpush1.bf16.msra.mxu1 %v5026_v38  ;;  %v5763_v49 = vpop.f32.mrb[46].mxu0  ;;  %v5765_v62 = vpop.f32.mrb[46].mxu1  ;;  %v5033_v25 = vld [vmem:[#allocation2 + $0x4e4] ss:$16 sps:$4 sm:$0xff]   ;;  %v5036_v38 = vld [vmem:[#allocation2 + $0x4ec] ss:$16 sps:$4 sm:$0xff]  }
 0x149   :  { %6378 = vst [vmem:[#allocation9_spill] sm:$0xff] %v5765_v62  ;;  %2001 = vmatprep.mubr.f32.mxu0 %v873_v21  ;;  %2645 = vmatprep.mubr.f32.mxu1 %v873_v21  ;;  %v5771_v1 = vpop.f32.mrb[47].mxu0  ;;  %v5773_v34 = vpop.f32.mrb[47].mxu1  ;;  %v880_v62 = vmax.f32 %v448_v10, 0.0  ;;  %v889_v37 = vmax.f32 %v456_v8, 0.0 }
 0x14a   :  { %6379 = vst [vmem:[#allocation10_spill] sm:$0xff] %v5773_v34  ;;  %3860 = vmatprep.subr.bf16.mxu0 %v5027_v20  ;;  %4116 = vmatprep.subr.bf16.mxu1 %v5030_v52  ;;  %v462_v20 = vadd.f32 %v5626_v46, %v5661_v23  ;;  %v5041_v10 = vld [vmem:[#allocation2 + $0x500] ss:$16 sps:$4 sm:$0xff]   ;;  %v460_v46 = vadd.f32 %v5623_v39, %v5672_v51  ;;  %v5050_v39 = vld [vmem:[#allocation2 + $0x528] ss:$16 sps:$4 sm:$0xff]  }
 0x14b   :  { %2002 = vmatmul.mubr.f32.gmra.mrb[76].mxu0 %v872_v0  ;;  %2646 = vmatmul.mubr.f32.gmra.mrb[76].mxu1 %v872_v0 }
 0x14c   :  { %3862 = vmatpush1.bf16.msra.mxu0 %v5029_v44  ;;  %4118 = vmatpush1.bf16.msra.mxu1 %v5032_v53  ;;  %v5775_v16 = vpop.f32.mrb[48].mxu0  ;;  %v5777_v21 = vpop.f32.mrb[48].mxu1  ;;  %v5039_v44 = vld [vmem:[#allocation2 + $0x504] ss:$16 sps:$4 sm:$0xff]   ;;  %v5042_v53 = vld [vmem:[#allocation2 + $0x50c] ss:$16 sps:$4 sm:$0xff]  }
 0x14d   :  { %6380 = vst [vmem:[#allocation11_spill] sm:$0xff] %v5777_v21  ;;  %2007 = vmatprep.mubr.f32.mxu0 %v881_v3  ;;  %2651 = vmatprep.mubr.f32.mxu1 %v881_v3  ;;  %v5783_v52 = vpop.f32.mrb[49].mxu0  ;;  %v5785_v0 = vpop.f32.mrb[49].mxu1  ;;  %v888_v21 = vmax.f32 %v454_v24, 0.0  ;;  %v897_v34 = vmax.f32 %v462_v20, 0.0 }
 0x14e   :  { %6381 = vst [vmem:[#allocation12_spill] sm:$0xff] %v5785_v0  ;;  %3864 = vmatprep.subr.bf16.mxu0 %v5033_v25  ;;  %4120 = vmatprep.subr.bf16.mxu1 %v5036_v38  ;;  %v468_v25 = vadd.f32 %v5632_v63, %v5661_v23  ;;  %v5047_v24 = vld [vmem:[#allocation2 + $0x520] ss:$16 sps:$4 sm:$0xff]   ;;  %v466_v63 = vadd.f32 %v5629_v56, %v5672_v51  ;;  %v5056_v56 = vld [vmem:[#allocation2 + $0x548] ss:$16 sps:$4 sm:$0xff]  }
 0x14f   :  { %2008 = vmatmul.mubr.f32.gmra.mrb[78].mxu0 %v880_v62  ;;  %2652 = vmatmul.mubr.f32.gmra.mrb[78].mxu1 %v880_v62 }
 0x150   :  { %3866 = vmatpush1.bf16.msra.mxu0 %v5035_v58  ;;  %4122 = vmatpush1.bf16.msra.mxu1 %v5038_v4  ;;  %v5787_v8 = vpop.f32.mrb[50].mxu0  ;;  %v5789_v3 = vpop.f32.mrb[50].mxu1  ;;  %v5045_v58 = vld [vmem:[#allocation2 + $0x524] ss:$16 sps:$4 sm:$0xff]   ;;  %v5048_v4 = vld [vmem:[#allocation2 + $0x52c] ss:$16 sps:$4 sm:$0xff]  }
 0x151   :  { %6382 = vst [vmem:[#allocation13_spill] sm:$0xff] %v5789_v3  ;;  %2013 = vmatprep.mubr.f32.mxu0 %v889_v37  ;;  %2657 = vmatprep.mubr.f32.mxu1 %v889_v37  ;;  %v5795_v38 = vpop.f32.mrb[51].mxu0  ;;  %v5797_v62 = vpop.f32.mrb[51].mxu1  ;;  %v896_v3 = vmax.f32 %v460_v46, 0.0  ;;  %v905_v0 = vmax.f32 %v468_v25, 0.0 }
 0x152   :  { %6383 = vst [vmem:[#allocation14_spill] sm:$0xff] %v5797_v62  ;;  %3868 = vmatprep.subr.bf16.mxu0 %v5039_v44  ;;  %4124 = vmatprep.subr.bf16.mxu1 %v5042_v53  ;;  %v474_v44 = vadd.f32 %v5638_v17, %v5661_v23  ;;  %v5053_v46 = vld [vmem:[#allocation2 + $0x540] ss:$16 sps:$4 sm:$0xff]   ;;  %v472_v17 = vadd.f32 %v5635_v11, %v5672_v51  ;;  %v5062_v11 = vld [vmem:[#allocation2 + $0x568] ss:$16 sps:$4 sm:$0xff]  }
 0x153   :  { %2014 = vmatmul.mubr.f32.gmra.mrb[80].mxu0 %v888_v21  ;;  %2658 = vmatmul.mubr.f32.gmra.mrb[80].mxu1 %v888_v21 }
 0x154   :  { %3870 = vmatpush1.bf16.msra.mxu0 %v5041_v10  ;;  %4126 = vmatpush1.bf16.msra.mxu1 %v5044_v18  ;;  %v5799_v20 = vpop.f32.mrb[52].mxu0  ;;  %v5801_v37 = vpop.f32.mrb[52].mxu1  ;;  %v5051_v10 = vld [vmem:[#allocation2 + $0x544] ss:$16 sps:$4 sm:$0xff]   ;;  %v5054_v18 = vld [vmem:[#allocation2 + $0x54c] ss:$16 sps:$4 sm:$0xff]  }
 0x155   :  { %6384 = vst [vmem:[#allocation15_spill] sm:$0xff] %v5801_v37  ;;  %2019 = vmatprep.mubr.f32.mxu0 %v897_v34  ;;  %2663 = vmatprep.mubr.f32.mxu1 %v897_v34  ;;  %v5807_v53 = vpop.f32.mrb[53].mxu0  ;;  %v5809_v21 = vpop.f32.mrb[53].mxu1  ;;  %v904_v37 = vmax.f32 %v466_v63, 0.0  ;;  %v913_v62 = vmax.f32 %v474_v44, 0.0 }
 0x156   :  { %6385 = vst [vmem:[#allocation16_spill] sm:$0xff] %v5809_v21  ;;  %3872 = vmatprep.subr.bf16.mxu0 %v5045_v58  ;;  %4128 = vmatprep.subr.bf16.mxu1 %v5048_v4  ;;  %v480_v58 = vadd.f32 %v5644_v42, %v5661_v23  ;;  %v5059_v63 = vld [vmem:[#allocation2 + $0x560] ss:$16 sps:$4 sm:$0xff]   ;;  %v478_v42 = vadd.f32 %v5641_v30, %v5672_v51  ;;  %v5068_v30 = vld [vmem:[#allocation2 + $0x588] ss:$16 sps:$4 sm:$0xff]  }
 0x157   :  { %2020 = vmatmul.mubr.f32.gmra.mrb[82].mxu0 %v896_v3  ;;  %2664 = vmatmul.mubr.f32.gmra.mrb[82].mxu1 %v896_v3 }
 0x158   :  { %3874 = vmatpush1.bf16.msra.mxu0 %v5047_v24  ;;  %4130 = vmatpush1.bf16.msra.mxu1 %v5050_v39  ;;  %v5811_v25 = vpop.f32.mrb[54].mxu0  ;;  %v5813_v34 = vpop.f32.mrb[54].mxu1  ;;  %v5057_v24 = vld [vmem:[#allocation2 + $0x564] ss:$16 sps:$4 sm:$0xff]   ;;  %v5060_v39 = vld [vmem:[#allocation2 + $0x56c] ss:$16 sps:$4 sm:$0xff]  }
 0x159   :  { %6386 = vst [vmem:[#allocation17_spill] sm:$0xff] %v5813_v34  ;;  %2025 = vmatprep.mubr.f32.mxu0 %v905_v0  ;;  %2669 = vmatprep.mubr.f32.mxu1 %v905_v0  ;;  %v5819_v4 = vpop.f32.mrb[55].mxu0  ;;  %v5821_v3 = vpop.f32.mrb[55].mxu1  ;;  %v912_v34 = vmax.f32 %v472_v17, 0.0  ;;  %v921_v21 = vmax.f32 %v480_v58, 0.0  ;;  %v86_v58 = vsub.s32 5, %v5550_v32 }
 0x15a   :  { %6387 = vst [vmem:[#allocation18_spill] sm:$0xff] %v5821_v3  ;;  %3876 = vmatprep.subr.bf16.mxu0 %v5051_v10  ;;  %4132 = vmatprep.subr.bf16.mxu1 %v5054_v18  ;;  %v486_v10 = vadd.f32 %v5651_v2, %v5661_v23  ;;  %v5065_v17 = vld [vmem:[#allocation2 + $0x580] ss:$16 sps:$4 sm:$0xff]   ;;  %v920_v2 = vmax.f32 %v478_v42, 0.0  ;;  %v5072_v3 = vld [vmem:[#allocation2 + $0x5ac] ss:$16 sps:$4 sm:$0xff]  }
 0x15b   :  { %2026 = vmatmul.mubr.f32.gmra.mrb[84].mxu0 %v904_v37  ;;  %2670 = vmatmul.mubr.f32.gmra.mrb[84].mxu1 %v904_v37  ;;  %v5071_v42 = vld [vmem:[#allocation2 + $0x5a0] ss:$16 sps:$4 sm:$0xff]  }
 0x15c   :  { %3878 = vmatpush1.bf16.msra.mxu0 %v5053_v46  ;;  %4134 = vmatpush1.bf16.msra.mxu1 %v5056_v56  ;;  %v5823_v44 = vpop.f32.mrb[56].mxu0  ;;  %v5825_v0 = vpop.f32.mrb[56].mxu1  ;;  %v5063_v46 = vld [vmem:[#allocation2 + $0x584] ss:$16 sps:$4 sm:$0xff]   ;;  %v5066_v56 = vld [vmem:[#allocation2 + $0x58c] ss:$16 sps:$4 sm:$0xff]  }
 0x15d   :  { %6388 = vst [vmem:[#allocation19_spill] sm:$0xff] %v5825_v0  ;;  %2031 = vmatprep.mubr.f32.mxu0 %v913_v62  ;;  %2675 = vmatprep.mubr.f32.mxu1 %v913_v62  ;;  %v5831_v18 = vpop.f32.mrb[57].mxu0  ;;  %v5833_v37 = vpop.f32.mrb[57].mxu1 }
 0x15e   :  { %6389 = vst [vmem:[#allocation20_spill] sm:$0xff] %v5833_v37  ;;  %3880 = vmatprep.subr.bf16.mxu0 %v5057_v24  ;;  %4136 = vmatprep.subr.bf16.mxu1 %v5060_v39  ;;  %v484_v37 = vadd.f32 %v5647_v54, %v5672_v51  ;;  %v929_v24 = vmax.f32 %v486_v10, 0.0  ;;  %v5074_v54 = vld [vmem:[#allocation2 + $0x5a8] ss:$16 sps:$4 sm:$0xff]   ;;  %v82_v10 = vsub.s32 4, %v5550_v32 }
 0x15f   :  { %2032 = vmatmul.mubr.f32.gmra.mrb[86].mxu0 %v912_v34  ;;  %2676 = vmatmul.mubr.f32.gmra.mrb[86].mxu1 %v912_v34  ;;  %v492_v34 = vadd.f32 %v5663_v26, %v5661_v23  ;;  %v5852_v26 = vld [vmem:[%s6364_s2] sm:$0xff] }
 0x160   :  { %3882 = vmatpush1.bf16.msra.mxu0 %v5059_v63  ;;  %4138 = vmatpush1.bf16.msra.mxu1 %v5062_v11  ;;  %v5836_v62 = vpop.f32.mrb[58].mxu0  ;;  %v5838_v0 = vpop.f32.mrb[58].mxu1  ;;  %v5069_v11 = vld [vmem:[#allocation2 + $0x5a4] ss:$16 sps:$4 sm:$0xff]  }
 0x161   :  { %6390 = vst [vmem:[#allocation21_spill] sm:$0xff] %v5838_v0  ;;  %2037 = vmatprep.mubr.f32.mxu0 %v921_v21  ;;  %2681 = vmatprep.mubr.f32.mxu1 %v921_v21  ;;  %v5844_v39 = vpop.f32.mrb[59].mxu0  ;;  %v5846_v63 = vpop.f32.mrb[59].mxu1  ;;  %v5855_v21 = vrot.slane %v5852_v26, %v86_v58  ;;  %v928_v0 = vmax.f32 %v484_v37, 0.0  ;;  %v5075_v58 = vld [vmem:[#allocation2 + $0x5c4] ss:$16 sps:$4 sm:$0xff]  }
 0x162   :  { %6391 = vst [vmem:[#allocation22_spill] sm:$0xff] %v5846_v63  ;;  %3884 = vmatprep.subr.bf16.mxu0 %v5063_v46  ;;  %4140 = vmatprep.subr.bf16.mxu1 %v5066_v56  ;;  %v5077_v37 = vld [vmem:[#allocation2 + $0x5c0] ss:$16 sps:$4 sm:$0xff]  }
 0x163   :  { %2038 = vmatmul.mubr.f32.gmra.mrb[88].mxu0 %v920_v2  ;;  %2682 = vmatmul.mubr.f32.gmra.mrb[88].mxu1 %v920_v2  ;;  %v498_v2 = vadd.f32 %v5676_v60, %v5661_v23 }
 0x164   :  { %3886 = vmatpush1.bf16.msra.mxu0 %v5065_v17  ;;  %4142 = vmatpush1.bf16.msra.mxu1 %v5068_v30  ;;  %v5857_v46 = vpop.f32.mrb[60].mxu0  ;;  %v5859_v56 = vpop.f32.mrb[60].mxu1  ;;  %v490_v17 = vadd.f32 %v5654_v14, %v5672_v51  ;;  %v937_v30 = vmax.f32 %v492_v34, 0.0  ;;  %v5870_v14 = vrot.slane %v5852_v26, %v82_v10  ;;  %v5081_v10 = vld [vmem:[#allocation2 + $0x5e4] ss:$16 sps:$4 sm:$0xff]  }
 0x165   :  { %6392 = vst [vmem:[#allocation23_spill] sm:$0xff] %v5859_v56  ;;  %2043 = vmatprep.mubr.f32.mxu0 %v929_v24  ;;  %2687 = vmatprep.mubr.f32.mxu1 %v929_v24  ;;  %v5865_v63 = vpop.f32.mrb[61].mxu0  ;;  %v5867_v27 = vpop.f32.mrb[61].mxu1  ;;  %v5080_v24 = vld [vmem:[#allocation2 + $0x5c8] ss:$16 sps:$4 sm:$0xff]  }
 0x166   :  { %3888 = vmatprep.subr.bf16.mxu0 %v5069_v11  ;;  %4144 = vmatprep.subr.bf16.mxu1 %v5072_v3  ;;  %v936_v60 = vmax.f32 %v490_v17, 0.0  ;;  %v496_v11 = vadd.f32 %v5666_v45, %v5672_v51  ;;  %v945_v3 = vmax.f32 %v498_v2, 0.0  ;;  %v5084_v56 = vld [vmem:[#allocation2 + $0x5ec] ss:$16 sps:$4 sm:$0xff]   ;;  %v5083_v17 = vld [vmem:[#allocation2 + $0x5e0] ss:$16 sps:$4 sm:$0xff]  }
 0x167   :  { %2044 = vmatmul.mubr.f32.gmra.mrb[90].mxu0 %v928_v0  ;;  %2688 = vmatmul.mubr.f32.gmra.mrb[90].mxu1 %v928_v0  ;;  %v569_v0 = vadd.f32 %v5687_v12, %v5855_v21  ;;  %v5086_v45 = vld [vmem:[#allocation2 + $0x5e8] ss:$16 sps:$4 sm:$0xff]   ;;  %v575_v12 = vadd.f32 %v5699_v43, %v5855_v21  ;;  %v581_v43 = vadd.f32 %v5711_v7, %v5855_v21 }
 0x168   :  { %3890 = vmatpush1.bf16.msra.mxu0 %v5071_v42  ;;  %4146 = vmatpush1.bf16.msra.mxu1 %v5074_v54  ;;  %v5872_v34 = vpop.f32.mrb[62].mxu0  ;;  %v5874_v23 = vpop.f32.mrb[62].mxu1  ;;  %v944_v51 = vmax.f32 %v496_v11, 0.0  ;;  %v587_v7 = vadd.f32 %v5723_v36, %v5855_v21  ;;  %v593_v36 = vadd.f32 %v5735_v9, %v5855_v21  ;;  %v599_v9 = vadd.f32 %v5747_v50, %v5855_v21 }
 0x169   :  { %2049 = vmatprep.mubr.f32.mxu0 %v937_v30  ;;  %2693 = vmatprep.mubr.f32.mxu1 %v937_v30  ;;  %v5880_v42 = vpop.f32.mrb[63].mxu0  ;;  %v5882_v54 = vpop.f32.mrb[63].mxu1  ;;  %v567_v30 = vadd.f32 %v5679_v33, %v5870_v14  ;;  %v827_v2 = vmax.f32 %v569_v0, 0.0  ;;  %v573_v33 = vadd.f32 %v5691_v29, %v5870_v14  ;;  %v835_v11 = vmax.f32 %v575_v12, 0.0  ;;  %v5095_v0 = vld [vmem:[#allocation2 + $0x620] ss:$16 sps:$4 sm:$0xff]  }
 0x16a   :  { %3892 = vmatprep.subr.bf16.mxu0 %v5075_v58  ;;  %4148 = vmatprep.subr.bf16.mxu1 %v5078_v55  ;;  %v5087_v55 = vld [vmem:[#allocation2 + $0x604] ss:$16 sps:$4 sm:$0xff]   ;;  %v5090_v58 = vld [vmem:[#allocation2 + $0x60c] ss:$16 sps:$4 sm:$0xff]   ;;  %v579_v29 = vadd.f32 %v5703_v57, %v5870_v14  ;;  %v5104_v12 = vld [vmem:[#allocation2 + $0x648] ss:$16 sps:$4 sm:$0xff]   ;;  %v585_v57 = vadd.f32 %v5715_v19, %v5870_v14  ;;  %v591_v19 = vadd.f32 %v5727_v47, %v5870_v14 }
 0x16b   :  { %2050 = vmatmul.mubr.f32.gmra.mrb[92].mxu0 %v936_v60  ;;  %2694 = vmatmul.mubr.f32.gmra.mrb[92].mxu1 %v936_v60  ;;  %v826_v60 = vmax.f32 %v567_v30, 0.0  ;;  %v5102_v30 = vld [vmem:[#allocation2 + $0x64c] ss:$16 sps:$4 sm:$0xff]   ;;  %v597_v47 = vadd.f32 %v5739_v13, %v5870_v14  ;;  %v605_v50 = vadd.f32 %v5759_v59, %v5855_v21  ;;  %v603_v13 = vadd.f32 %v5751_v5, %v5870_v14 }
 0x16c   :  { %3894 = vmatpush1.bf16.msra.mxu0 %v5077_v37  ;;  %4150 = vmatpush1.bf16.msra.mxu1 %v5080_v24  ;;  %v5089_v37 = vld [vmem:[#allocation2 + $0x600] ss:$16 sps:$4 sm:$0xff]   ;;  %v5092_v24 = vld [vmem:[#allocation2 + $0x608] ss:$16 sps:$4 sm:$0xff]   ;;  %v611_v59 = vadd.f32 %v5771_v1, %v5855_v21  ;;  %v609_v5 = vadd.f32 %v5763_v49, %v5870_v14  ;;  %v617_v1 = vadd.f32 %v5783_v52, %v5855_v21 }
 0x16d   :  { %2055 = vmatprep.mubr.f32.mxu0 %v945_v3  ;;  %2699 = vmatprep.mubr.f32.mxu1 %v945_v3  ;;  %v5096_v3 = vld [vmem:[#allocation2 + $0x62c] ss:$16 sps:$4 sm:$0xff]   ;;  %v615_v49 = vadd.f32 %v5775_v16, %v5870_v14  ;;  %v623_v52 = vadd.f32 %v5795_v38, %v5855_v21  ;;  %v621_v16 = vadd.f32 %v5787_v8, %v5870_v14 }
 0x16e   :  { %3896 = vmatprep.subr.bf16.mxu0 %v5081_v10  ;;  %4152 = vmatprep.subr.bf16.mxu1 %v5084_v56  ;;  %v5093_v56 = vld [vmem:[#allocation2 + $0x624] ss:$16 sps:$4 sm:$0xff]   ;;  %v5098_v10 = vld [vmem:[#allocation2 + $0x628] ss:$16 sps:$4 sm:$0xff]   ;;  %v629_v38 = vadd.f32 %v5807_v53, %v5855_v21  ;;  %v627_v8 = vadd.f32 %v5799_v20, %v5870_v14  ;;  %v635_v53 = vadd.f32 %v5819_v4, %v5855_v21 }
 0x16f   :  { %2056 = vmatmul.mubr.f32.gmra.mrb[94].mxu0 %v944_v51  ;;  %2700 = vmatmul.mubr.f32.gmra.mrb[94].mxu1 %v944_v51  ;;  %v5099_v51 = vld [vmem:[#allocation2 + $0x644] ss:$16 sps:$4 sm:$0xff]   ;;  %v633_v20 = vadd.f32 %v5811_v25, %v5870_v14  ;;  %v641_v4 = vadd.f32 %v5831_v18, %v5855_v21  ;;  %v639_v25 = vadd.f32 %v5823_v44, %v5870_v14 }
 0x170   :  { %3898 = vmatpush1.bf16.msra.mxu0 %v5083_v17  ;;  %4154 = vmatpush1.bf16.msra.mxu1 %v5086_v45  ;;  %v834_v17 = vmax.f32 %v573_v33, 0.0  ;;  %v843_v45 = vmax.f32 %v581_v43, 0.0  ;;  %v5110_v33 = vld [vmem:[#allocation2 + $0x668] ss:$16 sps:$4 sm:$0xff]   ;;  %v859_v43 = vmax.f32 %v593_v36, 0.0  ;;  %v647_v18 = vadd.f32 %v5844_v39, %v5855_v21 }
 0x171   :  { %2126 = vmatprep.mubr.f32.mxu0 %v827_v2  ;;  %2770 = vmatprep.mubr.f32.mxu1 %v827_v2  ;;  %v5101_v2 = vld [vmem:[#allocation2 + $0x640] ss:$16 sps:$4 sm:$0xff]   ;;  %v5128_v36 = vld [vmem:[#allocation2 + $0x6c8] ss:$16 sps:$4 sm:$0xff]   ;;  %v645_v44 = vadd.f32 %v5836_v62, %v5870_v14  ;;  %v653_v39 = vadd.f32 %v5865_v63, %v5855_v21  ;;  %v659_v63 = vadd.f32 %v5880_v42, %v5855_v21 }
 0x172   :  { %3900 = vmatprep.subr.bf16.mxu0 %v5087_v55  ;;  %4156 = vmatprep.subr.bf16.mxu1 %v5090_v58  ;;  %v842_v55 = vmax.f32 %v579_v29, 0.0  ;;  %v851_v58 = vmax.f32 %v587_v7, 0.0  ;;  %v867_v29 = vmax.f32 %v599_v9, 0.0  ;;  %v5120_v7 = vld [vmem:[#allocation2 + $0x6ac] ss:$16 sps:$4 sm:$0xff]   ;;  %v891_v9 = vmax.f32 %v617_v1, 0.0 }
 0x173   :  { %2127 = vmatmul.mubr.f32.vlgmr.msra.gmra.mrb[64].mxu0 %v826_v60  ;;  %2771 = vmatmul.mubr.f32.vlgmr.msra.gmra.mrb[64].mxu1 %v826_v60  ;;  %v5107_v60 = vld [vmem:[#allocation2 + $0x660] ss:$16 sps:$4 sm:$0xff]   ;;  %v923_v1 = vmax.f32 %v641_v4, 0.0  ;;  %v5170_v62 = vld [vmem:[#allocation2 + $0x7a8] ss:$16 sps:$4 sm:$0xff]   ;;  %v657_v21 = vadd.f32 %v5872_v34, %v5870_v14  ;;  %v947_v42 = vmax.f32 %v659_v63, 0.0 }
 0x174   :  { %3902 = vmatpush1.bf16.msra.mxu0 %v5089_v37  ;;  %4158 = vmatpush1.bf16.msra.mxu1 %v5092_v24  ;;  %v5105_v37 = vld [vmem:[#allocation2 + $0x664] ss:$16 sps:$4 sm:$0xff]   ;;  %v5108_v24 = vld [vmem:[#allocation2 + $0x66c] ss:$16 sps:$4 sm:$0xff]   ;;  %v5179_v34 = vld [vmem:[#allocation2 + $0x7e0] ss:$16 sps:$4 sm:$0xff]  }
 0x175   :  { %2132 = vmatprep.mubr.f32.mxu0 %v835_v11  ;;  %2776 = vmatprep.mubr.f32.mxu1 %v835_v11  ;;  %v850_v11 = vmax.f32 %v585_v57, 0.0  ;;  %v5126_v57 = vld [vmem:[#allocation2 + $0x6cc] ss:$16 sps:$4 sm:$0xff]  }
 0x176   :  { %3904 = vmatprep.subr.bf16.mxu0 %v5093_v56  ;;  %4160 = vmatprep.subr.bf16.mxu1 %v5096_v3  ;;  %v5111_v56 = vld [vmem:[#allocation2 + $0x684] ss:$16 sps:$4 sm:$0xff]   ;;  %v5114_v3 = vld [vmem:[#allocation2 + $0x68c] ss:$16 sps:$4 sm:$0xff]  }
 0x177   :  { %2133 = vmatmul.mubr.f32.gmra.mrb[66].mxu0 %v834_v17  ;;  %2777 = vmatmul.mubr.f32.gmra.mrb[66].mxu1 %v834_v17  ;;  %v858_v17 = vmax.f32 %v591_v19, 0.0  ;;  %v5134_v19 = vld [vmem:[#allocation2 + $0x6e8] ss:$16 sps:$4 sm:$0xff]  }
 0x178   :  { %3906 = vmatpush1.bf16.msra.mxu0 %v5095_v0  ;;  %4162 = vmatpush1.bf16.msra.mxu1 %v5098_v10  ;;  %v5113_v0 = vld [vmem:[#allocation2 + $0x680] ss:$16 sps:$4 sm:$0xff]   ;;  %v5116_v10 = vld [vmem:[#allocation2 + $0x688] ss:$16 sps:$4 sm:$0xff]  }
 0x179   :  { %2138 = vmatprep.mubr.f32.mxu0 %v843_v45  ;;  %2782 = vmatprep.mubr.f32.mxu1 %v843_v45  ;;  %v5117_v45 = vld [vmem:[#allocation2 + $0x6a4] ss:$16 sps:$4 sm:$0xff]   ;;  %v3093_v4 = vld [vmem:[%s6367_s5 + $0x8] sm:$0xff] }
 0x17a   :  { %3908 = vmatprep.subr.bf16.mxu0 %v5099_v51  ;;  %4164 = vmatprep.subr.bf16.mxu1 %v5102_v30  ;;  %v5119_v51 = vld [vmem:[#allocation2 + $0x6a0] ss:$16 sps:$4 sm:$0xff]   ;;  %v5122_v30 = vld [vmem:[#allocation2 + $0x6a8] ss:$16 sps:$4 sm:$0xff]  }
 0x17b   :  { %2139 = vmatmul.mubr.f32.gmra.mrb[68].mxu0 %v842_v55  ;;  %2783 = vmatmul.mubr.f32.gmra.mrb[68].mxu1 %v842_v55  ;;  %v5123_v55 = vld [vmem:[#allocation2 + $0x6c4] ss:$16 sps:$4 sm:$0xff]  }
 0x17c   :  { %3910 = vmatpush1.bf16.msra.mxu0 %v5101_v2  ;;  %4166 = vmatpush1.bf16.msra.mxu1 %v5104_v12  ;;  %v866_v2 = vmax.f32 %v597_v47, 0.0  ;;  %v875_v12 = vmax.f32 %v605_v50, 0.0  ;;  %v899_v47 = vmax.f32 %v623_v52, 0.0  ;;  %v5144_v50 = vld [vmem:[#allocation2 + $0x72c] ss:$16 sps:$4 sm:$0xff]  }
 0x17d   :  { %2144 = vmatprep.mubr.f32.mxu0 %v851_v58  ;;  %2788 = vmatprep.mubr.f32.mxu1 %v851_v58  ;;  %v5125_v58 = vld [vmem:[#allocation2 + $0x6c0] ss:$16 sps:$4 sm:$0xff]   ;;  %v5165_v52 = vld [vmem:[#allocation2 + $0x7a4] ss:$16 sps:$4 sm:$0xff]  }
 0x17e   :  { %3912 = vmatprep.subr.bf16.mxu0 %v5105_v37  ;;  %4168 = vmatprep.subr.bf16.mxu1 %v5108_v24  ;;  %v874_v37 = vmax.f32 %v603_v13, 0.0  ;;  %v883_v24 = vmax.f32 %v611_v59, 0.0  ;;  %v5150_v13 = vld [vmem:[#allocation2 + $0x74c] ss:$16 sps:$4 sm:$0xff]   ;;  %v5152_v59 = vld [vmem:[#allocation2 + $0x748] ss:$16 sps:$4 sm:$0xff]  }
 0x17f   :  { %2145 = vmatmul.mubr.f32.gmra.mrb[70].mxu0 %v850_v11  ;;  %2789 = vmatmul.mubr.f32.gmra.mrb[70].mxu1 %v850_v11  ;;  %v5131_v11 = vld [vmem:[#allocation2 + $0x6e0] ss:$16 sps:$4 sm:$0xff]  }
 0x180   :  { %3914 = vmatpush1.bf16.msra.mxu0 %v5107_v60  ;;  %4170 = vmatpush1.bf16.msra.mxu1 %v5110_v33  ;;  %v5129_v60 = vld [vmem:[#allocation2 + $0x6e4] ss:$16 sps:$4 sm:$0xff]   ;;  %v5132_v33 = vld [vmem:[#allocation2 + $0x6ec] ss:$16 sps:$4 sm:$0xff]  }
 0x181   :  { %2150 = vmatprep.mubr.f32.mxu0 %v859_v43  ;;  %2794 = vmatprep.mubr.f32.mxu1 %v859_v43  ;;  %v882_v43 = vmax.f32 %v609_v5, 0.0  ;;  %v5158_v5 = vld [vmem:[#allocation2 + $0x768] ss:$16 sps:$4 sm:$0xff]  }
 0x182   :  { %3916 = vmatprep.subr.bf16.mxu0 %v5111_v56  ;;  %4172 = vmatprep.subr.bf16.mxu1 %v5114_v3  ;;  %v5135_v56 = vld [vmem:[#allocation2 + $0x704] ss:$16 sps:$4 sm:$0xff]   ;;  %v5138_v3 = vld [vmem:[#allocation2 + $0x70c] ss:$16 sps:$4 sm:$0xff]  }
 0x183   :  { %2151 = vmatmul.mubr.f32.gmra.mrb[72].mxu0 %v858_v17  ;;  %2795 = vmatmul.mubr.f32.gmra.mrb[72].mxu1 %v858_v17  ;;  %v890_v17 = vmax.f32 %v615_v49, 0.0  ;;  %v931_v49 = vmax.f32 %v647_v18, 0.0 }
 0x184   :  { %3918 = vmatpush1.bf16.msra.mxu0 %v5113_v0  ;;  %4174 = vmatpush1.bf16.msra.mxu1 %v5116_v10  ;;  %v5137_v0 = vld [vmem:[#allocation2 + $0x700] ss:$16 sps:$4 sm:$0xff]   ;;  %v5140_v10 = vld [vmem:[#allocation2 + $0x708] ss:$16 sps:$4 sm:$0xff]  }
 0x185   :  { %2156 = vmatprep.mubr.f32.mxu0 %v867_v29  ;;  %2800 = vmatprep.mubr.f32.mxu1 %v867_v29  ;;  %v5141_v29 = vld [vmem:[#allocation2 + $0x724] ss:$16 sps:$4 sm:$0xff]  }
 0x186   :  { %3920 = vmatprep.subr.bf16.mxu0 %v5117_v45  ;;  %4176 = vmatprep.subr.bf16.mxu1 %v5120_v7  ;;  %v5143_v45 = vld [vmem:[#allocation2 + $0x720] ss:$16 sps:$4 sm:$0xff]   ;;  %v5146_v7 = vld [vmem:[#allocation2 + $0x728] ss:$16 sps:$4 sm:$0xff]  }
 0x187   :  { %2157 = vmatmul.mubr.f32.gmra.mrb[74].mxu0 %v866_v2  ;;  %2801 = vmatmul.mubr.f32.gmra.mrb[74].mxu1 %v866_v2  ;;  %v5147_v2 = vld [vmem:[#allocation2 + $0x744] ss:$16 sps:$4 sm:$0xff]  }
 0x188   :  { %3922 = vmatpush1.bf16.msra.mxu0 %v5119_v51  ;;  %4178 = vmatpush1.bf16.msra.mxu1 %v5122_v30  ;;  %v898_v51 = vmax.f32 %v621_v16, 0.0  ;;  %v907_v30 = vmax.f32 %v629_v38, 0.0  ;;  %v939_v16 = vmax.f32 %v653_v39, 0.0  ;;  %v5171_v38 = vld [vmem:[#allocation2 + $0x7c4] ss:$16 sps:$4 sm:$0xff]  }
 0x189   :  { %2162 = vmatprep.mubr.f32.mxu0 %v875_v12  ;;  %2806 = vmatprep.mubr.f32.mxu1 %v875_v12  ;;  %v5149_v12 = vld [vmem:[#allocation2 + $0x740] ss:$16 sps:$4 sm:$0xff]  }
 0x18a   :  { %3924 = vmatprep.subr.bf16.mxu0 %v5123_v55  ;;  %4180 = vmatprep.subr.bf16.mxu1 %v5126_v57  ;;  %v906_v55 = vmax.f32 %v627_v8, 0.0  ;;  %v915_v57 = vmax.f32 %v635_v53, 0.0  ;;  %v5177_v8 = vld [vmem:[#allocation2 + $0x7e4] ss:$16 sps:$4 sm:$0xff]  }
 0x18b   :  { %2163 = vmatmul.mubr.f32.gmra.mrb[76].mxu0 %v874_v37  ;;  %2807 = vmatmul.mubr.f32.gmra.mrb[76].mxu1 %v874_v37  ;;  %v5155_v37 = vld [vmem:[#allocation2 + $0x760] ss:$16 sps:$4 sm:$0xff]  }
 0x18c   :  { %3926 = vmatpush1.bf16.msra.mxu0 %v5125_v58  ;;  %4182 = vmatpush1.bf16.msra.mxu1 %v5128_v36  ;;  %v5153_v58 = vld [vmem:[#allocation2 + $0x764] ss:$16 sps:$4 sm:$0xff]   ;;  %v5156_v36 = vld [vmem:[#allocation2 + $0x76c] ss:$16 sps:$4 sm:$0xff]  }
 0x18d   :  { %2168 = vmatprep.mubr.f32.mxu0 %v883_v24  ;;  %2812 = vmatprep.mubr.f32.mxu1 %v883_v24  ;;  %v914_v24 = vmax.f32 %v633_v20, 0.0  ;;  %v3108_v53 = vld [vmem:[%s6367_s5 + $0x80] sm:$0xff] }
 0x18e   :  { %3928 = vmatprep.subr.bf16.mxu0 %v5129_v60  ;;  %4184 = vmatprep.subr.bf16.mxu1 %v5132_v33  ;;  %v5159_v60 = vld [vmem:[#allocation2 + $0x784] ss:$16 sps:$4 sm:$0xff]   ;;  %v5162_v33 = vld [vmem:[#allocation2 + $0x78c] ss:$16 sps:$4 sm:$0xff]  }
 0x18f   :  { %2169 = vmatmul.mubr.f32.gmra.mrb[78].mxu0 %v882_v43  ;;  %2813 = vmatmul.mubr.f32.gmra.mrb[78].mxu1 %v882_v43  ;;  %v922_v43 = vmax.f32 %v639_v25, 0.0  ;;  %v3112_v39 = vld [vmem:[%s6367_s5 + $0xa0] sm:$0xff] }
 0x190   :  { %3930 = vmatpush1.bf16.msra.mxu0 %v5131_v11  ;;  %4186 = vmatpush1.bf16.msra.mxu1 %v5134_v19  ;;  %v5161_v11 = vld [vmem:[#allocation2 + $0x780] ss:$16 sps:$4 sm:$0xff]   ;;  %v5164_v19 = vld [vmem:[#allocation2 + $0x788] ss:$16 sps:$4 sm:$0xff]  }
 0x191   :  { %2174 = vmatprep.mubr.f32.mxu0 %v891_v9  ;;  %2818 = vmatprep.mubr.f32.mxu1 %v891_v9  ;;  %v94_v9 = vsub.s32 7, %v5550_v32 }
 0x192   :  { %3932 = vmatprep.subr.bf16.mxu0 %v5135_v56  ;;  %4188 = vmatprep.subr.bf16.mxu1 %v5138_v3  ;;  %v5168_v56 = vld [vmem:[#allocation2 + $0x7ac] ss:$16 sps:$4 sm:$0xff]   ;;  %v90_v3 = vsub.s32 6, %v5550_v32 }
 0x193   :  { %2175 = vmatmul.mubr.f32.gmra.mrb[80].mxu0 %v890_v17  ;;  %2819 = vmatmul.mubr.f32.gmra.mrb[80].mxu1 %v890_v17  ;;  %v651_v17 = vadd.f32 %v5857_v46, %v5870_v14  ;;  %v3140_v14 = vld [vmem:[%s6367_s5 + $0x180] sm:$0xff] }
 0x194   :  { %3934 = vmatpush1.bf16.msra.mxu0 %v5137_v0  ;;  %4190 = vmatpush1.bf16.msra.mxu1 %v5140_v10  ;;  %v5167_v0 = vld [vmem:[#allocation2 + $0x7a0] ss:$16 sps:$4 sm:$0xff]   ;;  %v930_v10 = vmax.f32 %v645_v44, 0.0  ;;  %v5950_v46 = vrot.slane %v5852_v26, %v90_v3  ;;  %v3095_v44 = vld [vmem:[%s6367_s5 + $0x18] sm:$0xff] }
 0x195   :  { %2180 = vmatprep.mubr.f32.mxu0 %v899_v47  ;;  %2824 = vmatprep.mubr.f32.mxu1 %v899_v47  ;;  %v5947_v47 = vrot.slane %v5852_v26, %v94_v9  ;;  %v3109_v26 = vld [vmem:[%s6367_s5 + $0x88] sm:$0xff] }
 0x196   :  { %3936 = vmatprep.subr.bf16.mxu0 %v5141_v29  ;;  %4192 = vmatprep.subr.bf16.mxu1 %v5144_v50  ;;  %v5174_v29 = vld [vmem:[#allocation2 + $0x7cc] ss:$16 sps:$4 sm:$0xff]   ;;  %v5173_v50 = vld [vmem:[#allocation2 + $0x7c0] ss:$16 sps:$4 sm:$0xff]   ;;  %v4219_v20 = vpack.c.bf16 %v3109_v26, %v3108_v53 }
 0x197   :  { %2181 = vmatmul.mubr.f32.gmra.mrb[82].mxu0 %v898_v51  ;;  %2825 = vmatmul.mubr.f32.gmra.mrb[82].mxu1 %v898_v51  ;;  %v730_v51 = vadd.f32 %v5689_v15, %v5947_v47  ;;  %v3141_v15 = vld [vmem:[%s6367_s5 + $0x188] sm:$0xff]  ;;  %v754_v26 = vadd.f32 %v5737_v35, %v5947_v47  ;;  %v3131_v35 = vld [vmem:[%s6367_s5 + $0x138] sm:$0xff] }
 0x198   :  { %3938 = vmatpush1.bf16.msra.mxu0 %v5143_v45  ;;  %4194 = vmatpush1.bf16.msra.mxu1 %v5146_v7  ;;  %v5176_v45 = vld [vmem:[#allocation2 + $0x7c8] ss:$16 sps:$4 sm:$0xff]   ;;  %v938_v7 = vmax.f32 %v651_v17, 0.0  ;;  %v748_v17 = vadd.f32 %v5725_v41, %v5947_v47 }
 0x199   :  { %2186 = vmatprep.mubr.f32.mxu0 %v907_v30  ;;  %2830 = vmatprep.mubr.f32.mxu1 %v907_v30  ;;  %v5180_v30 = vld [vmem:[#allocation2 + $0x7ec] ss:$16 sps:$4 sm:$0xff]  }
 0x19a   :  { %3940 = vmatprep.subr.bf16.mxu0 %v5147_v2  ;;  %4196 = vmatprep.subr.bf16.mxu1 %v5150_v13  ;;  %v728_v2 = vadd.f32 %v5681_v6, %v5950_v46  ;;  %v946_v13 = vmax.f32 %v657_v21, 0.0  ;;  %v4251_v6 = vpack.c.bf16 %v3141_v15, %v3140_v14  ;;  %v3113_v9 = vld [vmem:[%s6367_s5 + $0xa8] sm:$0xff]  ;;  %v3146_v21 = vld [vmem:[%s6367_s5 + $0x1b0] sm:$0xff]  ;;  %v853_v53 = vmax.f32 %v748_v17, 0.0  ;;  %v3135_v17 = vld [vmem:[%s6367_s5 + $0x158] sm:$0xff] }
 0x19b   :  { %2187 = vmatmul.mubr.f32.gmra.mrb[84].mxu0 %v906_v55  ;;  %2831 = vmatmul.mubr.f32.gmra.mrb[84].mxu1 %v906_v55  ;;  %v736_v55 = vadd.f32 %v5701_v48, %v5947_v47  ;;  %v3125_v48 = vld [vmem:[%s6367_s5 + $0x108] sm:$0xff]  ;;  %v4227_v63 = vpack.c.bf16 %v3113_v9, %v3112_v39  ;;  %v6395_v39 = vld [vmem:[#allocation8_spill] sm:$0xff] }
 0x19c   :  { %3942 = vmatpush1.bf16.msra.mxu0 %v5149_v12  ;;  %4198 = vmatpush1.bf16.msra.mxu1 %v5152_v59  ;;  %v5182_v12 = vld [vmem:[#allocation2 + $0x7e8] ss:$16 sps:$4 sm:$0xff]   ;;  %v829_v59 = vmax.f32 %v730_v51, 0.0  ;;  %v828_v25 = vmax.f32 %v728_v2, 0.0  ;;  %v766_v9 = vadd.f32 %v6395_v39, %v5947_v47 }
 0x19d   :  { %2192 = vmatprep.mubr.f32.mxu0 %v915_v57  ;;  %2836 = vmatprep.mubr.f32.mxu1 %v915_v57  ;;  %v3092_v57 = vld [vmem:[%s6367_s5] sm:$0xff]  ;;  %v3129_v41 = vld [vmem:[%s6367_s5 + $0x128] sm:$0xff]  ;;  %v3099_v2 = vld [vmem:[%s6367_s5 + $0x38] sm:$0xff] }
 0x19e   :  { %3944 = vmatprep.subr.bf16.mxu0 %v5153_v58  ;;  %4200 = vmatprep.subr.bf16.mxu1 %v5156_v36  ;;  %v3124_v58 = vld [vmem:[%s6367_s5 + $0x100] sm:$0xff]  ;;  %v3110_v36 = vld [vmem:[%s6367_s5 + $0x90] sm:$0xff]  ;;  %v4221_v18 = vpack.c.bf16 %v3093_v4, %v3092_v57  ;;  %v752_v4 = vadd.f32 %v5729_v28, %v5950_v46 }
 0x19f   :  { %2193 = vmatmul.mubr.f32.gmra.mrb[86].mxu0 %v914_v24  ;;  %2837 = vmatmul.mubr.f32.gmra.mrb[86].mxu1 %v914_v24  ;;  %v3143_v24 = vld [vmem:[%s6367_s5 + $0x198] sm:$0xff]  ;;  %v3132_v28 = vld [vmem:[%s6367_s5 + $0x140] sm:$0xff] }
 0x1a0   :  { %3946 = vmatpush1.bf16.msra.mxu0 %v5155_v37  ;;  %4202 = vmatpush1.bf16.msra.mxu1 %v5158_v5  ;;  %v3111_v37 = vld [vmem:[%s6367_s5 + $0x98] sm:$0xff]  ;;  %v3142_v5 = vld [vmem:[%s6367_s5 + $0x190] sm:$0xff] }
 0x1a1   :  { %2198 = vmatprep.mubr.f32.mxu0 %v923_v1  ;;  %2842 = vmatprep.mubr.f32.mxu1 %v923_v1  ;;  %v734_v1 = vadd.f32 %v5693_v31, %v5950_v46  ;;  %v3126_v31 = vld [vmem:[%s6367_s5 + $0x110] sm:$0xff] }
 0x1a2   :  { %3948 = vmatprep.subr.bf16.mxu0 %v5159_v60  ;;  %4204 = vmatprep.subr.bf16.mxu1 %v5162_v33  ;;  %v837_v60 = vmax.f32 %v736_v55, 0.0  ;;  %v742_v33 = vadd.f32 %v5713_v40, %v5947_v47  ;;  %v3127_v40 = vld [vmem:[%s6367_s5 + $0x118] sm:$0xff]  ;;  %v3148_v55 = vld [vmem:[%s6367_s5 + $0x1c0] sm:$0xff] }
 0x1a3   :  { %2199 = vmatmul.mubr.f32.gmra.mrb[88].mxu0 %v922_v43  ;;  %2843 = vmatmul.mubr.f32.gmra.mrb[88].mxu1 %v922_v43  ;;  %v3094_v43 = vld [vmem:[%s6367_s5 + $0x10] sm:$0xff]  ;;  %v836_v3 = vmax.f32 %v734_v1, 0.0 }
 0x1a4   :  { %3950 = vmatpush1.bf16.msra.mxu0 %v5161_v11  ;;  %4206 = vmatpush1.bf16.msra.mxu1 %v5164_v19  ;;  %v4253_v11 = vpack.c.bf16 %v3125_v48, %v3124_v58  ;;  %v4223_v19 = vpack.c.bf16 %v3111_v37, %v3110_v36  ;;  %v861_v58 = vmax.f32 %v754_v26, 0.0  ;;  %v6393_v48 = vld [vmem:[#allocation6_spill] sm:$0xff]  ;;  %v3136_v26 = vld [vmem:[%s6367_s5 + $0x160] sm:$0xff] }
 0x1a5   :  { %2204 = vmatprep.mubr.f32.mxu0 %v931_v49  ;;  %2848 = vmatprep.mubr.f32.mxu1 %v931_v49  ;;  %v4255_v49 = vpack.c.bf16 %v3143_v24, %v3142_v5  ;;  %v760_v36 = vadd.f32 %v6393_v48, %v5947_v47  ;;  %v3100_v24 = vld [vmem:[%s6367_s5 + $0x40] sm:$0xff] }
 0x1a6   :  { %3952 = vmatprep.subr.bf16.mxu0 %v5165_v52  ;;  %4208 = vmatprep.subr.bf16.mxu1 %v5168_v56  ;;  %v3144_v52 = vld [vmem:[%s6367_s5 + $0x1a0] sm:$0xff]  ;;  %v3145_v56 = vld [vmem:[%s6367_s5 + $0x1a8] sm:$0xff] }
 0x1a7   :  { %2205 = vmatmul.mubr.f32.gmra.mrb[90].mxu0 %v930_v10  ;;  %2849 = vmatmul.mubr.f32.gmra.mrb[90].mxu1 %v930_v10  ;;  %v845_v10 = vmax.f32 %v742_v33, 0.0  ;;  %v3119_v33 = vld [vmem:[%s6367_s5 + $0xd8] sm:$0xff] }
 0x1a8   :  { %3954 = vmatpush1.bf16.msra.mxu0 %v5167_v0  ;;  %4210 = vmatpush1.bf16.msra.mxu1 %v5170_v62  ;;  %v740_v0 = vadd.f32 %v5705_v61, %v5950_v46  ;;  %v4225_v62 = vpack.c.bf16 %v3095_v44, %v3094_v43  ;;  %v3128_v61 = vld [vmem:[%s6367_s5 + $0x120] sm:$0xff]  ;;  %v860_v43 = vmax.f32 %v752_v4, 0.0 }
 0x1a9   :  { %2210 = vmatprep.mubr.f32.mxu0 %v939_v16  ;;  %2854 = vmatprep.mubr.f32.mxu1 %v939_v16  ;;  %v4257_v16 = vpack.c.bf16 %v3127_v40, %v3126_v31  ;;  %v4261_v14 = vpack.c.bf16 %v3129_v41, %v3128_v61  ;;  %v6394_v44 = vld [vmem:[#allocation5_spill] sm:$0xff]  ;;  %v869_v40 = vmax.f32 %v760_v36, 0.0  ;;  %v6400_v36 = vld [vmem:[#allocation11_spill] sm:$0xff] }
 0x1aa   :  { %3956 = vmatprep.subr.bf16.mxu0 %v5171_v38  ;;  %4212 = vmatprep.subr.bf16.mxu1 %v5174_v29  ;;  %v3096_v38 = vld [vmem:[%s6367_s5 + $0x20] sm:$0xff]  ;;  %v3097_v29 = vld [vmem:[%s6367_s5 + $0x28] sm:$0xff]  ;;  %v844_v51 = vmax.f32 %v740_v0, 0.0  ;;  %v758_v31 = vadd.f32 %v6394_v44, %v5950_v46  ;;  %v3103_v0 = vld [vmem:[%s6367_s5 + $0x58] sm:$0xff] }
 0x1ab   :  { %2211 = vmatmul.mubr.f32.gmra.mrb[92].mxu0 %v938_v7  ;;  %2855 = vmatmul.mubr.f32.gmra.mrb[92].mxu1 %v938_v7  ;;  %v3115_v7 = vld [vmem:[%s6367_s5 + $0xb8] sm:$0xff]  ;;  %v6404_v44 = vld [vmem:[#allocation15_spill] sm:$0xff] }
 0x1ac   :  { %3958 = vmatpush1.bf16.msra.mxu0 %v5173_v50  ;;  %4214 = vmatpush1.bf16.msra.mxu1 %v5176_v45  ;;  %v4259_v50 = vpack.c.bf16 %v3145_v56, %v3144_v52  ;;  %v3114_v45 = vld [vmem:[%s6367_s5 + $0xb0] sm:$0xff]  ;;  %v868_v61 = vmax.f32 %v758_v31, 0.0  ;;  %v788_v31 = vadd.f32 %v6404_v44, %v5950_v46 }
 0x1ad   :  { %2216 = vmatprep.mubr.f32.mxu0 %v947_v42  ;;  %2860 = vmatprep.mubr.f32.mxu1 %v947_v42  ;;  %v3147_v42 = vld [vmem:[%s6367_s5 + $0x1b8] sm:$0xff]  ;;  %v4231_v15 = vpack.c.bf16 %v3115_v7, %v3114_v45  ;;  %v877_v7 = vmax.f32 %v766_v9, 0.0 }
 0x1ae   :  { %3960 = vmatprep.subr.bf16.mxu0 %v5177_v8  ;;  %4216 = vmatprep.subr.bf16.mxu1 %v5180_v30  ;;  %v746_v8 = vadd.f32 %v5717_v22, %v5950_v46  ;;  %v4229_v30 = vpack.c.bf16 %v3097_v29, %v3096_v38  ;;  %v3130_v22 = vld [vmem:[%s6367_s5 + $0x130] sm:$0xff]  ;;  %v3152_v38 = vld [vmem:[%s6367_s5 + $0x1e0] sm:$0xff]  ;;  %v3153_v29 = vld [vmem:[%s6367_s5 + $0x1e8] sm:$0xff]  ;;  %v908_v9 = vmax.f32 %v788_v31, 0.0 }
 0x1af   :  { %2217 = vmatmul.mubr.f32.gmra.mrb[94].mxu0 %v946_v13  ;;  %2861 = vmatmul.mubr.f32.gmra.mrb[94].mxu1 %v946_v13  ;;  %v4263_v13 = vpack.c.bf16 %v3147_v42, %v3146_v21  ;;  %v4265_v37 = vpack.c.bf16 %v3131_v35, %v3130_v22  ;;  %v6397_v21 = vld [vmem:[#allocation10_spill] sm:$0xff] }
 0x1b0   :  { %3962 = vmatpush1.bf16.msra.mxu0 %v5179_v34  ;;  %2287 = vmatprep.mubr.f32.mxu0 %v829_v59  ;;  %v3098_v34 = vld [vmem:[%s6367_s5 + $0x30] sm:$0xff]  ;;  %v852_v57 = vmax.f32 %v746_v8, 0.0  ;;  %v772_v42 = vadd.f32 %v6397_v21, %v5947_v47 }
 0x1b1   :  { %4218 = vmatpush1.bf16.msra.mxu1 %v5182_v12  ;;  %2931 = vmatprep.mubr.f32.mxu1 %v829_v59  ;;  %v3116_v12 = vld [vmem:[%s6367_s5 + $0xc0] sm:$0xff]  ;;  %v3117_v59 = vld [vmem:[%s6367_s5 + $0xc8] sm:$0xff] }
 0x1b2   :  { %4220 = vmatprep.subr.bf16.mxu0 %v4219_v20  ;;  %4252 = vmatprep.subr.bf16.mxu1 %v4251_v6  ;;  %v3149_v20 = vld [vmem:[%s6367_s5 + $0x1c8] sm:$0xff]  ;;  %v4233_v6 = vpack.c.bf16 %v3099_v2, %v3098_v34  ;;  %v4235_v5 = vpack.c.bf16 %v3117_v59, %v3116_v12  ;;  %v3122_v34 = vld [vmem:[%s6367_s5 + $0xf0] sm:$0xff]  ;;  %v3123_v2 = vld [vmem:[%s6367_s5 + $0xf8] sm:$0xff]  ;;  %v885_v59 = vmax.f32 %v772_v42, 0.0 }
 0x1b3   :  { %2288 = vmatmul.mubr.f32.vlgmr.msra.gmra.mrb[64].mxu0 %v828_v25  ;;  %v4267_v1 = vpack.c.bf16 %v3149_v20, %v3148_v55  ;;  %v6399_v55 = vld [vmem:[#allocation12_spill] sm:$0xff]  ;;  %v4247_v4 = vpack.c.bf16 %v3123_v2, %v3122_v34  ;;  %v6411_v42 = vld [vmem:[#allocation23_spill] sm:$0xff]  ;;  %v1718_v2 = vld [vmem:[%s6366_s4] sm:$0xf] }
 0x1b4   :  { %2932 = vmatmul.mubr.f32.vlgmr.msra.gmra.mrb[64].mxu1 %v828_v25  ;;  %2293 = vmatprep.mubr.f32.mxu0 %v837_v60  ;;  %v3101_v25 = vld [vmem:[%s6367_s5 + $0x48] sm:$0xff]  ;;  %v778_v20 = vadd.f32 %v6399_v55, %v5947_v47 }
 0x1b5   :  { %2937 = vmatprep.mubr.f32.mxu1 %v837_v60  ;;  %4222 = vmatpush3.bf16.msra.mxu0 %v4221_v18  ;;  %v3133_v18 = vld [vmem:[%s6367_s5 + $0x148] sm:$0xff]  ;;  %v3118_v60 = vld [vmem:[%s6367_s5 + $0xd0] sm:$0xff] }
 0x1b6   :  { %4254 = vmatpush3.bf16.msra.mxu1 %v4253_v11  ;;  %4224 = vmatprep.subr.bf16.mxu0 %v4223_v19  ;;  %v3150_v11 = vld [vmem:[%s6367_s5 + $0x1d0] sm:$0xff]  ;;  %v3151_v19 = vld [vmem:[%s6367_s5 + $0x1d8] sm:$0xff]  ;;  %v4269_v52 = vpack.c.bf16 %v3133_v18, %v3132_v28  ;;  %v4239_v56 = vpack.c.bf16 %v3119_v33, %v3118_v60  ;;  %v6402_v18 = vld [vmem:[#allocation13_spill] sm:$0xff] }
 0x1b7   :  { %2294 = vmatmul.mubr.f32.gmra.mrb[66].mxu0 %v836_v3  ;;  %4256 = vmatprep.subr.bf16.mxu1 %v4255_v49  ;;  %v4237_v49 = vpack.c.bf16 %v3101_v25, %v3100_v24  ;;  %v893_v24 = vmax.f32 %v778_v20, 0.0  ;;  %v6401_v25 = vld [vmem:[#allocation14_spill] sm:$0xff]  ;;  %v782_v60 = vadd.f32 %v6402_v18, %v5950_v46  ;;  %v6415_v20 = vsub.s32 3, %v5550_v32 }
 0x1b8   :  { %2938 = vmatmul.mubr.f32.gmra.mrb[66].mxu1 %v836_v3  ;;  %2299 = vmatprep.mubr.f32.mxu0 %v845_v10  ;;  %v3102_v3 = vld [vmem:[%s6367_s5 + $0x50] sm:$0xff]  ;;  %v784_v28 = vadd.f32 %v6401_v25, %v5947_v47 }
 0x1b9   :  { %2943 = vmatprep.mubr.f32.mxu1 %v845_v10  ;;  %4226 = vmatpush3.bf16.msra.mxu0 %v4225_v62  ;;  %v3134_v62 = vld [vmem:[%s6367_s5 + $0x150] sm:$0xff]  ;;  %v4271_v10 = vpack.c.bf16 %v3151_v19, %v3150_v11  ;;  %v4241_v45 = vpack.c.bf16 %v3103_v0, %v3102_v3  ;;  %v6403_v11 = vld [vmem:[#allocation16_spill] sm:$0xff] }
 0x1ba   :  { %4258 = vmatpush3.bf16.msra.mxu1 %v4257_v16  ;;  %4228 = vmatprep.subr.bf16.mxu0 %v4227_v63  ;;  %v3120_v16 = vld [vmem:[%s6367_s5 + $0xe0] sm:$0xff]  ;;  %v3121_v63 = vld [vmem:[%s6367_s5 + $0xe8] sm:$0xff]  ;;  %v901_v33 = vmax.f32 %v784_v28, 0.0  ;;  %v790_v19 = vadd.f32 %v6403_v11, %v5947_v47  ;;  %v6407_v0 = vld [vmem:[#allocation20_spill] sm:$0xff] }
 0x1bb   :  { %2300 = vmatmul.mubr.f32.gmra.mrb[68].mxu0 %v844_v51  ;;  %4260 = vmatprep.subr.bf16.mxu1 %v4259_v50  ;;  %v6396_v50 = vld [vmem:[#allocation7_spill] sm:$0xff]  ;;  %v4243_v8 = vpack.c.bf16 %v3121_v63, %v3120_v16 }
 0x1bc   :  { %2944 = vmatmul.mubr.f32.gmra.mrb[68].mxu1 %v844_v51  ;;  %2305 = vmatprep.mubr.f32.mxu0 %v853_v53  ;;  %v764_v41 = vadd.f32 %v6396_v50, %v5950_v46  ;;  %v4273_v51 = vpack.c.bf16 %v3135_v17, %v3134_v62  ;;  %v802_v62 = vadd.f32 %v6407_v0, %v5947_v47  ;;  %v6408_v17 = vld [vmem:[#allocation19_spill] sm:$0xff]  ;;  %v6410_v50 = vld [vmem:[#allocation21_spill] sm:$0xff] }
 0x1bd   :  { %2949 = vmatprep.mubr.f32.mxu1 %v853_v53  ;;  %4230 = vmatpush3.bf16.msra.mxu0 %v4229_v30  ;;  %v3104_v30 = vld [vmem:[%s6367_s5 + $0x60] sm:$0xff]  ;;  %v3105_v53 = vld [vmem:[%s6367_s5 + $0x68] sm:$0xff]  ;;  %v800_v16 = vadd.f32 %v6408_v17, %v5950_v46 }
 0x1be   :  { %4262 = vmatpush3.bf16.msra.mxu1 %v4261_v14  ;;  %4232 = vmatprep.subr.bf16.mxu0 %v4231_v15  ;;  %v4275_v14 = vpack.c.bf16 %v3153_v29, %v3152_v38  ;;  %v3137_v15 = vld [vmem:[%s6367_s5 + $0x168] sm:$0xff]  ;;  %v876_v22 = vmax.f32 %v764_v41, 0.0  ;;  %v4245_v12 = vpack.c.bf16 %v3105_v53, %v3104_v30  ;;  %v925_v63 = vmax.f32 %v802_v62, 0.0 }
 0x1bf   :  { %2306 = vmatmul.mubr.f32.gmra.mrb[70].mxu0 %v852_v57  ;;  %4264 = vmatprep.subr.bf16.mxu1 %v4263_v13  ;;  %v6398_v13 = vld [vmem:[#allocation9_spill] sm:$0xff]  ;;  %v6409_v38 = vld [vmem:[#allocation22_spill] sm:$0xff]  ;;  %v806_v41 = vadd.f32 %v6410_v50, %v5950_v46  ;;  %v820_v30 = vadd.f32 %v5882_v54, %v5947_v47  ;;  %v3154_v54 = vld [vmem:[%s6367_s5 + $0x1f0] sm:$0xff] }
 0x1c0   :  { %2950 = vmatmul.mubr.f32.gmra.mrb[70].mxu1 %v852_v57  ;;  %2311 = vmatprep.mubr.f32.mxu0 %v861_v58  ;;  %v770_v35 = vadd.f32 %v6398_v13, %v5950_v46  ;;  %v4277_v57 = vpack.c.bf16 %v3137_v15, %v3136_v26  ;;  %v808_v29 = vadd.f32 %v6409_v38, %v5947_v47 }
 0x1c1   :  { %2955 = vmatprep.mubr.f32.mxu1 %v861_v58  ;;  %4234 = vmatpush3.bf16.msra.mxu0 %v4233_v6  ;;  %v3106_v6 = vld [vmem:[%s6367_s5 + $0x70] sm:$0xff]  ;;  %v3107_v58 = vld [vmem:[%s6367_s5 + $0x78] sm:$0xff]  ;;  %v932_v21 = vmax.f32 %v806_v41, 0.0  ;;  %v818_v26 = vadd.f32 %v5874_v23, %v5950_v46 }
 0x1c2   :  { %4266 = vmatpush3.bf16.msra.mxu1 %v4265_v37  ;;  %4236 = vmatprep.subr.bf16.mxu0 %v4235_v5  ;;  %v884_v48 = vmax.f32 %v770_v35, 0.0  ;;  %v776_v37 = vadd.f32 %v6400_v36, %v5950_v46  ;;  %v4249_v5 = vpack.c.bf16 %v3107_v58, %v3106_v6  ;;  %v3138_v23 = vld [vmem:[%s6367_s5 + $0x170] sm:$0xff]  ;;  %v6413_v35 = vsub.s32 2, %v5550_v32 }
 0x1c3   :  { %2312 = vmatmul.mubr.f32.gmra.mrb[72].mxu0 %v860_v43  ;;  %4268 = vmatprep.subr.bf16.mxu1 %v4267_v1 }
 0x1c4   :  { %2956 = vmatmul.mubr.f32.gmra.mrb[72].mxu1 %v860_v43  ;;  %2317 = vmatprep.mubr.f32.mxu0 %v869_v40  ;;  %v892_v1 = vmax.f32 %v776_v37, 0.0  ;;  %v900_v43 = vmax.f32 %v782_v60, 0.0 }
 0x1c5   :  { %2961 = vmatprep.mubr.f32.mxu1 %v869_v40  ;;  %4238 = vmatpush3.bf16.msra.mxu0 %v4237_v49  ;;  %v909_v49 = vmax.f32 %v790_v19, 0.0  ;;  %v6405_v40 = vld [vmem:[#allocation18_spill] sm:$0xff] }
 0x1c6   :  { %4270 = vmatpush3.bf16.msra.mxu1 %v4269_v52  ;;  %4240 = vmatprep.subr.bf16.mxu0 %v4239_v56  ;;  %v796_v39 = vadd.f32 %v6405_v40, %v5947_v47  ;;  %v6406_v52 = vld [vmem:[#allocation17_spill] sm:$0xff] }
 0x1c7   :  { %2318 = vmatmul.mubr.f32.gmra.mrb[74].mxu0 %v868_v61  ;;  %4272 = vmatprep.subr.bf16.mxu1 %v4271_v10  ;;  %v794_v56 = vadd.f32 %v6406_v52, %v5950_v46 }
 0x1c8   :  { %2962 = vmatmul.mubr.f32.gmra.mrb[74].mxu1 %v868_v61  ;;  %2323 = vmatprep.mubr.f32.mxu0 %v877_v7  ;;  %v917_v3 = vmax.f32 %v796_v39, 0.0  ;;  %v924_v61 = vmax.f32 %v800_v16, 0.0 }
 0x1c9   :  { %2967 = vmatprep.mubr.f32.mxu1 %v877_v7  ;;  %4242 = vmatpush3.bf16.msra.mxu0 %v4241_v45  ;;  %v916_v10 = vmax.f32 %v794_v56, 0.0  ;;  %v933_v45 = vmax.f32 %v808_v29, 0.0  ;;  %v814_v7 = vadd.f32 %v5867_v27, %v5947_v47  ;;  %v949_v27 = vmax.f32 %v820_v30, 0.0  ;;  %v3155_v47 = vld [vmem:[%s6367_s5 + $0x1f8] sm:$0xff] }
 0x1ca   :  { %4274 = vmatpush3.bf16.msra.mxu1 %v4273_v51  ;;  %4244 = vmatprep.subr.bf16.mxu0 %v4243_v8  ;;  %v812_v51 = vadd.f32 %v6411_v42, %v5950_v46  ;;  %v4279_v15 = vpack.c.bf16 %v3155_v47, %v3154_v54  ;;  %v3139_v46 = vld [vmem:[%s6367_s5 + $0x178] sm:$0xff] }
 0x1cb   :  { %2324 = vmatmul.mubr.f32.gmra.mrb[76].mxu0 %v876_v22  ;;  %4276 = vmatprep.subr.bf16.mxu1 %v4275_v14  ;;  %v941_v8 = vmax.f32 %v814_v7, 0.0  ;;  %v948_v14 = vmax.f32 %v818_v26, 0.0  ;;  %v4281_v34 = vpack.c.bf16 %v3139_v46, %v3138_v23 }
 0x1cc   :  { %2968 = vmatmul.mubr.f32.gmra.mrb[76].mxu1 %v876_v22  ;;  %2329 = vmatprep.mubr.f32.mxu0 %v885_v59  ;;  %v940_v53 = vmax.f32 %v812_v51, 0.0  ;;  %v6412_v22 = vsub.s32 0, %v5550_v32 }
 0x1cd   :  { %2973 = vmatprep.mubr.f32.mxu1 %v885_v59  ;;  %4246 = vmatpush3.bf16.msra.mxu0 %v4245_v12  ;;  %v6219_v12 = vrot.slane %v1718_v2, %v6413_v35  ;;  %v6414_v59 = vsub.s32 1, %v5550_v32 }
 0x1ce   :  { %4278 = vmatpush3.bf16.msra.mxu1 %v4277_v57  ;;  %4248 = vmatprep.subr.bf16.mxu0 %v4247_v4  ;;  %v6215_v13 = vrot.slane %v1718_v2, %v6412_v22  ;;  %v6227_v57 = vrot.slane %v1718_v2, %v6415_v20 }
 0x1cf   :  { %2330 = vmatmul.mubr.f32.gmra.mrb[78].mxu0 %v884_v48  ;;  %4280 = vmatprep.subr.bf16.mxu1 %v4279_v15  ;;  %v6223_v55 = vrot.slane %v1718_v2, %v6414_v59 }
 0x1d0   :  { %2974 = vmatmul.mubr.f32.gmra.mrb[78].mxu1 %v884_v48  ;;  %2335 = vmatprep.mubr.f32.mxu0 %v893_v24 }
 0x1d1   :  { %2979 = vmatprep.mubr.f32.mxu1 %v893_v24  ;;  %4250 = vmatpush3.bf16.msra.mxu0 %v4249_v5 }
 0x1d2   :  { %4282 = vmatpush3.bf16.msra.mxu1 %v4281_v34 }
 0x1d3   :  { %2336 = vmatmul.mubr.f32.gmra.mrb[80].mxu0 %v892_v1 }
 0x1d4   :  { %2980 = vmatmul.mubr.f32.gmra.mrb[80].mxu1 %v892_v1  ;;  %2341 = vmatprep.mubr.f32.mxu0 %v901_v33 }
 0x1d5   :  { %2985 = vmatprep.mubr.f32.mxu1 %v901_v33 }
 0x1d7   :  { %2342 = vmatmul.mubr.f32.gmra.mrb[82].mxu0 %v900_v43 }
 0x1d8   :  { %2986 = vmatmul.mubr.f32.gmra.mrb[82].mxu1 %v900_v43  ;;  %2347 = vmatprep.mubr.f32.mxu0 %v909_v49 }
 0x1d9   :  { %2991 = vmatprep.mubr.f32.mxu1 %v909_v49 }
 0x1db   :  { %2348 = vmatmul.mubr.f32.gmra.mrb[84].mxu0 %v908_v9 }
 0x1dc   :  { %2992 = vmatmul.mubr.f32.gmra.mrb[84].mxu1 %v908_v9  ;;  %2353 = vmatprep.mubr.f32.mxu0 %v917_v3 }
 0x1dd   :  { %2997 = vmatprep.mubr.f32.mxu1 %v917_v3 }
 0x1df   :  { %2354 = vmatmul.mubr.f32.gmra.mrb[86].mxu0 %v916_v10 }
 0x1e0   :  { %2998 = vmatmul.mubr.f32.gmra.mrb[86].mxu1 %v916_v10  ;;  %2359 = vmatprep.mubr.f32.mxu0 %v925_v63 }
 0x1e1   :  { %3003 = vmatprep.mubr.f32.mxu1 %v925_v63 }
 0x1e3   :  { %2360 = vmatmul.mubr.f32.gmra.mrb[88].mxu0 %v924_v61 }
 0x1e4   :  { %3004 = vmatmul.mubr.f32.gmra.mrb[88].mxu1 %v924_v61  ;;  %2365 = vmatprep.mubr.f32.mxu0 %v933_v45 }
 0x1e5   :  { %3009 = vmatprep.mubr.f32.mxu1 %v933_v45 }
 0x1e7   :  { %2366 = vmatmul.mubr.f32.gmra.mrb[90].mxu0 %v932_v21 }
 0x1e8   :  { %3010 = vmatmul.mubr.f32.gmra.mrb[90].mxu1 %v932_v21  ;;  %2371 = vmatprep.mubr.f32.mxu0 %v941_v8 }
 0x1e9   :  { %3015 = vmatprep.mubr.f32.mxu1 %v941_v8 }
 0x1eb   :  { %2372 = vmatmul.mubr.f32.gmra.mrb[92].mxu0 %v940_v53 }
 0x1ec   :  { %3016 = vmatmul.mubr.f32.gmra.mrb[92].mxu1 %v940_v53  ;;  %2377 = vmatprep.mubr.f32.mxu0 %v949_v27 }
 0x1ed   :  { %3021 = vmatprep.mubr.f32.mxu1 %v949_v27 }
 0x1ef   :  { %2378 = vmatmul.mubr.f32.gmra.mrb[94].mxu0 %v948_v14 }
 0x1f0   :  { %3022 = vmatmul.mubr.f32.gmra.mrb[94].mxu1 %v948_v14 }
 0x286   :  { %v2289_v4 = vpop.f32.mrb[64].mxu0 }
 0x287   :  { %v4283_v6 = vadd.f32 %v2289_v4, %v6215_v13  ;;  %v2933_v58 = vpop.f32.mrb[64].mxu1  ;;  %v2291_v48 = vpop.f32.mrb[65].mxu0 }
 0x288   :  { %v4315_v36 = vadd.f32 %v2933_v58, %v6219_v12  ;;  %v4284_v37 = vadd.f32 %v2291_v48, %v6223_v55  ;;  %v2935_v5 = vpop.f32.mrb[65].mxu1 }
 0x289   :  { %v4316_v24 = vadd.f32 %v2935_v5, %v6227_v57  ;;  %v3028_v1 = vmax.f32 %v4283_v6, 0.0 }
 0x28a   :  { %v3029_v25 = vmax.f32 %v4284_v37, 0.0  ;;  %v2295_v28 = vpop.f32.mrb[66].mxu0  ;;  %v3030_v11 = vmax.f32 %v4315_v36, 0.0 }
 0x28b   :  { %v3031_v18 = vmax.f32 %v4316_v24, 0.0  ;;  %v4285_v32 = vadd.f32 %v2295_v28, %v6215_v13  ;;  %v2939_v60 = vpop.f32.mrb[66].mxu1  ;;  %v2297_v33 = vpop.f32.mrb[67].mxu0 }
 0x28c   :  { %v4317_v19 = vadd.f32 %v2939_v60, %v6219_v12  ;;  %v4286_v43 = vadd.f32 %v2297_v33, %v6223_v55  ;;  %v2941_v44 = vpop.f32.mrb[67].mxu1  ;;  %3227 = vmatprep.mubr.f32.mxu0 %v3029_v25 }
 0x28d   :  { %v4318_v31 = vadd.f32 %v2941_v44, %v6227_v57  ;;  %3372 = vmatprep.mubr.f32.mxu1 %v3031_v18  ;;  %3228 = vmatmul.mubr.f32.vlgmr.msra.gmra.mrb[96].mxu0 %v3028_v1  ;;  %v3032_v39 = vmax.f32 %v4285_v32, 0.0 }
 0x28e   :  { %v3033_v49 = vmax.f32 %v4286_v43, 0.0  ;;  %3373 = vmatmul.mubr.f32.vlgmr.msra.gmra.mrb[96].mxu1 %v3030_v11  ;;  %v2301_v40 = vpop.f32.mrb[68].mxu0  ;;  %v3034_v0 = vmax.f32 %v4317_v19, 0.0 }
 0x28f   :  { %v3035_v9 = vmax.f32 %v4318_v31, 0.0  ;;  %v4287_v52 = vadd.f32 %v2301_v40, %v6215_v13  ;;  %v2945_v56 = vpop.f32.mrb[68].mxu1  ;;  %v2303_v3 = vpop.f32.mrb[69].mxu0 }
 0x290   :  { %v4319_v62 = vadd.f32 %v2945_v56, %v6219_v12  ;;  %v4288_v10 = vadd.f32 %v2303_v3, %v6223_v55  ;;  %v2947_v17 = vpop.f32.mrb[69].mxu1  ;;  %3232 = vmatprep.mubr.f32.mxu0 %v3033_v49 }
 0x291   :  { %v4320_v16 = vadd.f32 %v2947_v17, %v6227_v57  ;;  %3377 = vmatprep.mubr.f32.mxu1 %v3035_v9  ;;  %3233 = vmatmul.mubr.f32.gmra.mrb[98].mxu0 %v3032_v39  ;;  %v3036_v29 = vmax.f32 %v4287_v52, 0.0 }
 0x292   :  { %v3037_v63 = vmax.f32 %v4288_v10, 0.0  ;;  %3378 = vmatmul.mubr.f32.gmra.mrb[98].mxu1 %v3034_v0  ;;  %v2307_v38 = vpop.f32.mrb[70].mxu0  ;;  %v3038_v7 = vmax.f32 %v4319_v62, 0.0 }
 0x293   :  { %v3039_v61 = vmax.f32 %v4320_v16, 0.0  ;;  %v4289_v50 = vadd.f32 %v2307_v38, %v6215_v13  ;;  %v2951_v41 = vpop.f32.mrb[70].mxu1  ;;  %v2309_v45 = vpop.f32.mrb[71].mxu0 }
 0x294   :  { %v4321_v21 = vadd.f32 %v2951_v41, %v6219_v12  ;;  %v4290_v42 = vadd.f32 %v2309_v45, %v6223_v55  ;;  %v2953_v51 = vpop.f32.mrb[71].mxu1  ;;  %3237 = vmatprep.mubr.f32.mxu0 %v3037_v63 }
 0x295   :  { %v4322_v8 = vadd.f32 %v2953_v51, %v6227_v57  ;;  %3382 = vmatprep.mubr.f32.mxu1 %v3039_v61  ;;  %3238 = vmatmul.mubr.f32.gmra.mrb[100].mxu0 %v3036_v29  ;;  %v3040_v26 = vmax.f32 %v4289_v50, 0.0 }
 0x296   :  { %v3041_v30 = vmax.f32 %v4290_v42, 0.0  ;;  %3383 = vmatmul.mubr.f32.gmra.mrb[100].mxu1 %v3038_v7  ;;  %v2313_v53 = vpop.f32.mrb[72].mxu0  ;;  %v3042_v15 = vmax.f32 %v4321_v21, 0.0 }
 0x297   :  { %v3043_v27 = vmax.f32 %v4322_v8, 0.0  ;;  %v4291_v14 = vadd.f32 %v2313_v53, %v6215_v13  ;;  %v2957_v54 = vpop.f32.mrb[72].mxu1  ;;  %v2315_v47 = vpop.f32.mrb[73].mxu0 }
 0x298   :  { %v4323_v23 = vadd.f32 %v2957_v54, %v6219_v12  ;;  %v4292_v46 = vadd.f32 %v2315_v47, %v6223_v55  ;;  %v2959_v34 = vpop.f32.mrb[73].mxu1  ;;  %3242 = vmatprep.mubr.f32.mxu0 %v3041_v30 }
 0x299   :  { %v4324_v2 = vadd.f32 %v2959_v34, %v6227_v57  ;;  %3387 = vmatprep.mubr.f32.mxu1 %v3043_v27  ;;  %3243 = vmatmul.mubr.f32.gmra.mrb[102].mxu0 %v3040_v26  ;;  %v3044_v59 = vmax.f32 %v4291_v14, 0.0 }
 0x29a   :  { %v3045_v22 = vmax.f32 %v4292_v46, 0.0  ;;  %3388 = vmatmul.mubr.f32.gmra.mrb[102].mxu1 %v3042_v15  ;;  %v2319_v35 = vpop.f32.mrb[74].mxu0  ;;  %v3046_v48 = vmax.f32 %v4323_v23, 0.0 }
 0x29b   :  { %v3047_v20 = vmax.f32 %v4324_v2, 0.0  ;;  %v4293_v4 = vadd.f32 %v2319_v35, %v6215_v13  ;;  %v2963_v6 = vpop.f32.mrb[74].mxu1  ;;  %v2321_v58 = vpop.f32.mrb[75].mxu0 }
 0x29c   :  { %v4325_v36 = vadd.f32 %v2963_v6, %v6219_v12  ;;  %v4294_v37 = vadd.f32 %v2321_v58, %v6223_v55  ;;  %v2965_v5 = vpop.f32.mrb[75].mxu1  ;;  %3247 = vmatprep.mubr.f32.mxu0 %v3045_v22 }
 0x29d   :  { %v4326_v24 = vadd.f32 %v2965_v5, %v6227_v57  ;;  %3392 = vmatprep.mubr.f32.mxu1 %v3047_v20  ;;  %3248 = vmatmul.mubr.f32.gmra.mrb[104].mxu0 %v3044_v59  ;;  %v3048_v1 = vmax.f32 %v4293_v4, 0.0 }
 0x29e   :  { %v3049_v25 = vmax.f32 %v4294_v37, 0.0  ;;  %3393 = vmatmul.mubr.f32.gmra.mrb[104].mxu1 %v3046_v48  ;;  %v2325_v28 = vpop.f32.mrb[76].mxu0  ;;  %v3050_v11 = vmax.f32 %v4325_v36, 0.0 }
 0x29f   :  { %v3051_v18 = vmax.f32 %v4326_v24, 0.0  ;;  %v4295_v32 = vadd.f32 %v2325_v28, %v6215_v13  ;;  %v2969_v60 = vpop.f32.mrb[76].mxu1  ;;  %v2327_v33 = vpop.f32.mrb[77].mxu0 }
 0x2a0   :  { %v4327_v19 = vadd.f32 %v2969_v60, %v6219_v12  ;;  %v4296_v43 = vadd.f32 %v2327_v33, %v6223_v55  ;;  %v2971_v44 = vpop.f32.mrb[77].mxu1  ;;  %3252 = vmatprep.mubr.f32.mxu0 %v3049_v25 }
 0x2a1   :  { %v4328_v31 = vadd.f32 %v2971_v44, %v6227_v57  ;;  %3397 = vmatprep.mubr.f32.mxu1 %v3051_v18  ;;  %3253 = vmatmul.mubr.f32.gmra.mrb[106].mxu0 %v3048_v1  ;;  %v3052_v39 = vmax.f32 %v4295_v32, 0.0 }
 0x2a2   :  { %v3053_v49 = vmax.f32 %v4296_v43, 0.0  ;;  %3398 = vmatmul.mubr.f32.gmra.mrb[106].mxu1 %v3050_v11  ;;  %v2331_v40 = vpop.f32.mrb[78].mxu0  ;;  %v3054_v0 = vmax.f32 %v4327_v19, 0.0 }
 0x2a3   :  { %v3055_v9 = vmax.f32 %v4328_v31, 0.0  ;;  %v4297_v52 = vadd.f32 %v2331_v40, %v6215_v13  ;;  %v2975_v56 = vpop.f32.mrb[78].mxu1  ;;  %v2333_v3 = vpop.f32.mrb[79].mxu0 }
 0x2a4   :  { %v4329_v62 = vadd.f32 %v2975_v56, %v6219_v12  ;;  %v4298_v10 = vadd.f32 %v2333_v3, %v6223_v55  ;;  %v2977_v17 = vpop.f32.mrb[79].mxu1  ;;  %3257 = vmatprep.mubr.f32.mxu0 %v3053_v49 }
 0x2a5   :  { %v4330_v16 = vadd.f32 %v2977_v17, %v6227_v57  ;;  %3402 = vmatprep.mubr.f32.mxu1 %v3055_v9  ;;  %3258 = vmatmul.mubr.f32.gmra.mrb[108].mxu0 %v3052_v39  ;;  %v3056_v29 = vmax.f32 %v4297_v52, 0.0 }
 0x2a6   :  { %v3057_v63 = vmax.f32 %v4298_v10, 0.0  ;;  %3403 = vmatmul.mubr.f32.gmra.mrb[108].mxu1 %v3054_v0  ;;  %v2337_v38 = vpop.f32.mrb[80].mxu0  ;;  %v3058_v7 = vmax.f32 %v4329_v62, 0.0 }
 0x2a7   :  { %v3059_v61 = vmax.f32 %v4330_v16, 0.0  ;;  %v4299_v50 = vadd.f32 %v2337_v38, %v6215_v13  ;;  %v2981_v41 = vpop.f32.mrb[80].mxu1  ;;  %v2339_v45 = vpop.f32.mrb[81].mxu0 }
 0x2a8   :  { %v4331_v21 = vadd.f32 %v2981_v41, %v6219_v12  ;;  %v4300_v42 = vadd.f32 %v2339_v45, %v6223_v55  ;;  %v2983_v51 = vpop.f32.mrb[81].mxu1  ;;  %3262 = vmatprep.mubr.f32.mxu0 %v3057_v63 }
 0x2a9   :  { %v4332_v8 = vadd.f32 %v2983_v51, %v6227_v57  ;;  %3407 = vmatprep.mubr.f32.mxu1 %v3059_v61  ;;  %3263 = vmatmul.mubr.f32.gmra.mrb[110].mxu0 %v3056_v29  ;;  %v3060_v26 = vmax.f32 %v4299_v50, 0.0 }
 0x2aa   :  { %v3061_v30 = vmax.f32 %v4300_v42, 0.0  ;;  %3408 = vmatmul.mubr.f32.gmra.mrb[110].mxu1 %v3058_v7  ;;  %v2343_v53 = vpop.f32.mrb[82].mxu0  ;;  %v3062_v15 = vmax.f32 %v4331_v21, 0.0 }
 0x2ab   :  { %v3063_v27 = vmax.f32 %v4332_v8, 0.0  ;;  %v4301_v14 = vadd.f32 %v2343_v53, %v6215_v13  ;;  %v2987_v54 = vpop.f32.mrb[82].mxu1  ;;  %v2345_v47 = vpop.f32.mrb[83].mxu0 }
 0x2ac   :  { %v4333_v23 = vadd.f32 %v2987_v54, %v6219_v12  ;;  %v4302_v46 = vadd.f32 %v2345_v47, %v6223_v55  ;;  %v2989_v34 = vpop.f32.mrb[83].mxu1  ;;  %3267 = vmatprep.mubr.f32.mxu0 %v3061_v30 }
 0x2ad   :  { %v4334_v2 = vadd.f32 %v2989_v34, %v6227_v57  ;;  %3412 = vmatprep.mubr.f32.mxu1 %v3063_v27  ;;  %3268 = vmatmul.mubr.f32.gmra.mrb[112].mxu0 %v3060_v26  ;;  %v3064_v59 = vmax.f32 %v4301_v14, 0.0 }
 0x2ae   :  { %v3065_v22 = vmax.f32 %v4302_v46, 0.0  ;;  %3413 = vmatmul.mubr.f32.gmra.mrb[112].mxu1 %v3062_v15  ;;  %v2349_v35 = vpop.f32.mrb[84].mxu0  ;;  %v3066_v48 = vmax.f32 %v4333_v23, 0.0 }
 0x2af   :  { %v3067_v20 = vmax.f32 %v4334_v2, 0.0  ;;  %v4303_v4 = vadd.f32 %v2349_v35, %v6215_v13  ;;  %v2993_v6 = vpop.f32.mrb[84].mxu1  ;;  %v2351_v58 = vpop.f32.mrb[85].mxu0 }
 0x2b0   :  { %v4335_v36 = vadd.f32 %v2993_v6, %v6219_v12  ;;  %v4304_v37 = vadd.f32 %v2351_v58, %v6223_v55  ;;  %v2995_v5 = vpop.f32.mrb[85].mxu1  ;;  %3272 = vmatprep.mubr.f32.mxu0 %v3065_v22 }
 0x2b1   :  { %v4336_v24 = vadd.f32 %v2995_v5, %v6227_v57  ;;  %3417 = vmatprep.mubr.f32.mxu1 %v3067_v20  ;;  %3273 = vmatmul.mubr.f32.gmra.mrb[114].mxu0 %v3064_v59  ;;  %v3068_v1 = vmax.f32 %v4303_v4, 0.0 }
 0x2b2   :  { %v3069_v25 = vmax.f32 %v4304_v37, 0.0  ;;  %3418 = vmatmul.mubr.f32.gmra.mrb[114].mxu1 %v3066_v48  ;;  %v2355_v28 = vpop.f32.mrb[86].mxu0  ;;  %v3070_v11 = vmax.f32 %v4335_v36, 0.0 }
 0x2b3   :  { %v3071_v18 = vmax.f32 %v4336_v24, 0.0  ;;  %v4305_v32 = vadd.f32 %v2355_v28, %v6215_v13  ;;  %v2999_v60 = vpop.f32.mrb[86].mxu1  ;;  %v2357_v33 = vpop.f32.mrb[87].mxu0 }
 0x2b4   :  { %v4337_v19 = vadd.f32 %v2999_v60, %v6219_v12  ;;  %v4306_v43 = vadd.f32 %v2357_v33, %v6223_v55  ;;  %v3001_v44 = vpop.f32.mrb[87].mxu1  ;;  %3277 = vmatprep.mubr.f32.mxu0 %v3069_v25 }
 0x2b5   :  { %v4338_v31 = vadd.f32 %v3001_v44, %v6227_v57  ;;  %3422 = vmatprep.mubr.f32.mxu1 %v3071_v18  ;;  %3278 = vmatmul.mubr.f32.gmra.mrb[116].mxu0 %v3068_v1  ;;  %v3072_v39 = vmax.f32 %v4305_v32, 0.0 }
 0x2b6   :  { %v3073_v49 = vmax.f32 %v4306_v43, 0.0  ;;  %3423 = vmatmul.mubr.f32.gmra.mrb[116].mxu1 %v3070_v11  ;;  %v2361_v40 = vpop.f32.mrb[88].mxu0  ;;  %v3074_v0 = vmax.f32 %v4337_v19, 0.0 }
 0x2b7   :  { %v3075_v9 = vmax.f32 %v4338_v31, 0.0  ;;  %v4307_v52 = vadd.f32 %v2361_v40, %v6215_v13  ;;  %v3005_v56 = vpop.f32.mrb[88].mxu1  ;;  %v2363_v3 = vpop.f32.mrb[89].mxu0 }
 0x2b8   :  { %v4339_v62 = vadd.f32 %v3005_v56, %v6219_v12  ;;  %v4308_v10 = vadd.f32 %v2363_v3, %v6223_v55  ;;  %v3007_v17 = vpop.f32.mrb[89].mxu1  ;;  %3282 = vmatprep.mubr.f32.mxu0 %v3073_v49 }
 0x2b9   :  { %v4340_v16 = vadd.f32 %v3007_v17, %v6227_v57  ;;  %3427 = vmatprep.mubr.f32.mxu1 %v3075_v9  ;;  %3283 = vmatmul.mubr.f32.gmra.mrb[118].mxu0 %v3072_v39  ;;  %v3076_v29 = vmax.f32 %v4307_v52, 0.0 }
 0x2ba   :  { %v3077_v63 = vmax.f32 %v4308_v10, 0.0  ;;  %3428 = vmatmul.mubr.f32.gmra.mrb[118].mxu1 %v3074_v0  ;;  %v2367_v38 = vpop.f32.mrb[90].mxu0  ;;  %v3078_v7 = vmax.f32 %v4339_v62, 0.0 }
 0x2bb   :  { %v3079_v61 = vmax.f32 %v4340_v16, 0.0  ;;  %v4309_v50 = vadd.f32 %v2367_v38, %v6215_v13  ;;  %v3011_v41 = vpop.f32.mrb[90].mxu1  ;;  %v2369_v45 = vpop.f32.mrb[91].mxu0 }
 0x2bc   :  { %v4341_v21 = vadd.f32 %v3011_v41, %v6219_v12  ;;  %v4310_v42 = vadd.f32 %v2369_v45, %v6223_v55  ;;  %v3013_v51 = vpop.f32.mrb[91].mxu1  ;;  %3287 = vmatprep.mubr.f32.mxu0 %v3077_v63 }
 0x2bd   :  { %v4342_v8 = vadd.f32 %v3013_v51, %v6227_v57  ;;  %3432 = vmatprep.mubr.f32.mxu1 %v3079_v61  ;;  %3288 = vmatmul.mubr.f32.gmra.mrb[120].mxu0 %v3076_v29  ;;  %v3080_v26 = vmax.f32 %v4309_v50, 0.0 }
 0x2be   :  { %v3081_v30 = vmax.f32 %v4310_v42, 0.0  ;;  %3433 = vmatmul.mubr.f32.gmra.mrb[120].mxu1 %v3078_v7  ;;  %v2373_v53 = vpop.f32.mrb[92].mxu0  ;;  %v3082_v15 = vmax.f32 %v4341_v21, 0.0 }
 0x2bf   :  { %v3083_v27 = vmax.f32 %v4342_v8, 0.0  ;;  %v4311_v14 = vadd.f32 %v2373_v53, %v6215_v13  ;;  %v3017_v54 = vpop.f32.mrb[92].mxu1  ;;  %v2375_v47 = vpop.f32.mrb[93].mxu0 }
 0x2c0   :  { %v4343_v23 = vadd.f32 %v3017_v54, %v6219_v12  ;;  %v4312_v46 = vadd.f32 %v2375_v47, %v6223_v55  ;;  %v3019_v34 = vpop.f32.mrb[93].mxu1  ;;  %3292 = vmatprep.mubr.f32.mxu0 %v3081_v30 }
 0x2c1   :  { %v4344_v2 = vadd.f32 %v3019_v34, %v6227_v57  ;;  %3437 = vmatprep.mubr.f32.mxu1 %v3083_v27  ;;  %3293 = vmatmul.mubr.f32.gmra.mrb[122].mxu0 %v3080_v26  ;;  %v3084_v59 = vmax.f32 %v4311_v14, 0.0 }
 0x2c2   :  { %v3085_v22 = vmax.f32 %v4312_v46, 0.0  ;;  %3438 = vmatmul.mubr.f32.gmra.mrb[122].mxu1 %v3082_v15  ;;  %v2379_v35 = vpop.f32.mrb[94].mxu0  ;;  %v3086_v48 = vmax.f32 %v4343_v23, 0.0 }
 0x2c3   :  { %v3087_v20 = vmax.f32 %v4344_v2, 0.0  ;;  %v4313_v4 = vadd.f32 %v2379_v35, %v6215_v13  ;;  %v3023_v6 = vpop.f32.mrb[94].mxu1  ;;  %v2381_v58 = vpop.f32.mrb[95].mxu0 }
 0x2c4   :  { %v4345_v36 = vadd.f32 %v3023_v6, %v6219_v12  ;;  %v4314_v37 = vadd.f32 %v2381_v58, %v6223_v55  ;;  %v3025_v5 = vpop.f32.mrb[95].mxu1  ;;  %3297 = vmatprep.mubr.f32.mxu0 %v3085_v22  ;;  %v6296_v12 = vld [vmem:[%s6368_s6] ss:$0 sm:$0xff] }
 0x2c5   :  { %v4346_v24 = vadd.f32 %v3025_v5, %v6227_v57  ;;  %3442 = vmatprep.mubr.f32.mxu1 %v3087_v20  ;;  %3298 = vmatmul.mubr.f32.gmra.mrb[124].mxu0 %v3084_v59  ;;  %v3088_v28 = vmax.f32 %v4313_v4, 0.0 }
 0x2c6   :  { %v3089_v25 = vmax.f32 %v4314_v37, 0.0  ;;  %3443 = vmatmul.mubr.f32.gmra.mrb[124].mxu1 %v3086_v48  ;;  %v3090_v18 = vmax.f32 %v4345_v36, 0.0 }
 0x2c7   :  { %v3091_v1 = vmax.f32 %v4346_v24, 0.0 }
 0x2c8   :  { %3302 = vmatprep.mubr.f32.mxu0 %v3089_v25 }
 0x2c9   :  { %3447 = vmatprep.mubr.f32.mxu1 %v3091_v1  ;;  %3303 = vmatmul.mubr.f32.gmra.mrb[126].mxu0 %v3088_v28 }
 0x2ca   :  { %3448 = vmatmul.mubr.f32.gmra.mrb[126].mxu1 %v3090_v18 }
 0x360   :  { %v3579_v13 = vpop.f32.mrb[96].mxu0 }
 0x361   :  { %v3659_v32 = vpop.f32.mrb[96].mxu1  ;;  %v3580_v55 = vpop.f32.mrb[97].mxu0 }
 0x362   :  { %v3581_v57 = vadd.f32 %v3580_v55, %v3579_v13  ;;  %v3660_v60 = vpop.f32.mrb[97].mxu1 }
 0x363   :  { %v3661_v33 = vadd.f32 %v3660_v60, %v3659_v32 }
 0x364   :  { %v3230_v11 = vadd.f32 %v3581_v57, %v6296_v12  ;;  %v3582_v19 = vpop.f32.mrb[98].mxu0 }
 0x365   :  { %v3662_v43 = vpop.f32.mrb[98].mxu1  ;;  %v3583_v44 = vpop.f32.mrb[99].mxu0 }
 0x366   :  { %v3375_v31 = vadd.f32 %v3661_v33, %v3230_v11  ;;  %v3584_v49 = vadd.f32 %v3583_v44, %v3582_v19  ;;  %v3663_v40 = vpop.f32.mrb[99].mxu1 }
 0x367   :  { %v3664_v39 = vadd.f32 %v3663_v40, %v3662_v43 }
 0x368   :  { %3453 = vst [vmem:[%s6369_s7] sm:$0xff] %v3375_v31  ;;  %v3235_v9 = vadd.f32 %v3584_v49, %v6296_v12  ;;  %v3585_v52 = vpop.f32.mrb[100].mxu0 }
 0x369   :  { %v3665_v56 = vpop.f32.mrb[100].mxu1  ;;  %v3586_v3 = vpop.f32.mrb[101].mxu0 }
 0x36a   :  { %v3380_v0 = vadd.f32 %v3664_v39, %v3235_v9  ;;  %v3587_v62 = vadd.f32 %v3586_v3, %v3585_v52  ;;  %v3666_v10 = vpop.f32.mrb[101].mxu1 }
 0x36b   :  { %v3667_v17 = vadd.f32 %v3666_v10, %v3665_v56 }
 0x36c   :  { %3454 = vst [vmem:[%s6369_s7 + $0x8] sm:$0xff] %v3380_v0  ;;  %v3240_v16 = vadd.f32 %v3587_v62, %v6296_v12  ;;  %v3588_v63 = vpop.f32.mrb[102].mxu0 }
 0x36d   :  { %v3668_v38 = vpop.f32.mrb[102].mxu1  ;;  %v3589_v29 = vpop.f32.mrb[103].mxu0 }
 0x36e   :  { %v3385_v61 = vadd.f32 %v3667_v17, %v3240_v16  ;;  %v3590_v50 = vadd.f32 %v3589_v29, %v3588_v63  ;;  %v3669_v41 = vpop.f32.mrb[103].mxu1 }
 0x36f   :  { %v3670_v45 = vadd.f32 %v3669_v41, %v3668_v38 }
 0x370   :  { %3455 = vst [vmem:[%s6369_s7 + $0x10] sm:$0xff] %v3385_v61  ;;  %v3245_v7 = vadd.f32 %v3590_v50, %v6296_v12  ;;  %v3591_v21 = vpop.f32.mrb[104].mxu0 }
 0x371   :  { %v3671_v42 = vpop.f32.mrb[104].mxu1  ;;  %v3592_v51 = vpop.f32.mrb[105].mxu0 }
 0x372   :  { %v3390_v8 = vadd.f32 %v3670_v45, %v3245_v7  ;;  %v3593_v30 = vadd.f32 %v3592_v51, %v3591_v21  ;;  %v3672_v53 = vpop.f32.mrb[105].mxu1 }
 0x373   :  { %v3673_v26 = vadd.f32 %v3672_v53, %v3671_v42 }
 0x374   :  { %3456 = vst [vmem:[%s6369_s7 + $0x18] sm:$0xff] %v3390_v8  ;;  %v3250_v27 = vadd.f32 %v3593_v30, %v6296_v12  ;;  %v3594_v14 = vpop.f32.mrb[106].mxu0 }
 0x375   :  { %v3674_v54 = vpop.f32.mrb[106].mxu1  ;;  %v3595_v47 = vpop.f32.mrb[107].mxu0 }
 0x376   :  { %v3395_v15 = vadd.f32 %v3673_v26, %v3250_v27  ;;  %v3596_v23 = vadd.f32 %v3595_v47, %v3594_v14  ;;  %v3675_v46 = vpop.f32.mrb[107].mxu1 }
 0x377   :  { %v3676_v34 = vadd.f32 %v3675_v46, %v3674_v54 }
 0x378   :  { %3457 = vst [vmem:[%s6369_s7 + $0x20] sm:$0xff] %v3395_v15  ;;  %v3255_v2 = vadd.f32 %v3596_v23, %v6296_v12  ;;  %v3597_v22 = vpop.f32.mrb[108].mxu0 }
 0x379   :  { %v3677_v35 = vpop.f32.mrb[108].mxu1  ;;  %v3598_v59 = vpop.f32.mrb[109].mxu0 }
 0x37a   :  { %v3400_v20 = vadd.f32 %v3676_v34, %v3255_v2  ;;  %v3599_v4 = vadd.f32 %v3598_v59, %v3597_v22  ;;  %v3678_v6 = vpop.f32.mrb[109].mxu1 }
 0x37b   :  { %v3679_v58 = vadd.f32 %v3678_v6, %v3677_v35 }
 0x37c   :  { %3458 = vst [vmem:[%s6369_s7 + $0x28] sm:$0xff] %v3400_v20  ;;  %v3260_v48 = vadd.f32 %v3599_v4, %v6296_v12  ;;  %v3600_v36 = vpop.f32.mrb[110].mxu0 }
 0x37d   :  { %v3680_v37 = vpop.f32.mrb[110].mxu1  ;;  %v3601_v5 = vpop.f32.mrb[111].mxu0 }
 0x37e   :  { %v3405_v24 = vadd.f32 %v3679_v58, %v3260_v48  ;;  %v3602_v25 = vadd.f32 %v3601_v5, %v3600_v36  ;;  %v3681_v28 = vpop.f32.mrb[111].mxu1 }
 0x37f   :  { %v3682_v1 = vadd.f32 %v3681_v28, %v3680_v37 }
 0x380   :  { %3459 = vst [vmem:[%s6369_s7 + $0x30] sm:$0xff] %v3405_v24  ;;  %v3265_v18 = vadd.f32 %v3602_v25, %v6296_v12  ;;  %v3603_v13 = vpop.f32.mrb[112].mxu0 }
 0x381   :  { %v3683_v32 = vpop.f32.mrb[112].mxu1  ;;  %v3604_v55 = vpop.f32.mrb[113].mxu0 }
 0x382   :  { %v3410_v57 = vadd.f32 %v3682_v1, %v3265_v18  ;;  %v3605_v60 = vadd.f32 %v3604_v55, %v3603_v13  ;;  %v3684_v33 = vpop.f32.mrb[113].mxu1 }
 0x383   :  { %v3685_v11 = vadd.f32 %v3684_v33, %v3683_v32 }
 0x384   :  { %3460 = vst [vmem:[%s6369_s7 + $0x38] sm:$0xff] %v3410_v57  ;;  %v3270_v19 = vadd.f32 %v3605_v60, %v6296_v12  ;;  %v3606_v43 = vpop.f32.mrb[114].mxu0 }
 0x385   :  { %v3686_v44 = vpop.f32.mrb[114].mxu1  ;;  %v3607_v31 = vpop.f32.mrb[115].mxu0 }
 0x386   :  { %v3415_v49 = vadd.f32 %v3685_v11, %v3270_v19  ;;  %v3608_v40 = vadd.f32 %v3607_v31, %v3606_v43  ;;  %v3687_v39 = vpop.f32.mrb[115].mxu1 }
 0x387   :  { %v3688_v9 = vadd.f32 %v3687_v39, %v3686_v44 }
 0x388   :  { %3461 = vst [vmem:[%s6369_s7 + $0x40] sm:$0xff] %v3415_v49  ;;  %v3275_v52 = vadd.f32 %v3608_v40, %v6296_v12  ;;  %v3609_v56 = vpop.f32.mrb[116].mxu0 }
 0x389   :  { %v3689_v3 = vpop.f32.mrb[116].mxu1  ;;  %v3610_v0 = vpop.f32.mrb[117].mxu0 }
 0x38a   :  { %v3420_v62 = vadd.f32 %v3688_v9, %v3275_v52  ;;  %v3611_v10 = vadd.f32 %v3610_v0, %v3609_v56  ;;  %v3690_v17 = vpop.f32.mrb[117].mxu1 }
 0x38b   :  { %v3691_v16 = vadd.f32 %v3690_v17, %v3689_v3 }
 0x38c   :  { %3462 = vst [vmem:[%s6369_s7 + $0x48] sm:$0xff] %v3420_v62  ;;  %v3280_v63 = vadd.f32 %v3611_v10, %v6296_v12  ;;  %v3612_v38 = vpop.f32.mrb[118].mxu0 }
 0x38d   :  { %v3692_v29 = vpop.f32.mrb[118].mxu1  ;;  %v3613_v61 = vpop.f32.mrb[119].mxu0 }
 0x38e   :  { %v3425_v50 = vadd.f32 %v3691_v16, %v3280_v63  ;;  %v3614_v41 = vadd.f32 %v3613_v61, %v3612_v38  ;;  %v3693_v45 = vpop.f32.mrb[119].mxu1 }
 0x38f   :  { %v3694_v7 = vadd.f32 %v3693_v45, %v3692_v29 }
 0x390   :  { %3463 = vst [vmem:[%s6369_s7 + $0x50] sm:$0xff] %v3425_v50  ;;  %v3285_v21 = vadd.f32 %v3614_v41, %v6296_v12  ;;  %v3615_v42 = vpop.f32.mrb[120].mxu0 }
 0x391   :  { %v3695_v51 = vpop.f32.mrb[120].mxu1  ;;  %v3616_v8 = vpop.f32.mrb[121].mxu0 }
 0x392   :  { %v3430_v30 = vadd.f32 %v3694_v7, %v3285_v21  ;;  %v3617_v53 = vadd.f32 %v3616_v8, %v3615_v42  ;;  %v3696_v26 = vpop.f32.mrb[121].mxu1 }
 0x393   :  { %v3697_v27 = vadd.f32 %v3696_v26, %v3695_v51 }
 0x394   :  { %3464 = vst [vmem:[%s6369_s7 + $0x58] sm:$0xff] %v3430_v30  ;;  %v3290_v14 = vadd.f32 %v3617_v53, %v6296_v12  ;;  %v3618_v54 = vpop.f32.mrb[122].mxu0 }
 0x395   :  { %v3698_v47 = vpop.f32.mrb[122].mxu1  ;;  %v3619_v15 = vpop.f32.mrb[123].mxu0 }
 0x396   :  { %v3435_v23 = vadd.f32 %v3697_v27, %v3290_v14  ;;  %v3620_v46 = vadd.f32 %v3619_v15, %v3618_v54  ;;  %v3699_v34 = vpop.f32.mrb[123].mxu1 }
 0x397   :  { %v3700_v2 = vadd.f32 %v3699_v34, %v3698_v47 }
 0x398   :  { %3465 = vst [vmem:[%s6369_s7 + $0x60] sm:$0xff] %v3435_v23  ;;  %v3295_v22 = vadd.f32 %v3620_v46, %v6296_v12  ;;  %v3621_v35 = vpop.f32.mrb[124].mxu0 }
 0x399   :  { %v3701_v59 = vpop.f32.mrb[124].mxu1  ;;  %v3622_v20 = vpop.f32.mrb[125].mxu0 }
 0x39a   :  { %v3440_v4 = vadd.f32 %v3700_v2, %v3295_v22  ;;  %v3623_v6 = vadd.f32 %v3622_v20, %v3621_v35  ;;  %v3702_v58 = vpop.f32.mrb[125].mxu1 }
 0x39b   :  { %v3703_v48 = vadd.f32 %v3702_v58, %v3701_v59 }
 0x39c   :  { %3466 = vst [vmem:[%s6369_s7 + $0x68] sm:$0xff] %v3440_v4  ;;  %v3300_v36 = vadd.f32 %v3623_v6, %v6296_v12  ;;  %v3624_v37 = vpop.f32.mrb[126].mxu0 }
 0x39d   :  { %v3704_v5 = vpop.f32.mrb[126].mxu1  ;;  %v3625_v24 = vpop.f32.mrb[127].mxu0 }
 0x39e   :  { %v3445_v25 = vadd.f32 %v3703_v48, %v3300_v36  ;;  %v3626_v28 = vadd.f32 %v3625_v24, %v3624_v37  ;;  %v3705_v1 = vpop.f32.mrb[127].mxu1 }
 0x39f   :  { %v3706_v18 = vadd.f32 %v3705_v1, %v3704_v5 }
 0x3a0   :  { %3467 = vst [vmem:[%s6369_s7 + $0x70] sm:$0xff] %v3445_v25  ;;  %v3305_v13 = vadd.f32 %v3626_v28, %v6296_v12 }
 0x3a2   :  { %v3450_v32 = vadd.f32 %v3706_v18, %v3305_v13 }
 0x3a4   :  { %3468 = vst [vmem:[%s6369_s7 + $0x78] sm:$0xff] %v3450_v32 }
 0x3a5   :  { %3473 = vsyncpa [#allocation3], 1 }

</bundles_post_ra>
